<compile_context>
chip_gen: v7x
topology: tpu7x:2x2x1
jax: 0.10.0
libtpu: 0.0.40
codegen_flags: <defaults>
</compile_context>

<pallas_src>
import jax
import jax.numpy as jnp
from jax.experimental import pallas as pl
from jax.experimental.pallas import tpu as pltpu

N_FEATURES = 100
N_FEATURES_PAD = 128        # 100 -> 128: lane-aligned K for the first matmul
H0, H1, H2 = 256, 512, 1024
N_OUT = 784
N_OUT_PAD = 896             # 784 -> 7*128: unmasked lane-dense output stores
NEG_SLOPE = 0.2


def _leaky_relu(h):
    # max(h, 0.2*h) == LeakyReLU(0.2) for slope < 1; 2 VALU ops vs cmp+select.
    return jnp.maximum(h, NEG_SLOPE * h)


def generator_kernel(x_ref,
                     w0_ref, b0_ref,
                     w1_ref, b1_ref,
                     w2_ref, b2_ref,
                     w3_ref, b3_ref,
                     out_ref):
    # Matmuls run bf16 x bf16 on the MXU with f32 accumulation; bias add and
    # activations are f32, then re-cast to bf16 for the next layer.
    h = jnp.dot(x_ref[...], w0_ref[...], preferred_element_type=jnp.float32) + b0_ref[...]
    h = _leaky_relu(h).astype(jnp.bfloat16)
    h = jnp.dot(h, w1_ref[...], preferred_element_type=jnp.float32) + b1_ref[...]
    h = _leaky_relu(h).astype(jnp.bfloat16)
    h = jnp.dot(h, w2_ref[...], preferred_element_type=jnp.float32) + b2_ref[...]
    h = _leaky_relu(h).astype(jnp.bfloat16)
    h = jnp.dot(h, w3_ref[...], preferred_element_type=jnp.float32) + b3_ref[...]
    # f32 tanh (EUP-safe on v5e as well), bf16 store halves HBM writeback.
    out_ref[...] = jnp.tanh(h).astype(jnp.bfloat16)


def _round_up(x, m):
    return ((x + m - 1) // m) * m


def _pinned_spec(shape):
    """Constant-index block: stays resident in VMEM. Single-buffered when supported."""
    idx = lambda i: (0, 0)
    try:
        return pl.BlockSpec(shape, idx, pipeline_mode=pl.Buffered(1))
    except Exception:  # older JAX without pipeline_mode / Buffered
        return pl.BlockSpec(shape, idx)


def prepare_params(params):
    """One-time parameter prep: zero-pad to lane-aligned shapes and cast weights to bf16.

    Do this ONCE (outside the training/inference hot loop) and pass the result to
    generator_forward. Padding with zeros is mathematically a no-op.
    """
    w0, b0 = params["hid0"]
    w1, b1 = params["hid1"]
    w2, b2 = params["hid2"]
    w3, b3 = params["out"]

    w0_p = jnp.pad(w0.astype(jnp.bfloat16), ((0, N_FEATURES_PAD - N_FEATURES), (0, 0)))
    w1_p = w1.astype(jnp.bfloat16)
    w2_p = w2.astype(jnp.bfloat16)
    w3_p = jnp.pad(w3.astype(jnp.bfloat16), ((0, 0), (0, N_OUT_PAD - N_OUT)))
    b3_p = jnp.pad(b3.astype(jnp.float32), ((0, 0), (0, N_OUT_PAD - N_OUT)))
    return {
        "w0": w0_p, "b0": b0.astype(jnp.float32),
        "w1": w1_p, "b1": b1.astype(jnp.float32),
        "w2": w2_p, "b2": b2.astype(jnp.float32),
        "w3": w3_p, "b3": b3_p,
    }


def _pick_tb(B, tb):
    if tb is None:
        tb = 1024 if B >= 4096 else 512
    return min(tb, _round_up(B, 8))


def generator_forward(x, prepared, *, tb=None):
    """x: (B, 100) float32. prepared: output of prepare_params(). Returns (B, 784) bf16."""
    B = x.shape[0]
    TB = _pick_tb(B, tb)
    B_pad = _round_up(B, TB)
    grid = (B_pad // TB,)

    # Single fused pad of the input (batch rows to B_pad, features to 128).
    x_p = jnp.pad(x.astype(jnp.bfloat16),
                  ((0, B_pad - B), (0, N_FEATURES_PAD - N_FEATURES)))

    w0_p, b0 = prepared["w0"], prepared["b0"]
    w1_p, b1 = prepared["w1"], prepared["b1"]
    w2_p, b2 = prepared["w2"], prepared["b2"]
    w3_p, b3_p = prepared["w3"], prepared["b3"]

    act_spec = lambda cols: pl.BlockSpec((TB, cols), lambda i: (i, 0))

    flops = 2 * B_pad * (N_FEATURES_PAD * H0 + H0 * H1 + H1 * H2 + H2 * N_OUT_PAD)
    bytes_accessed = (
        x_p.size * 2
        + (w0_p.size + w1_p.size + w2_p.size + w3_p.size) * 2
        + (b0.size + b1.size + b2.size + b3_p.size) * 4
        + B_pad * N_OUT_PAD * 2
    )

    out_pad = pl.pallas_call(
        generator_kernel,
        out_shape=jax.ShapeDtypeStruct((B_pad, N_OUT_PAD), jnp.bfloat16),
        grid=grid,
        in_specs=[
            act_spec(N_FEATURES_PAD),
            _pinned_spec(w0_p.shape), _pinned_spec(b0.shape),
            _pinned_spec(w1_p.shape), _pinned_spec(b1.shape),
            _pinned_spec(w2_p.shape), _pinned_spec(b2.shape),
            _pinned_spec(w3_p.shape), _pinned_spec(b3_p.shape),
        ],
        out_specs=act_spec(N_OUT_PAD),
        compiler_params=pltpu.CompilerParams(
            dimension_semantics=("parallel",),
            vmem_limit_bytes=32 << 20,     # tight, accurate budget; fits v7x 64 MiB
        ),
        cost_estimate=pl.CostEstimate(
            flops=flops,
            transcendentals=B_pad * N_OUT_PAD,
            bytes_accessed=bytes_accessed,
        ),
    )(x_p, w0_p, b0, w1_p, b1, w2_p, b2, w3_p, b3_p)

    return out_pad[:B, :N_OUT]


def init_params(key):
    """Deterministic init mimicking nn.Linear's uniform(-1/sqrt(fan_in), 1/sqrt(fan_in))."""
    dims = [(N_FEATURES, H0), (H0, H1), (H1, H2), (H2, N_OUT)]
    names = ["hid0", "hid1", "hid2", "out"]
    params = {}
    for name, (fan_in, fan_out) in zip(names, dims):
        key, kw, kb = jax.random.split(key, 3)
        bound = 1.0 / jnp.sqrt(fan_in)
        w = jax.random.uniform(kw, (fan_in, fan_out), jnp.float32, -bound, bound)
        b = jax.random.uniform(kb, (1, fan_out), jnp.float32, -bound, bound)
        params[name] = (w, b)
    return params


def reference_forward(x, params):
    """Pure-JAX reference mirroring the kernel's bf16 compute / f32 accumulation."""
    h = x.astype(jnp.bfloat16)
    for name in ["hid0", "hid1", "hid2"]:
        w, b = params[name]
        h = jnp.dot(h, w.astype(jnp.bfloat16), preferred_element_type=jnp.float32) + b
        h = jnp.maximum(h, NEG_SLOPE * h).astype(jnp.bfloat16)
    w, b = params["out"]
    return jnp.tanh(
        jnp.dot(h, w.astype(jnp.bfloat16), preferred_element_type=jnp.float32) + b)


if __name__ == "__main__":
    key = jax.random.PRNGKey(0)
    key, kx = jax.random.split(key)
    batch = 8
    x = jax.random.normal(kx, (batch, N_FEATURES), jnp.float32)
    params = init_params(key)
    prepared = prepare_params(params)   # one-time, outside the hot path

    out = generator_forward(x, prepared)
    out = jax.block_until_ready(out)

    ref = reference_forward(x, params)
    assert out.shape == (batch, N_OUT), out.shape
    err = float(jnp.max(jnp.abs(out.astype(jnp.float32) - ref.astype(jnp.float32))))
    assert err < 2e-2, err

    print("KERNEL_OK")
</pallas_src>

<mosaic_0001>
module attributes {stable_mosaic.version = 11 : i64} {
  func.func @generator_kernel(%arg0: i32, %arg1: memref<8x128xbf16, #tpu.memory_space<vmem>>, %arg2: memref<128x256xbf16, #tpu.memory_space<vmem>>, %arg3: memref<1x256xf32, #tpu.memory_space<vmem>>, %arg4: memref<256x512xbf16, #tpu.memory_space<vmem>>, %arg5: memref<1x512xf32, #tpu.memory_space<vmem>>, %arg6: memref<512x1024xbf16, #tpu.memory_space<vmem>>, %arg7: memref<1x1024xf32, #tpu.memory_space<vmem>>, %arg8: memref<1024x896xbf16, #tpu.memory_space<vmem>>, %arg9: memref<1x896xf32, #tpu.memory_space<vmem>>, %arg10: memref<8x896xbf16, #tpu.memory_space<vmem>>) attributes {dimension_semantics = [#tpu.dimension_semantics<parallel>], iteration_bounds = array<i64: 1>, scalar_prefetch = 0 : i64, scratch_operands = 0 : i64, tpu.core_type = #tpu.core_type<tc>, window_params = [{transform_indices = @transform_0, window_bounds = array<i64: 8, 128>}, {pipeline_mode = #tpu.pipeline_mode<synchronous>, transform_indices = @transform_1, window_bounds = array<i64: 128, 256>}, {pipeline_mode = #tpu.pipeline_mode<synchronous>, transform_indices = @transform_2, window_bounds = array<i64: 1, 256>}, {pipeline_mode = #tpu.pipeline_mode<synchronous>, transform_indices = @transform_3, window_bounds = array<i64: 256, 512>}, {pipeline_mode = #tpu.pipeline_mode<synchronous>, transform_indices = @transform_4, window_bounds = array<i64: 1, 512>}, {pipeline_mode = #tpu.pipeline_mode<synchronous>, transform_indices = @transform_5, window_bounds = array<i64: 512, 1024>}, {pipeline_mode = #tpu.pipeline_mode<synchronous>, transform_indices = @transform_6, window_bounds = array<i64: 1, 1024>}, {pipeline_mode = #tpu.pipeline_mode<synchronous>, transform_indices = @transform_7, window_bounds = array<i64: 1024, 896>}, {pipeline_mode = #tpu.pipeline_mode<synchronous>, transform_indices = @transform_8, window_bounds = array<i64: 1, 896>}, {transform_indices = @transform_9, window_bounds = array<i64: 8, 896>}]} {
    %c0 = arith.constant 0 : index
    %c0_0 = arith.constant 0 : index
    %0 = vector.load %arg1[%c0, %c0_0] : memref<8x128xbf16, #tpu.memory_space<vmem>>, vector<8x128xbf16>
    %c0_1 = arith.constant 0 : index
    %c0_2 = arith.constant 0 : index
    %1 = vector.load %arg2[%c0_1, %c0_2] : memref<128x256xbf16, #tpu.memory_space<vmem>>, vector<128x256xbf16>
    %cst = arith.constant dense<0.000000e+00> : vector<8x256xf32>
    %2 = tpu.matmul %0, %1, %cst {dimension_numbers = #tpu.dot_dimension_numbers<[1], [0], [0], [1], [0, 0, 1, 1], [], []>} : vector<8x128xbf16>, vector<128x256xbf16>, vector<8x256xf32> -> vector<8x256xf32>
    %c0_3 = arith.constant 0 : index
    %c0_4 = arith.constant 0 : index
    %3 = vector.load %arg3[%c0_3, %c0_4] : memref<1x256xf32, #tpu.memory_space<vmem>>, vector<1x256xf32>
    %4 = vector.broadcast %3 : vector<1x256xf32> to vector<8x256xf32>
    %5 = arith.addf %2, %4 : vector<8x256xf32>
    %cst_5 = arith.constant 2.000000e-01 : f32
    %6 = vector.broadcast %cst_5 : f32 to vector<8x256xf32>
    %7 = arith.mulf %6, %5 : vector<8x256xf32>
    %8 = arith.maximumf %5, %7 : vector<8x256xf32>
    %9 = arith.truncf %8 : vector<8x256xf32> to vector<8x256xbf16>
    %c0_6 = arith.constant 0 : index
    %c0_7 = arith.constant 0 : index
    %10 = vector.load %arg4[%c0_6, %c0_7] : memref<256x512xbf16, #tpu.memory_space<vmem>>, vector<256x512xbf16>
    %cst_8 = arith.constant dense<0.000000e+00> : vector<8x512xf32>
    %11 = tpu.matmul %9, %10, %cst_8 {dimension_numbers = #tpu.dot_dimension_numbers<[1], [0], [0], [1], [0, 0, 1, 1], [], []>} : vector<8x256xbf16>, vector<256x512xbf16>, vector<8x512xf32> -> vector<8x512xf32>
    %c0_9 = arith.constant 0 : index
    %c0_10 = arith.constant 0 : index
    %12 = vector.load %arg5[%c0_9, %c0_10] : memref<1x512xf32, #tpu.memory_space<vmem>>, vector<1x512xf32>
    %13 = vector.broadcast %12 : vector<1x512xf32> to vector<8x512xf32>
    %14 = arith.addf %11, %13 : vector<8x512xf32>
    %cst_11 = arith.constant 2.000000e-01 : f32
    %15 = vector.broadcast %cst_11 : f32 to vector<8x512xf32>
    %16 = arith.mulf %15, %14 : vector<8x512xf32>
    %17 = arith.maximumf %14, %16 : vector<8x512xf32>
    %18 = arith.truncf %17 : vector<8x512xf32> to vector<8x512xbf16>
    %c0_12 = arith.constant 0 : index
    %c0_13 = arith.constant 0 : index
    %19 = vector.load %arg6[%c0_12, %c0_13] : memref<512x1024xbf16, #tpu.memory_space<vmem>>, vector<512x1024xbf16>
    %cst_14 = arith.constant dense<0.000000e+00> : vector<8x1024xf32>
    %20 = tpu.matmul %18, %19, %cst_14 {dimension_numbers = #tpu.dot_dimension_numbers<[1], [0], [0], [1], [0, 0, 1, 1], [], []>} : vector<8x512xbf16>, vector<512x1024xbf16>, vector<8x1024xf32> -> vector<8x1024xf32>
    %c0_15 = arith.constant 0 : index
    %c0_16 = arith.constant 0 : index
    %21 = vector.load %arg7[%c0_15, %c0_16] : memref<1x1024xf32, #tpu.memory_space<vmem>>, vector<1x1024xf32>
    %22 = vector.broadcast %21 : vector<1x1024xf32> to vector<8x1024xf32>
    %23 = arith.addf %20, %22 : vector<8x1024xf32>
    %cst_17 = arith.constant 2.000000e-01 : f32
    %24 = vector.broadcast %cst_17 : f32 to vector<8x1024xf32>
    %25 = arith.mulf %24, %23 : vector<8x1024xf32>
    %26 = arith.maximumf %23, %25 : vector<8x1024xf32>
    %27 = arith.truncf %26 : vector<8x1024xf32> to vector<8x1024xbf16>
    %c0_18 = arith.constant 0 : index
    %c0_19 = arith.constant 0 : index
    %28 = vector.load %arg8[%c0_18, %c0_19] : memref<1024x896xbf16, #tpu.memory_space<vmem>>, vector<1024x896xbf16>
    %cst_20 = arith.constant dense<0.000000e+00> : vector<8x896xf32>
    %29 = tpu.matmul %27, %28, %cst_20 {dimension_numbers = #tpu.dot_dimension_numbers<[1], [0], [0], [1], [0, 0, 1, 1], [], []>} : vector<8x1024xbf16>, vector<1024x896xbf16>, vector<8x896xf32> -> vector<8x896xf32>
    %c0_21 = arith.constant 0 : index
    %c0_22 = arith.constant 0 : index
    %30 = vector.load %arg9[%c0_21, %c0_22] : memref<1x896xf32, #tpu.memory_space<vmem>>, vector<1x896xf32>
    %31 = vector.broadcast %30 : vector<1x896xf32> to vector<8x896xf32>
    %32 = arith.addf %29, %31 : vector<8x896xf32>
    %33 = math.tanh %32 : vector<8x896xf32>
    %34 = arith.truncf %33 : vector<8x896xf32> to vector<8x896xbf16>
    %c0_23 = arith.constant 0 : index
    %c0_24 = arith.constant 0 : index
    %35 = vector.load %arg10[%c0_23, %c0_24] : memref<8x896xbf16, #tpu.memory_space<vmem>>, vector<8x896xbf16>
    tpu.vector_store %arg10[%c0_23, %c0_24], %34 {strides = array<i32>} : memref<8x896xbf16, #tpu.memory_space<vmem>>, vector<8x896xbf16>,
    return
  }
  func.func @transform_0(%arg0: i32) -> (i32, i32) {
    %c0_i32 = arith.constant 0 : i32
    %c0_i32_0 = arith.constant 0 : i32
    return %arg0, %c0_i32 : i32, i32
  }
  func.func @transform_1(%arg0: i32) -> (i32, i32) {
    %c0_i32 = arith.constant 0 : i32
    %c0_i32_0 = arith.constant 0 : i32
    %c0_i32_1 = arith.constant 0 : i32
    return %c0_i32, %c0_i32_0 : i32, i32
  }
  func.func @transform_2(%arg0: i32) -> (i32, i32) {
    %c0_i32 = arith.constant 0 : i32
    %c0_i32_0 = arith.constant 0 : i32
    %c0_i32_1 = arith.constant 0 : i32
    return %c0_i32, %c0_i32_0 : i32, i32
  }
  func.func @transform_3(%arg0: i32) -> (i32, i32) {
    %c0_i32 = arith.constant 0 : i32
    %c0_i32_0 = arith.constant 0 : i32
    %c0_i32_1 = arith.constant 0 : i32
    return %c0_i32, %c0_i32_0 : i32, i32
  }
  func.func @transform_4(%arg0: i32) -> (i32, i32) {
    %c0_i32 = arith.constant 0 : i32
    %c0_i32_0 = arith.constant 0 : i32
    %c0_i32_1 = arith.constant 0 : i32
    return %c0_i32, %c0_i32_0 : i32, i32
  }
  func.func @transform_5(%arg0: i32) -> (i32, i32) {
    %c0_i32 = arith.constant 0 : i32
    %c0_i32_0 = arith.constant 0 : i32
    %c0_i32_1 = arith.constant 0 : i32
    return %c0_i32, %c0_i32_0 : i32, i32
  }
  func.func @transform_6(%arg0: i32) -> (i32, i32) {
    %c0_i32 = arith.constant 0 : i32
    %c0_i32_0 = arith.constant 0 : i32
    %c0_i32_1 = arith.constant 0 : i32
    return %c0_i32, %c0_i32_0 : i32, i32
  }
  func.func @transform_7(%arg0: i32) -> (i32, i32) {
    %c0_i32 = arith.constant 0 : i32
    %c0_i32_0 = arith.constant 0 : i32
    %c0_i32_1 = arith.constant 0 : i32
    return %c0_i32, %c0_i32_0 : i32, i32
  }
  func.func @transform_8(%arg0: i32) -> (i32, i32) {
    %c0_i32 = arith.constant 0 : i32
    %c0_i32_0 = arith.constant 0 : i32
    %c0_i32_1 = arith.constant 0 : i32
    return %c0_i32, %c0_i32_0 : i32, i32
  }
  func.func @transform_9(%arg0: i32) -> (i32, i32) {
    %c0_i32 = arith.constant 0 : i32
    %c0_i32_0 = arith.constant 0 : i32
    return %arg0, %c0_i32 : i32, i32
  }
}

</mosaic_0001>

<bundles_post_ra>
// kernel: tpu_custom_call.1
= control target key start
LH: loop header
LB: loop body
LE: loop exit
PB: predicated region body
PF: predicated region fallthrough
CT: control target
= control target key end

     0   :  { %14 = vsyncpa [#allocation3], 0  ;;  %s8629_s0 = inlined_call_operand.hbm [shape: bf16[8,128], index: 0, kind: input, shape index: {}]   ;;  %s8630_s1 = inlined_call_operand.hbm [shape: bf16[128,256], index: 1, kind: input, shape index: {}]   ;;  %s8631_s2 = inlined_call_operand.hbm [shape: f32[1,256], index: 2, kind: input, shape index: {}]   ;;  %s8632_s3 = inlined_call_operand.hbm [shape: bf16[256,512], index: 3, kind: input, shape index: {}]   ;;  %s8633_s4 = inlined_call_operand.hbm [shape: f32[1,512], index: 4, kind: input, shape index: {}]   ;;  %s8634_s5 = inlined_call_operand.hbm [shape: bf16[512,1024], index: 5, kind: input, shape index: {}]   ;;  %s8635_s6 = inlined_call_operand.hbm [shape: f32[1,1024], index: 6, kind: input, shape index: {}]   ;;  %s8636_s7 = inlined_call_operand.hbm [shape: bf16[1024,896], index: 7, kind: input, shape index: {}]   ;;  %s8637_s8 = inlined_call_operand.hbm [shape: f32[1,896], index: 8, kind: input, shape index: {}]   ;;  %s8638_s9 = inlined_call_operand.hbm [shape: bf16[8,896], index: 9, kind: output, shape index: {}]  }
   0x1   :  { %15 = vsyncpa [#allocation6], 0 }
   0x2   :  { %16 = vsyncpa [#allocation9], 0 }
   0x3   :  { %17 = vsyncpa [#allocation12], 0 }
   0x4   :  { %18 = vsyncpa [#allocation15], 0 }
   0x5   :  { %19 = vsyncpa [#allocation4], 0  ;;  %s8267_s30 = smov [#allocation5]   ;;  %s8035_s13 = scalar_lea.hbm %s8630_s1, 2048 }
   0x6   :  { %s35_s10 = sshll.u32 %s8267_s30, 4  ;;  %p8036_p0 = scmp.ne.s32.totalorder %s8630_s1, %s8035_s13  ;;  %s36_s10 = int_to_ptr.vmem [resolvable:$true] %s35_s10 }
   0x7   :  { %p8039_p1 = scmp.lt.u32.totalorder %s8035_s13, %s8630_s1 }
   0x9   :  { %p8041_p2 = pnand %p8039_p1, %p8036_p0 }
   0xb   :  { %8044 = shalt.err (!%p8041_p2)
}
   0xc   :  { %s8045_s18 = scalar_lea.vmem %s36_s10, 2048  ;;  %p8050_p4 = scmp.lt.s32.totalorder %s36_s10, %s36_s10 }
   0xd   :  { %p8046_p3 = scmp.ne.s32.totalorder %s36_s10, %s8045_s18  ;;  %p8051_p5 = scmp.lt.s32.totalorder %s8045_s18, %s8045_s18 }
   0xf   :  { %p8052_p6 = por %p8051_p5, %p8050_p4 }
  0x11   :  { %p8053_p7 = pnand %p8052_p6, %p8046_p3 }
  0x13   :  { %8056 = shalt.err (!%p8053_p7)
}
  0x14   :  { %s8268_s19 = smov 128   ;;  %s8269_s20 = smov 8  }
  0x15   :  { %41 = dma.hbm_to_vmem [thread:$0]  %s8630_s1, 2048, %s36_s10, [#allocation6], %s8268_s19, %s8268_s19, %s8269_s20  }
  0x16   :  { %s8270_s23 = smov [#allocation8]   ;;  %s8057_s27 = scalar_lea.hbm %s8632_s3, 8192 }
  0x17   :  { %s57_s24 = sshll.u32 %s8270_s23, 4  ;;  %p8058_p8 = scmp.ne.s32.totalorder %s8632_s3, %s8057_s27  ;;  %s58_s24 = int_to_ptr.vmem [resolvable:$true] %s57_s24 }
  0x18   :  { %p8061_p9 = scmp.lt.u32.totalorder %s8057_s27, %s8632_s3 }
  0x1a   :  { %p8063_p10 = pnand %p8061_p9, %p8058_p8 }
  0x1c   :  { %8066 = shalt.err (!%p8063_p10)
}
  0x1d   :  { %s8067_s12 = scalar_lea.vmem %s58_s24, 8192  ;;  %p8072_p12 = scmp.lt.s32.totalorder %s58_s24, %s58_s24 }
  0x1e   :  { %p8068_p11 = scmp.ne.s32.totalorder %s58_s24, %s8067_s12  ;;  %p8073_p13 = scmp.lt.s32.totalorder %s8067_s12, %s8067_s12 }
  0x20   :  { %p8074_p0 = por %p8073_p13, %p8072_p12 }
  0x22   :  { %p8075_p1 = pnand %p8074_p0, %p8068_p11 }
  0x24   :  { %8078 = shalt.err (!%p8075_p1)
}
  0x25   :  { %s8271_s1 = smov 256   ;;  %s8272_s10 = smov 16  }
  0x26   :  { %63 = dma.hbm_to_vmem [thread:$0]  %s8632_s3, 8192, %s58_s24, [#allocation9], %s8271_s1, %s8271_s1, %s8272_s10  }
  0x27   :  { %s8273_s15 = smov [#allocation11]   ;;  %s8079_s19 = scalar_lea.hbm %s8634_s5, 32768 }
  0x28   :  { %s79_s16 = sshll.u32 %s8273_s15, 4  ;;  %p8080_p2 = scmp.ne.s32.totalorder %s8634_s5, %s8079_s19  ;;  %s80_s16 = int_to_ptr.vmem [resolvable:$true] %s79_s16 }
  0x29   :  { %p8083_p3 = scmp.lt.u32.totalorder %s8079_s19, %s8634_s5 }
  0x2b   :  { %p8085_p4 = pnand %p8083_p3, %p8080_p2 }
  0x2d   :  { %8088 = shalt.err (!%p8085_p4)
}
  0x2e   :  { %s8089_s25 = scalar_lea.vmem %s80_s16, 32768  ;;  %p8094_p6 = scmp.lt.s32.totalorder %s80_s16, %s80_s16 }
  0x2f   :  { %p8090_p5 = scmp.ne.s32.totalorder %s80_s16, %s8089_s25  ;;  %p8095_p7 = scmp.lt.s32.totalorder %s8089_s25, %s8089_s25 }
  0x31   :  { %p8096_p8 = por %p8095_p7, %p8094_p6 }
  0x33   :  { %p8097_p9 = pnand %p8096_p8, %p8090_p5 }
  0x35   :  { %8100 = shalt.err (!%p8097_p9)
}
  0x36   :  { %s8274_s3 = smov 512   ;;  %s8275_s24 = smov 32  }
  0x37   :  { %85 = dma.hbm_to_vmem [thread:$0]  %s8634_s5, 32768, %s80_s16, [#allocation12], %s8274_s3, %s8274_s3, %s8275_s24  }
  0x38   :  { %s8276_s28 = smov [#allocation14]   ;;  %s8101_s12 = scalar_lea.hbm %s8636_s7, 57344 }
  0x39   :  { %s101_s29 = sshll.u32 %s8276_s28, 4  ;;  %p8102_p10 = scmp.ne.s32.totalorder %s8636_s7, %s8101_s12  ;;  %s102_s29 = int_to_ptr.vmem [resolvable:$true] %s101_s29 }
  0x3a   :  { %p8105_p11 = scmp.lt.u32.totalorder %s8101_s12, %s8636_s7 }
  0x3c   :  { %p8107_p12 = pnand %p8105_p11, %p8102_p10 }
  0x3e   :  { %8110 = shalt.err (!%p8107_p12)
}
  0x3f   :  { %s8111_s15 = scalar_lea.vmem %s102_s29, 57344  ;;  %p8116_p0 = scmp.lt.s32.totalorder %s102_s29, %s102_s29 }
  0x40   :  { %p8112_p13 = scmp.ne.s32.totalorder %s102_s29, %s8111_s15  ;;  %p8117_p1 = scmp.lt.s32.totalorder %s8111_s15, %s8111_s15 }
  0x42   :  { %p8118_p2 = por %p8117_p1, %p8116_p0 }
  0x44   :  { %p8119_p3 = pnand %p8118_p2, %p8112_p13 }
  0x46   :  { %8122 = shalt.err (!%p8119_p3)
}
  0x47   :  { %s8277_s5 = smov 448   ;;  %s8278_s16 = smov 28  }
  0x48   :  { %107 = dma.hbm_to_vmem [thread:$0]  %s8636_s7, 57344, %s102_s29, [#allocation15], %s8277_s5, %s8277_s5, %s8278_s16  }
  0x49   :  { %s8279_s19 = smov [#allocation2]   ;;  %s8280_s21 = smov [#allocation7]  }
  0x4a   :  { %s26_s20 = sshll.u32 %s8279_s19, 4  ;;  %s48_s22 = sshll.u32 %s8280_s21, 4  ;;  %s27_s20 = int_to_ptr.vmem [resolvable:$true] %s26_s20  ;;  %s49_s22 = int_to_ptr.vmem [resolvable:$true] %s48_s22 }
  0x4b   :  { %s8123_s3 = scalar_lea.hbm %s8629_s0, 64 }
  0x4c   :  { %p8124_p4 = scmp.ne.s32.totalorder %s8629_s0, %s8123_s3  ;;  %p8127_p5 = scmp.lt.u32.totalorder %s8123_s3, %s8629_s0 }
  0x4e   :  { %p8129_p6 = pnand %p8127_p5, %p8124_p4 }
  0x50   :  { %8132 = shalt.err (!%p8129_p6)
}
  0x51   :  { %s8133_s7 = scalar_lea.vmem %s27_s20, 64  ;;  %p8138_p8 = scmp.lt.s32.totalorder %s27_s20, %s27_s20 }
  0x52   :  { %p8134_p7 = scmp.ne.s32.totalorder %s27_s20, %s8133_s7  ;;  %p8139_p9 = scmp.lt.s32.totalorder %s8133_s7, %s8133_s7 }
  0x54   :  { %p8140_p10 = por %p8139_p9, %p8138_p8 }
  0x56   :  { %p8141_p11 = pnand %p8140_p10, %p8134_p7 }
  0x58   :  { %8144 = shalt.err (!%p8141_p11)
}
  0x59   :  { %29 = dma.hbm_to_vmem [thread:$0]  %s8629_s0, 64, %s27_s20, [#allocation3]  }
  0x5a   :  { %s8145_s1 = scalar_lea.hbm %s8631_s2, 32 }
  0x5b   :  { %p8146_p12 = scmp.ne.s32.totalorder %s8631_s2, %s8145_s1  ;;  %p8149_p13 = scmp.lt.u32.totalorder %s8145_s1, %s8631_s2 }
  0x5d   :  { %p8151_p0 = pnand %p8149_p13, %p8146_p12 }
  0x5f   :  { %8154 = shalt.err (!%p8151_p0)
}
  0x60   :  { %s8155_s5 = scalar_lea.vmem %s49_s22, 32  ;;  %p8160_p2 = scmp.lt.s32.totalorder %s49_s22, %s49_s22 }
  0x61   :  { %p8156_p1 = scmp.ne.s32.totalorder %s49_s22, %s8155_s5  ;;  %p8161_p3 = scmp.lt.s32.totalorder %s8155_s5, %s8155_s5 }
  0x63   :  { %p8162_p4 = por %p8161_p3, %p8160_p2 }
  0x65   :  { %p8163_p5 = pnand %p8162_p4, %p8156_p1 }
  0x67   :  { %8166 = shalt.err (!%p8163_p5)
}
  0x68   :  { %51 = dma.hbm_to_vmem [thread:$0]  %s8631_s2, 32, %s49_s22, [#allocation6]  }
  0x69   :  { %s8281_s17 = smov [#allocation10]   ;;  %s8282_s19 = smov [#allocation13]  }
  0x6a   :  { %s70_s18 = sshll.u32 %s8281_s17, 4  ;;  %s92_s20 = sshll.u32 %s8282_s19, 4  ;;  %s71_s18 = int_to_ptr.vmem [resolvable:$true] %s70_s18  ;;  %s93_s20 = int_to_ptr.vmem [resolvable:$true] %s92_s20 }
  0x6b   :  { %s8167_s25 = scalar_lea.hbm %s8633_s4, 64 }
  0x6c   :  { %p8168_p6 = scmp.ne.s32.totalorder %s8633_s4, %s8167_s25  ;;  %p8171_p7 = scmp.lt.u32.totalorder %s8167_s25, %s8633_s4 }
  0x6e   :  { %p8173_p8 = pnand %p8171_p7, %p8168_p6 }
  0x70   :  { %8176 = shalt.err (!%p8173_p8)
}
  0x71   :  { %s8177_s2 = scalar_lea.vmem %s71_s18, 64  ;;  %p8182_p10 = scmp.lt.s32.totalorder %s71_s18, %s71_s18 }
  0x72   :  { %p8178_p9 = scmp.ne.s32.totalorder %s71_s18, %s8177_s2  ;;  %p8183_p11 = scmp.lt.s32.totalorder %s8177_s2, %s8177_s2 }
  0x74   :  { %p8184_p12 = por %p8183_p11, %p8182_p10 }
  0x76   :  { %p8185_p13 = pnand %p8184_p12, %p8178_p9 }
  0x78   :  { %8188 = shalt.err (!%p8185_p13)
}
  0x79   :  { %73 = dma.hbm_to_vmem [thread:$0]  %s8633_s4, 64, %s71_s18, [#allocation9]  }
  0x7a   :  { %s8189_s30 = scalar_lea.hbm %s8635_s6, 128 }
  0x7b   :  { %p8190_p0 = scmp.ne.s32.totalorder %s8635_s6, %s8189_s30  ;;  %p8193_p1 = scmp.lt.u32.totalorder %s8189_s30, %s8635_s6 }
  0x7d   :  { %p8195_p2 = pnand %p8193_p1, %p8190_p0 }
  0x7f   :  { %8198 = shalt.err (!%p8195_p2)
}
  0x80   :  { %s8199_s13 = scalar_lea.vmem %s93_s20, 128  ;;  %p8204_p4 = scmp.lt.s32.totalorder %s93_s20, %s93_s20 }
  0x81   :  { %p8200_p3 = scmp.ne.s32.totalorder %s93_s20, %s8199_s13  ;;  %p8205_p5 = scmp.lt.s32.totalorder %s8199_s13, %s8199_s13 }
  0x83   :  { %p8206_p6 = por %p8205_p5, %p8204_p4 }
  0x85   :  { %p8207_p7 = pnand %p8206_p6, %p8200_p3 }
  0x87   :  { %8210 = shalt.err (!%p8207_p7)
}
  0x88   :  { %95 = dma.hbm_to_vmem [thread:$0]  %s8635_s6, 128, %s93_s20, [#allocation12]  }
  0x89   :  { %s8283_s15 = smov [#allocation16]   ;;  %s8211_s17 = scalar_lea.hbm %s8637_s8, 112 }
  0x8a   :  { %s114_s5 = sshll.u32 %s8283_s15, 4  ;;  %p8212_p8 = scmp.ne.s32.totalorder %s8637_s8, %s8211_s17  ;;  %s115_s5 = int_to_ptr.vmem [resolvable:$true] %s114_s5 }
  0x8b   :  { %p8215_p9 = scmp.lt.u32.totalorder %s8211_s17, %s8637_s8 }
  0x8d   :  { %p8217_p10 = pnand %p8215_p9, %p8212_p8 }
  0x8f   :  { %8220 = shalt.err (!%p8217_p10)
}
  0x90   :  { %s8221_s25 = scalar_lea.vmem %s115_s5, 112  ;;  %s8225_s6 = scalar_lea.vmem %s115_s5, 128 }
  0x91   :  { %p8222_p11 = scmp.ne.s32.totalorder %s115_s5, %s8221_s25  ;;  %p8226_p12 = scmp.lt.s32.totalorder %s115_s5, %s115_s5 }
  0x92   :  { %p8227_p13 = scmp.lt.s32.totalorder %s8225_s6, %s8221_s25 }
  0x94   :  { %p8228_p0 = por %p8227_p13, %p8226_p12 }
  0x96   :  { %p8229_p1 = pnand %p8228_p0, %p8222_p11 }
  0x98   :  { %8232 = shalt.err (!%p8229_p1)
}
  0x99   :  { %117 = dma.hbm_to_vmem [thread:$0]  %s8637_s8, 112, %s115_s5, [#allocation15]  }
  0x9a   :  { %8255 = dma.done.wait [#allocation3], 64  }
  0x9b   :  { %8256 = vsyncadd [#allocation3], 4294967232 }
  0x9c   :  { %8257 = dma.done.wait [#allocation6], 2080  }
  0x9d   :  { %8258 = vsyncadd [#allocation6], 4294965216 }
  0x9e   :  { %8259 = dma.done.wait [#allocation9], 8256  }
  0x9f   :  { %8260 = vsyncadd [#allocation9], 4294959040 }
  0xa0   :  { %8261 = dma.done.wait [#allocation12], 32896  }
  0xa1   :  { %8262 = vsyncadd [#allocation12], 4294934400 }
  0xa2   :  { %8263 = dma.done.wait [#allocation15], 57456  }
  0xa3   :  { %8264 = vsyncadd [#allocation15], 4294909840  ;;  %v8284_v0 = vmov 0   ;;  %v7261_v1 = vld [vmem:[#allocation5 + $0x4] ss:$8 sps:$4 sm:$0xff]   ;;  %s8285_s8 = smov [#allocation17]  }
  0xa4   :  { %287 = vmatprep.mubr.bf16.mxu0 %v8284_v0  ;;  %v7263_v2 = vld [vmem:[#allocation5] ss:$8 sps:$4 sm:$0xff]   ;;  %255 = vmatprep.subr.bf16.mxu0 %v7261_v1  ;;  %v7264_v3 = vld [vmem:[#allocation5 + $0x14] ss:$8 sps:$4 sm:$0xff]   ;;  %v7266_v4 = vld [vmem:[#allocation5 + $0x10] ss:$8 sps:$4 sm:$0xff]  }
  0xa5   :  { %256 = vmatpush1.bf16.msra.mxu0 %v7263_v2  ;;  %v7267_v5 = vld [vmem:[#allocation5 + $0x24] ss:$8 sps:$4 sm:$0xff]   ;;  %v7269_v6 = vld [vmem:[#allocation5 + $0x20] ss:$8 sps:$4 sm:$0xff]   ;;  %v7270_v7 = vld [vmem:[#allocation5 + $0x34] ss:$8 sps:$4 sm:$0xff]  }
  0xa6   :  { %257 = vmatprep.subr.bf16.mxu0 %v7264_v3  ;;  %v7272_v8 = vld [vmem:[#allocation5 + $0x30] ss:$8 sps:$4 sm:$0xff]   ;;  %v7273_v9 = vld [vmem:[#allocation5 + $0x44] ss:$8 sps:$4 sm:$0xff]   ;;  %v7275_v10 = vld [vmem:[#allocation5 + $0x40] ss:$8 sps:$4 sm:$0xff]  }
  0xa7   :  { %v7276_v11 = vld [vmem:[#allocation5 + $0x54] ss:$8 sps:$4 sm:$0xff]   ;;  %v7278_v12 = vld [vmem:[#allocation5 + $0x50] ss:$8 sps:$4 sm:$0xff]   ;;  %v7279_v13 = vld [vmem:[#allocation5 + $0x64] ss:$8 sps:$4 sm:$0xff]  }
  0xa8   :  { %v7281_v14 = vld [vmem:[#allocation5 + $0x60] ss:$8 sps:$4 sm:$0xff]   ;;  %v7282_v15 = vld [vmem:[#allocation5 + $0x74] ss:$8 sps:$4 sm:$0xff]   ;;  %v7284_v16 = vld [vmem:[#allocation5 + $0x70] ss:$8 sps:$4 sm:$0xff]  }
  0xa9   :  { %258 = vmatpush1.bf16.msra.mxu0 %v7266_v4  ;;  %v7287_v17 = vld [vmem:[#allocation8 + $0x4] ss:$16 sps:$4 sm:$0xff]   ;;  %v146_v18 = vld [vmem:[#allocation2] sm:$0xf]  ;;  %v7285_v19 = vld [vmem:[#allocation8] ss:$16 sps:$4 sm:$0xff]  }
  0xaa   :  { %259 = vmatprep.subr.bf16.mxu0 %v7267_v5  ;;  %v7290_v20 = vld [vmem:[#allocation8 + $0x24] ss:$16 sps:$4 sm:$0xff]   ;;  %v7288_v21 = vld [vmem:[#allocation8 + $0x20] ss:$16 sps:$4 sm:$0xff]   ;;  %v7335_v50 = vld [vmem:[#allocation8 + $0xc] ss:$16 sps:$4 sm:$0xff]  }
  0xab   :  { %v7293_v22 = vld [vmem:[#allocation8 + $0x44] ss:$16 sps:$4 sm:$0xff]   ;;  %v7291_v23 = vld [vmem:[#allocation8 + $0x40] ss:$16 sps:$4 sm:$0xff]   ;;  %s6283_s24 = sshll.u32 %s8285_s8, 4  ;;  %s6284_s24 = int_to_ptr.vmem [resolvable:$true] %s6283_s24 }
  0xac   :  { %v7296_v24 = vld [vmem:[#allocation8 + $0x64] ss:$16 sps:$4 sm:$0xff]   ;;  %v7294_v25 = vld [vmem:[#allocation8 + $0x60] ss:$16 sps:$4 sm:$0xff]   ;;  %s8233_s26 = scalar_lea.vmem %s6284_s24, 448  ;;  %p8238_p3 = scmp.lt.s32.totalorder %s6284_s24, %s6284_s24 }
  0xad   :  { %260 = vmatpush1.bf16.msra.mxu0 %v7269_v6  ;;  %v7299_v26 = vld [vmem:[#allocation8 + $0x84] ss:$16 sps:$4 sm:$0xff]   ;;  %v7297_v27 = vld [vmem:[#allocation8 + $0x80] ss:$16 sps:$4 sm:$0xff]   ;;  %p8234_p2 = scmp.ne.s32.totalorder %s6284_s24, %s8233_s26  ;;  %p8239_p4 = scmp.lt.s32.totalorder %s8233_s26, %s8233_s26 }
  0xae   :  { %261 = vmatprep.subr.bf16.mxu0 %v7270_v7  ;;  %v7302_v28 = vld [vmem:[#allocation8 + $0xa4] ss:$16 sps:$4 sm:$0xff]   ;;  %v7300_v29 = vld [vmem:[#allocation8 + $0xa0] ss:$16 sps:$4 sm:$0xff]  }
  0xaf   :  { %v7305_v30 = vld [vmem:[#allocation8 + $0xc4] ss:$16 sps:$4 sm:$0xff]   ;;  %v7303_v31 = vld [vmem:[#allocation8 + $0xc0] ss:$16 sps:$4 sm:$0xff]   ;;  %p8240_p5 = por %p8239_p4, %p8238_p3 }
  0xb0   :  { %v7308_v32 = vld [vmem:[#allocation8 + $0xe4] ss:$16 sps:$4 sm:$0xff]   ;;  %v7306_v33 = vld [vmem:[#allocation8 + $0xe0] ss:$16 sps:$4 sm:$0xff]  }
  0xb1   :  { %262 = vmatpush1.bf16.msra.mxu0 %v7272_v8  ;;  %v7311_v34 = vld [vmem:[#allocation8 + $0x104] ss:$16 sps:$4 sm:$0xff]   ;;  %v7309_v35 = vld [vmem:[#allocation8 + $0x100] ss:$16 sps:$4 sm:$0xff]   ;;  %p8241_p6 = pnand %p8240_p5, %p8234_p2 }
  0xb2   :  { %263 = vmatprep.subr.bf16.mxu0 %v7273_v9  ;;  %v7314_v36 = vld [vmem:[#allocation8 + $0x124] ss:$16 sps:$4 sm:$0xff]   ;;  %v7312_v37 = vld [vmem:[#allocation8 + $0x120] ss:$16 sps:$4 sm:$0xff]  }
  0xb3   :  { %v7317_v38 = vld [vmem:[#allocation8 + $0x144] ss:$16 sps:$4 sm:$0xff]   ;;  %v7315_v39 = vld [vmem:[#allocation8 + $0x140] ss:$16 sps:$4 sm:$0xff]  }
  0xb4   :  { %v7320_v40 = vld [vmem:[#allocation8 + $0x164] ss:$16 sps:$4 sm:$0xff]   ;;  %v7318_v41 = vld [vmem:[#allocation8 + $0x160] ss:$16 sps:$4 sm:$0xff]  }
  0xb5   :  { %264 = vmatpush1.bf16.msra.mxu0 %v7275_v10  ;;  %v7323_v42 = vld [vmem:[#allocation8 + $0x184] ss:$16 sps:$4 sm:$0xff]   ;;  %v7321_v43 = vld [vmem:[#allocation8 + $0x180] ss:$16 sps:$4 sm:$0xff]  }
  0xb6   :  { %265 = vmatprep.subr.bf16.mxu0 %v7276_v11  ;;  %v7326_v44 = vld [vmem:[#allocation8 + $0x1a4] ss:$16 sps:$4 sm:$0xff]   ;;  %v7324_v45 = vld [vmem:[#allocation8 + $0x1a0] ss:$16 sps:$4 sm:$0xff]  }
  0xb7   :  { %v7329_v46 = vld [vmem:[#allocation8 + $0x1c4] ss:$16 sps:$4 sm:$0xff]   ;;  %v7327_v47 = vld [vmem:[#allocation8 + $0x1c0] ss:$16 sps:$4 sm:$0xff]  }
  0xb8   :  { %v7332_v48 = vld [vmem:[#allocation8 + $0x1e4] ss:$16 sps:$4 sm:$0xff]   ;;  %v7330_v49 = vld [vmem:[#allocation8 + $0x1e0] ss:$16 sps:$4 sm:$0xff]  }
  0xb9   :  { %266 = vmatpush1.bf16.msra.mxu0 %v7278_v12  ;;  %v802_v51 = vld [vmem:[#allocation11] sm:$0xff] }
  0xba   :  { %267 = vmatprep.subr.bf16.mxu0 %v7279_v13  ;;  %v806_v52 = vld [vmem:[#allocation11 + $0x20] sm:$0xff] }
  0xbb   :  { %v6377_v53 = vcombine.high %v802_v51, %v806_v52  ;;  %v6376_v54 = vcombine.low %v802_v51, %v806_v52  ;;  %v810_v55 = vld [vmem:[#allocation11 + $0x40] sm:$0xff] }
  0xbc   :  { %v814_v56 = vld [vmem:[#allocation11 + $0x60] sm:$0xff] }
  0xbd   :  { %268 = vmatpush1.bf16.msra.mxu0 %v7281_v14  ;;  %v6385_v57 = vcombine.high %v810_v55, %v814_v56  ;;  %2380 = vmatprep.subr.bf16.mxu1 %v6377_v53  ;;  %v6384_v58 = vcombine.low %v810_v55, %v814_v56  ;;  %v818_v59 = vld [vmem:[#allocation11 + $0x80] sm:$0xff] }
  0xbe   :  { %269 = vmatprep.subr.bf16.mxu0 %v7282_v15  ;;  %2381 = vmatpush1.bf16.msra.mxu1 %v6376_v54  ;;  %v822_v60 = vld [vmem:[#allocation11 + $0xa0] sm:$0xff] }
  0xbf   :  { %2382 = vmatprep.subr.bf16.mxu1 %v6385_v57  ;;  %v6393_v61 = vcombine.high %v818_v59, %v822_v60  ;;  %v6392_v62 = vcombine.low %v818_v59, %v822_v60  ;;  %v826_v63 = vld [vmem:[#allocation11 + $0xc0] sm:$0xff] }
  0xc0   :  { %v830_v0 = vld [vmem:[#allocation11 + $0xe0] sm:$0xff] }
  0xc1   :  { %270 = vmatpush1.bf16.msra.mxu0 %v7284_v16  ;;  %v6401_v1 = vcombine.high %v826_v63, %v830_v0  ;;  %v6400_v2 = vcombine.low %v826_v63, %v830_v0  ;;  %v834_v3 = vld [vmem:[#allocation11 + $0x100] sm:$0xff]  ;;  %v7338_v63 = vld [vmem:[#allocation8 + $0x2c] ss:$16 sps:$4 sm:$0xff]  }
  0xc2   :  { %708 = vmatprep.subr.bf16.mxu0 %v7287_v17  ;;  %2383 = vmatpush1.bf16.msra.mxu1 %v6384_v58  ;;  %v838_v4 = vld [vmem:[#allocation11 + $0x120] sm:$0xff] }
  0xc3   :  { %2384 = vmatprep.subr.bf16.mxu1 %v6393_v61  ;;  %v6409_v5 = vcombine.high %v834_v3, %v838_v4  ;;  %v6408_v6 = vcombine.low %v834_v3, %v838_v4  ;;  %v842_v7 = vld [vmem:[#allocation11 + $0x140] sm:$0xff]  ;;  %v7344_v3 = vld [vmem:[#allocation8 + $0x6c] ss:$16 sps:$4 sm:$0xff]  }
  0xc4   :  { %288 = vmatmul.mubr.bf16.vlgmr.msra.gmra.mrb[0].mxu0 %v146_v18  ;;  %v846_v8 = vld [vmem:[#allocation11 + $0x160] sm:$0xff] }
  0xc5   :  { %709 = vmatpush1.bf16.msra.mxu0 %v7285_v19  ;;  %v6417_v9 = vcombine.high %v842_v7, %v846_v8  ;;  %v6416_v10 = vcombine.low %v842_v7, %v846_v8  ;;  %v850_v11 = vld [vmem:[#allocation11 + $0x180] sm:$0xff]  ;;  %v7350_v7 = vld [vmem:[#allocation8 + $0xac] ss:$16 sps:$4 sm:$0xff]  }
  0xc6   :  { %710 = vmatprep.subr.bf16.mxu0 %v7290_v20  ;;  %2385 = vmatpush1.bf16.msra.mxu1 %v6392_v62  ;;  %v854_v12 = vld [vmem:[#allocation11 + $0x1a0] sm:$0xff] }
  0xc7   :  { %2386 = vmatprep.subr.bf16.mxu1 %v6401_v1  ;;  %v6425_v13 = vcombine.high %v850_v11, %v854_v12  ;;  %v6424_v14 = vcombine.low %v850_v11, %v854_v12  ;;  %v858_v15 = vld [vmem:[#allocation11 + $0x1c0] sm:$0xff]  ;;  %v7341_v1 = vld [vmem:[#allocation8 + $0x4c] ss:$16 sps:$4 sm:$0xff]  }
  0xc8   :  { %v862_v16 = vld [vmem:[#allocation11 + $0x1e0] sm:$0xff]  ;;  %v7356_v11 = vld [vmem:[#allocation8 + $0xec] ss:$16 sps:$4 sm:$0xff]  }
  0xc9   :  { %711 = vmatpush1.bf16.msra.mxu0 %v7288_v21  ;;  %v6433_v17 = vcombine.high %v858_v15, %v862_v16  ;;  %v6432_v18 = vcombine.low %v858_v15, %v862_v16  ;;  %v866_v19 = vld [vmem:[#allocation11 + $0x200] sm:$0xff]  ;;  %v7362_v15 = vld [vmem:[#allocation8 + $0x12c] ss:$16 sps:$4 sm:$0xff]  }
  0xca   :  { %712 = vmatprep.subr.bf16.mxu0 %v7293_v22  ;;  %2387 = vmatpush1.bf16.msra.mxu1 %v6400_v2  ;;  %v870_v20 = vld [vmem:[#allocation11 + $0x220] sm:$0xff] }
  0xcb   :  { %2388 = vmatprep.subr.bf16.mxu1 %v6409_v5  ;;  %v6441_v21 = vcombine.high %v866_v19, %v870_v20  ;;  %v6440_v22 = vcombine.low %v866_v19, %v870_v20  ;;  %v7333_v61 = vld [vmem:[#allocation8 + $0x8] ss:$16 sps:$4 sm:$0xff]   ;;  %v7347_v5 = vld [vmem:[#allocation8 + $0x8c] ss:$16 sps:$4 sm:$0xff]  }
  0xcc   :  { %v7336_v0 = vld [vmem:[#allocation8 + $0x28] ss:$16 sps:$4 sm:$0xff]   ;;  %v7368_v19 = vld [vmem:[#allocation8 + $0x16c] ss:$16 sps:$4 sm:$0xff]  }
  0xcd   :  { %713 = vmatpush1.bf16.msra.mxu0 %v7291_v23  ;;  %v874_v23 = vld [vmem:[#allocation11 + $0x240] sm:$0xff] }
  0xce   :  { %714 = vmatprep.subr.bf16.mxu0 %v7296_v24  ;;  %2389 = vmatpush1.bf16.msra.mxu1 %v6408_v6  ;;  %v878_v24 = vld [vmem:[#allocation11 + $0x260] sm:$0xff] }
  0xcf   :  { %2390 = vmatprep.subr.bf16.mxu1 %v6417_v9  ;;  %v7339_v2 = vld [vmem:[#allocation8 + $0x48] ss:$16 sps:$4 sm:$0xff]   ;;  %v7353_v9 = vld [vmem:[#allocation8 + $0xcc] ss:$16 sps:$4 sm:$0xff]  }
  0xd0   :  { %v7342_v4 = vld [vmem:[#allocation8 + $0x68] ss:$16 sps:$4 sm:$0xff]  }
  0xd1   :  { %715 = vmatpush1.bf16.msra.mxu0 %v7294_v25  ;;  %v6449_v25 = vcombine.high %v874_v23, %v878_v24  ;;  %v7345_v6 = vld [vmem:[#allocation8 + $0x88] ss:$16 sps:$4 sm:$0xff]  }
  0xd2   :  { %716 = vmatprep.subr.bf16.mxu0 %v7299_v26  ;;  %2391 = vmatpush1.bf16.msra.mxu1 %v6416_v10  ;;  %v6448_v26 = vcombine.low %v874_v23, %v878_v24  ;;  %v7348_v8 = vld [vmem:[#allocation8 + $0xa8] ss:$16 sps:$4 sm:$0xff]   ;;  %v7374_v23 = vld [vmem:[#allocation8 + $0x1ac] ss:$16 sps:$4 sm:$0xff]  }
  0xd3   :  { %2392 = vmatprep.subr.bf16.mxu1 %v6425_v13  ;;  %v7351_v10 = vld [vmem:[#allocation8 + $0xc8] ss:$16 sps:$4 sm:$0xff]   ;;  %v7359_v13 = vld [vmem:[#allocation8 + $0x10c] ss:$16 sps:$4 sm:$0xff]  }
  0xd4   :  { %v7354_v12 = vld [vmem:[#allocation8 + $0xe8] ss:$16 sps:$4 sm:$0xff]  }
  0xd5   :  { %717 = vmatpush1.bf16.msra.mxu0 %v7297_v27  ;;  %v882_v27 = vld [vmem:[#allocation11 + $0x280] sm:$0xff] }
  0xd6   :  { %718 = vmatprep.subr.bf16.mxu0 %v7302_v28  ;;  %2393 = vmatpush1.bf16.msra.mxu1 %v6424_v14  ;;  %v886_v28 = vld [vmem:[#allocation11 + $0x2a0] sm:$0xff] }
  0xd7   :  { %2394 = vmatprep.subr.bf16.mxu1 %v6433_v17  ;;  %v7357_v14 = vld [vmem:[#allocation8 + $0x108] ss:$16 sps:$4 sm:$0xff]   ;;  %v7365_v17 = vld [vmem:[#allocation8 + $0x14c] ss:$16 sps:$4 sm:$0xff]  }
  0xd8   :  { %v7360_v16 = vld [vmem:[#allocation8 + $0x128] ss:$16 sps:$4 sm:$0xff]  }
  0xd9   :  { %719 = vmatpush1.bf16.msra.mxu0 %v7300_v29  ;;  %v165_v29 = vlaneseq  ;;  %v7366_v20 = vld [vmem:[#allocation8 + $0x168] ss:$16 sps:$4 sm:$0xff]  }
  0xda   :  { %720 = vmatprep.subr.bf16.mxu0 %v7305_v30  ;;  %2395 = vmatpush1.bf16.msra.mxu1 %v6432_v18  ;;  %v6457_v30 = vcombine.high %v882_v27, %v886_v28  ;;  %v7363_v18 = vld [vmem:[#allocation8 + $0x148] ss:$16 sps:$4 sm:$0xff]  }
  0xdb   :  { %2396 = vmatprep.subr.bf16.mxu1 %v6441_v21  ;;  %v7371_v21 = vld [vmem:[#allocation8 + $0x18c] ss:$16 sps:$4 sm:$0xff]   ;;  %v7372_v24 = vld [vmem:[#allocation8 + $0x1a8] ss:$16 sps:$4 sm:$0xff]  }
  0xdd   :  { %721 = vmatpush1.bf16.msra.mxu0 %v7303_v31  ;;  %v6456_v31 = vcombine.low %v882_v27, %v886_v28  ;;  %v7380_v27 = vld [vmem:[#allocation8 + $0x1ec] ss:$16 sps:$4 sm:$0xff]  }
  0xde   :  { %722 = vmatprep.subr.bf16.mxu0 %v7308_v32  ;;  %2397 = vmatpush1.bf16.msra.mxu1 %v6440_v22  ;;  %v890_v32 = vld [vmem:[#allocation11 + $0x2c0] sm:$0xff]  ;;  %v803_v28 = vld [vmem:[#allocation11 + $0x8] sm:$0xff] }
  0xdf   :  { %2398 = vmatprep.subr.bf16.mxu1 %v6449_v25  ;;  %v7369_v22 = vld [vmem:[#allocation8 + $0x188] ss:$16 sps:$4 sm:$0xff]   ;;  %v7377_v25 = vld [vmem:[#allocation8 + $0x1cc] ss:$16 sps:$4 sm:$0xff]  }
  0xe1   :  { %723 = vmatpush1.bf16.msra.mxu0 %v7306_v33  ;;  %v894_v33 = vld [vmem:[#allocation11 + $0x2e0] sm:$0xff] }
  0xe2   :  { %724 = vmatprep.subr.bf16.mxu0 %v7311_v34  ;;  %2399 = vmatpush1.bf16.msra.mxu1 %v6448_v26  ;;  %v8444_v34 = vshrl.u32 %v165_v29, 7  ;;  %v7375_v26 = vld [vmem:[#allocation8 + $0x1c8] ss:$16 sps:$4 sm:$0xff]   ;;  %v807_v29 = vld [vmem:[#allocation11 + $0x28] sm:$0xff] }
  0xe3   :  { %2400 = vmatprep.subr.bf16.mxu1 %v6457_v30  ;;  %v7378_v30 = vld [vmem:[#allocation8 + $0x1e8] ss:$16 sps:$4 sm:$0xff]  }
  0xe5   :  { %725 = vmatpush1.bf16.msra.mxu0 %v7309_v35  ;;  %v6465_v35 = vcombine.high %v890_v32, %v894_v33 }
  0xe6   :  { %726 = vmatprep.subr.bf16.mxu0 %v7314_v36  ;;  %2401 = vmatpush1.bf16.msra.mxu1 %v6456_v31  ;;  %v6464_v36 = vcombine.low %v890_v32, %v894_v33  ;;  %v6379_v31 = vcombine.high %v803_v28, %v807_v29  ;;  %v811_v32 = vld [vmem:[#allocation11 + $0x48] sm:$0xff] }
  0xe7   :  { %2402 = vmatprep.subr.bf16.mxu1 %v6465_v35  ;;  %v815_v33 = vld [vmem:[#allocation11 + $0x68] sm:$0xff]  ;;  %v6378_v35 = vcombine.low %v803_v28, %v807_v29 }
  0xe9   :  { %727 = vmatpush1.bf16.msra.mxu0 %v7312_v37  ;;  %v898_v37 = vld [vmem:[#allocation11 + $0x300] sm:$0xff] }
  0xea   :  { %728 = vmatprep.subr.bf16.mxu0 %v7317_v38  ;;  %v902_v38 = vld [vmem:[#allocation11 + $0x320] sm:$0xff]  ;;  %2403 = vmatpush1.bf16.msra.mxu1 %v6464_v36  ;;  %v6387_v36 = vcombine.high %v811_v32, %v815_v33 }
  0xed   :  { %729 = vmatpush1.bf16.msra.mxu0 %v7315_v39  ;;  %v163_v39 = vld [vmem:[#allocation7] sm:$0x3] }
  0xee   :  { %730 = vmatprep.subr.bf16.mxu0 %v7320_v40  ;;  %v8447_v40 = vsub.s32 0, %v8444_v34 }
  0xf1   :  { %731 = vmatpush1.bf16.msra.mxu0 %v7318_v41  ;;  %v6473_v41 = vcombine.high %v898_v37, %v902_v38 }
  0xf2   :  { %732 = vmatprep.subr.bf16.mxu0 %v7323_v42  ;;  %v8450_v42 = vsub.s32 1, %v8444_v34 }
  0xf3   :  { %2404 = vmatprep.subr.bf16.mxu1 %v6473_v41 }
  0xf5   :  { %733 = vmatpush1.bf16.msra.mxu0 %v7321_v43  ;;  %v6472_v43 = vcombine.low %v898_v37, %v902_v38  ;;  %v819_v37 = vld [vmem:[#allocation11 + $0x88] sm:$0xff] }
  0xf6   :  { %734 = vmatprep.subr.bf16.mxu0 %v7326_v44  ;;  %v906_v44 = vld [vmem:[#allocation11 + $0x340] sm:$0xff]  ;;  %v823_v38 = vld [vmem:[#allocation11 + $0xa8] sm:$0xff] }
  0xf7   :  { %2405 = vmatpush1.bf16.msra.mxu1 %v6472_v43  ;;  %v6395_v41 = vcombine.high %v819_v37, %v823_v38  ;;  %v827_v43 = vld [vmem:[#allocation11 + $0xc8] sm:$0xff] }
  0xf9   :  { %735 = vmatpush1.bf16.msra.mxu0 %v7324_v45  ;;  %v910_v45 = vld [vmem:[#allocation11 + $0x360] sm:$0xff] }
  0xfa   :  { %736 = vmatprep.subr.bf16.mxu0 %v7329_v46  ;;  %v168_v46 = vrot.slane %v163_v39, %v8447_v40 }
  0xfd   :  { %737 = vmatpush1.bf16.msra.mxu0 %v7327_v47  ;;  %v6481_v47 = vcombine.high %v906_v44, %v910_v45 }
  0xfe   :  { %738 = vmatprep.subr.bf16.mxu0 %v7332_v48  ;;  %v172_v48 = vrot.slane %v163_v39, %v8450_v42  ;;  %v6386_v39 = vcombine.low %v811_v32, %v815_v33 }
  0xff   :  { %2406 = vmatprep.subr.bf16.mxu1 %v6481_v47  ;;  %v835_v47 = vld [vmem:[#allocation11 + $0x108] sm:$0xff] }
 0x101   :  { %739 = vmatpush1.bf16.msra.mxu0 %v7330_v49  ;;  %v6480_v49 = vcombine.low %v906_v44, %v910_v45  ;;  %v831_v44 = vld [vmem:[#allocation11 + $0xe8] sm:$0xff]  ;;  %v6394_v45 = vcombine.low %v819_v37, %v823_v38 }
 0x102   :  { %749 = vmatprep.subr.bf16.mxu0 %v7335_v50 }
 0x103   :  { %2407 = vmatpush1.bf16.msra.mxu1 %v6480_v49  ;;  %v6402_v49 = vcombine.low %v827_v43, %v831_v44 }
 0x197   :  { %v289_v50 = vpop.f32.mrb[0].mxu0 }
 0x198   :  { %v290_v51 = vadd.f32 %v289_v50, %v168_v46  ;;  %v291_v52 = vpop.f32.mrb[1].mxu0  ;;  %v6403_v46 = vcombine.high %v827_v43, %v831_v44 }
 0x199   :  { %v292_v53 = vadd.f32 %v291_v52, %v172_v48  ;;  %v293_v54 = vpop.f32.mrb[2].mxu0  ;;  %v839_v48 = vld [vmem:[#allocation11 + $0x128] sm:$0xff] }
 0x19a   :  { %v296_v55 = vmul.f32 0.2, %v290_v51  ;;  %v294_v56 = vpop.f32.mrb[3].mxu0  ;;  %v6411_v50 = vcombine.high %v835_v47, %v839_v48  ;;  %v847_v52 = vld [vmem:[#allocation11 + $0x168] sm:$0xff] }
 0x19b   :  { %v297_v57 = vmul.f32 0.2, %v292_v53  ;;  %v855_v56 = vld [vmem:[#allocation11 + $0x1a8] sm:$0xff] }
 0x19c   :  { %v298_v58 = vmax.f32 %v290_v51, %v296_v55  ;;  %v843_v51 = vld [vmem:[#allocation11 + $0x148] sm:$0xff] }
 0x19d   :  { %v299_v59 = vmax.f32 %v292_v53, %v297_v57  ;;  %v6410_v53 = vcombine.low %v835_v47, %v839_v48  ;;  %v6419_v54 = vcombine.high %v843_v51, %v847_v52  ;;  %v851_v55 = vld [vmem:[#allocation11 + $0x188] sm:$0xff]  ;;  %v6418_v57 = vcombine.low %v843_v51, %v847_v52  ;;  %v8474_v51 = vld [vmem:[#allocation10] sm:$0xf] }
 0x19e   :  { %v8454_v62 = vpack.c.bf16 %v298_v58, %v298_v58  ;;  %v6427_v58 = vcombine.high %v851_v55, %v855_v56  ;;  %v371_v52 = vrot.slane %v8474_v51, %v8447_v40 }
 0x19f   :  { %v301_v60 = vpack.c.bf16 %v299_v59, %v299_v59  ;;  %v859_v59 = vld [vmem:[#allocation11 + $0x1c8] sm:$0xff] }
 0x1a1   :  { %740 = vmatprep.mubr.bf16.mxu0 %v301_v60 }
 0x1a2   :  { %741 = vmatmul.mubr.bf16.vlgmr.msra.gmra.mrb[4].mxu0 %v8454_v62 }
 0x1a3   :  { %750 = vmatpush1.bf16.msra.mxu0 %v7333_v61  ;;  %781 = vmatprep.mubr.bf16.mxu0 %v301_v60  ;;  %v863_v60 = vld [vmem:[#allocation11 + $0x1e8] sm:$0xff]  ;;  %v914_v61 = vld [vmem:[#allocation11 + $0x380] sm:$0xff] }
 0x1a4   :  { %751 = vmatprep.subr.bf16.mxu0 %v7338_v63 }
 0x1a7   :  { %752 = vmatpush1.bf16.msra.mxu0 %v7336_v0  ;;  %v6426_v0 = vcombine.low %v851_v55, %v855_v56 }
 0x1a8   :  { %753 = vmatprep.subr.bf16.mxu0 %v7341_v1 }
 0x1ab   :  { %754 = vmatpush1.bf16.msra.mxu0 %v7339_v2  ;;  %v6435_v2 = vcombine.high %v859_v59, %v863_v60 }
 0x1ac   :  { %755 = vmatprep.subr.bf16.mxu0 %v7344_v3  ;;  %v867_v3 = vld [vmem:[#allocation11 + $0x208] sm:$0xff] }
 0x1af   :  { %756 = vmatpush1.bf16.msra.mxu0 %v7342_v4  ;;  %v871_v4 = vld [vmem:[#allocation11 + $0x228] sm:$0xff] }
 0x1b0   :  { %757 = vmatprep.subr.bf16.mxu0 %v7347_v5  ;;  %v922_v5 = vld [vmem:[#allocation11 + $0x3c0] sm:$0xff] }
 0x1b3   :  { %758 = vmatpush1.bf16.msra.mxu0 %v7345_v6  ;;  %v926_v6 = vld [vmem:[#allocation11 + $0x3e0] sm:$0xff] }
 0x1b4   :  { %759 = vmatprep.subr.bf16.mxu0 %v7350_v7  ;;  %v6497_v7 = vcombine.high %v922_v5, %v926_v6 }
 0x1b7   :  { %760 = vmatpush1.bf16.msra.mxu0 %v7348_v8  ;;  %v6434_v8 = vcombine.low %v859_v59, %v863_v60 }
 0x1b8   :  { %761 = vmatprep.subr.bf16.mxu0 %v7353_v9  ;;  %v6496_v9 = vcombine.low %v922_v5, %v926_v6 }
 0x1bb   :  { %762 = vmatpush1.bf16.msra.mxu0 %v7351_v10  ;;  %v6443_v10 = vcombine.high %v867_v3, %v871_v4 }
 0x1bc   :  { %763 = vmatprep.subr.bf16.mxu0 %v7356_v11  ;;  %v875_v11 = vld [vmem:[#allocation11 + $0x248] sm:$0xff] }
 0x1bf   :  { %764 = vmatpush1.bf16.msra.mxu0 %v7354_v12  ;;  %v879_v12 = vld [vmem:[#allocation11 + $0x268] sm:$0xff] }
 0x1c0   :  { %765 = vmatprep.subr.bf16.mxu0 %v7359_v13  ;;  %v8458_v13 = vld [vmem:[#allocation11 + $0x400] sm:$0xff] }
 0x1c3   :  { %766 = vmatpush1.bf16.msra.mxu0 %v7357_v14  ;;  %v8460_v14 = vld [vmem:[#allocation11 + $0x420] sm:$0xff] }
 0x1c4   :  { %767 = vmatprep.subr.bf16.mxu0 %v7362_v15  ;;  %v8462_v15 = vld [vmem:[#allocation11 + $0x408] sm:$0xff] }
 0x1c7   :  { %768 = vmatpush1.bf16.msra.mxu0 %v7360_v16  ;;  %v6505_v16 = vcombine.high %v8458_v13, %v8460_v14 }
 0x1c8   :  { %769 = vmatprep.subr.bf16.mxu0 %v7365_v17  ;;  %v8466_v17 = vld [vmem:[#allocation11 + $0x428] sm:$0xff] }
 0x1cb   :  { %770 = vmatpush1.bf16.msra.mxu0 %v7363_v18  ;;  %v6442_v18 = vcombine.low %v867_v3, %v871_v4  ;;  %v943_v3 = vld [vmem:[#allocation11 + $0x468] sm:$0xff] }
 0x1cc   :  { %771 = vmatprep.subr.bf16.mxu0 %v7368_v19  ;;  %v6504_v19 = vcombine.low %v8458_v13, %v8460_v14 }
 0x1cf   :  { %772 = vmatpush1.bf16.msra.mxu0 %v7366_v20  ;;  %v6506_v20 = vcombine.low %v8462_v15, %v8466_v17 }
 0x1d0   :  { %773 = vmatprep.subr.bf16.mxu0 %v7371_v21  ;;  %v6451_v21 = vcombine.high %v875_v11, %v879_v12 }
 0x1d3   :  { %774 = vmatpush1.bf16.msra.mxu0 %v7369_v22  ;;  %v883_v22 = vld [vmem:[#allocation11 + $0x288] sm:$0xff] }
 0x1d4   :  { %775 = vmatprep.subr.bf16.mxu0 %v7374_v23  ;;  %v887_v23 = vld [vmem:[#allocation11 + $0x2a8] sm:$0xff] }
 0x1d5   :  { %v6458_v28 = vcombine.low %v883_v22, %v887_v23 }
 0x1d7   :  { %776 = vmatpush1.bf16.msra.mxu0 %v7372_v24  ;;  %v6450_v24 = vcombine.low %v875_v11, %v879_v12  ;;  %v951_v11 = vld [vmem:[#allocation11 + $0x4a8] sm:$0xff] }
 0x1d8   :  { %777 = vmatprep.subr.bf16.mxu0 %v7377_v25  ;;  %v6459_v25 = vcombine.high %v883_v22, %v887_v23  ;;  %v954_v22 = vld [vmem:[#allocation11 + $0x4c0] sm:$0xff] }
 0x1d9   :  { %v958_v23 = vld [vmem:[#allocation11 + $0x4e0] sm:$0xff] }
 0x1da   :  { %v6529_v13 = vcombine.high %v954_v22, %v958_v23 }
 0x1db   :  { %778 = vmatpush1.bf16.msra.mxu0 %v7375_v26  ;;  %v891_v26 = vld [vmem:[#allocation11 + $0x2c8] sm:$0xff] }
 0x1dc   :  { %779 = vmatprep.subr.bf16.mxu0 %v7380_v27  ;;  %v895_v27 = vld [vmem:[#allocation11 + $0x2e8] sm:$0xff] }
 0x1dd   :  { %v6467_v29 = vcombine.high %v891_v26, %v895_v27  ;;  %v6466_v32 = vcombine.low %v891_v26, %v895_v27 }
 0x1df   :  { %780 = vmatpush1.bf16.msra.mxu0 %v7378_v30  ;;  %v899_v30 = vld [vmem:[#allocation11 + $0x308] sm:$0xff] }
 0x1e0   :  { %2462 = vmatprep.subr.bf16.mxu0 %v6379_v31  ;;  %v903_v31 = vld [vmem:[#allocation11 + $0x328] sm:$0xff] }
 0x1e1   :  { %v6475_v33 = vcombine.high %v899_v30, %v903_v31  ;;  %v6474_v37 = vcombine.low %v899_v30, %v903_v31 }
 0x1e2   :  { %782 = vmatmul.mubr.bf16.vlgmr.msra.gmra.mrb[8].mxu0 %v8454_v62  ;;  %v918_v62 = vld [vmem:[#allocation11 + $0x3a0] sm:$0xff] }
 0x1e3   :  { %2463 = vmatpush1.bf16.msra.mxu0 %v6378_v35  ;;  %v6489_v63 = vcombine.high %v914_v61, %v918_v62  ;;  %v6488_v1 = vcombine.low %v914_v61, %v918_v62  ;;  %v907_v35 = vld [vmem:[#allocation11 + $0x348] sm:$0xff] }
 0x1e4   :  { %2464 = vmatprep.subr.bf16.mxu0 %v6387_v36  ;;  %v911_v36 = vld [vmem:[#allocation11 + $0x368] sm:$0xff] }
 0x1e5   :  { %2408 = vmatprep.subr.bf16.mxu1 %v6489_v63  ;;  %v6483_v38 = vcombine.high %v907_v35, %v911_v36  ;;  %v6482_v43 = vcombine.low %v907_v35, %v911_v36  ;;  %v938_v63 = vld [vmem:[#allocation11 + $0x440] sm:$0xff]  ;;  %v971_v35 = vld [vmem:[#allocation11 + $0x548] sm:$0xff] }
 0x1e6   :  { %2409 = vmatpush1.bf16.msra.mxu1 %v6488_v1  ;;  %v942_v1 = vld [vmem:[#allocation11 + $0x460] sm:$0xff]  ;;  %v975_v36 = vld [vmem:[#allocation11 + $0x568] sm:$0xff] }
 0x1e7   :  { %2465 = vmatpush1.bf16.msra.mxu0 %v6386_v39  ;;  %2410 = vmatprep.subr.bf16.mxu1 %v6497_v7  ;;  %v915_v39 = vld [vmem:[#allocation11 + $0x388] sm:$0xff]  ;;  %v6513_v6 = vcombine.high %v938_v63, %v942_v1  ;;  %v6512_v12 = vcombine.low %v938_v63, %v942_v1 }
 0x1e8   :  { %2466 = vmatprep.subr.bf16.mxu0 %v6395_v41  ;;  %v919_v41 = vld [vmem:[#allocation11 + $0x3a8] sm:$0xff] }
 0x1e9   :  { %v6491_v44 = vcombine.high %v915_v39, %v919_v41  ;;  %v6490_v47 = vcombine.low %v915_v39, %v919_v41  ;;  %v6547_v41 = vcombine.high %v971_v35, %v975_v36  ;;  %v999_v63 = vld [vmem:[#allocation11 + $0x628] sm:$0xff] }
 0x1ea   :  { %2411 = vmatpush1.bf16.msra.mxu1 %v6496_v9  ;;  %v950_v9 = vld [vmem:[#allocation11 + $0x4a0] sm:$0xff] }
 0x1eb   :  { %2467 = vmatpush1.bf16.msra.mxu0 %v6394_v45  ;;  %2421 = vmatprep.subr.bf16.mxu1 %v6505_v16  ;;  %v923_v45 = vld [vmem:[#allocation11 + $0x3c8] sm:$0xff] }
 0x1ec   :  { %2468 = vmatprep.subr.bf16.mxu0 %v6403_v46  ;;  %v927_v46 = vld [vmem:[#allocation11 + $0x3e8] sm:$0xff] }
 0x1ed   :  { %v6499_v48 = vcombine.high %v923_v45, %v927_v46 }
 0x1ef   :  { %2469 = vmatpush1.bf16.msra.mxu0 %v6402_v49  ;;  %v6498_v49 = vcombine.low %v923_v45, %v927_v46  ;;  %v979_v45 = vld [vmem:[#allocation11 + $0x588] sm:$0xff] }
 0x1f0   :  { %2470 = vmatprep.subr.bf16.mxu0 %v6411_v50  ;;  %v6507_v50 = vcombine.high %v8462_v15, %v8466_v17  ;;  %v962_v15 = vld [vmem:[#allocation11 + $0x500] sm:$0xff]  ;;  %v983_v46 = vld [vmem:[#allocation11 + $0x5a8] sm:$0xff] }
 0x1f1   :  { %v966_v17 = vld [vmem:[#allocation11 + $0x520] sm:$0xff] }
 0x1f2   :  { %v6537_v30 = vcombine.high %v962_v15, %v966_v17 }
 0x1f3   :  { %2471 = vmatpush1.bf16.msra.mxu0 %v6410_v53  ;;  %v375_v53 = vrot.slane %v8474_v51, %v8450_v42 }
 0x1f4   :  { %2472 = vmatprep.subr.bf16.mxu0 %v6419_v54 }
 0x1f7   :  { %2473 = vmatpush1.bf16.msra.mxu0 %v6418_v57 }
 0x1f8   :  { %2474 = vmatprep.subr.bf16.mxu0 %v6427_v58 }
 0x1fb   :  { %2475 = vmatpush1.bf16.msra.mxu0 %v6426_v0 }
 0x1fc   :  { %2476 = vmatprep.subr.bf16.mxu0 %v6435_v2  ;;  %v939_v2 = vld [vmem:[#allocation11 + $0x448] sm:$0xff] }
 0x1fd   :  { %v6515_v7 = vcombine.high %v939_v2, %v943_v3  ;;  %v6514_v16 = vcombine.low %v939_v2, %v943_v3 }
 0x1ff   :  { %2477 = vmatpush1.bf16.msra.mxu0 %v6434_v8  ;;  %v946_v8 = vld [vmem:[#allocation11 + $0x480] sm:$0xff] }
 0x200   :  { %2478 = vmatprep.subr.bf16.mxu0 %v6443_v10  ;;  %v947_v10 = vld [vmem:[#allocation11 + $0x488] sm:$0xff]  ;;  %v6520_v26 = vcombine.low %v946_v8, %v950_v9 }
 0x201   :  { %v6522_v27 = vcombine.low %v947_v10, %v951_v11 }
 0x203   :  { %2479 = vmatpush1.bf16.msra.mxu0 %v6442_v18  ;;  %v6521_v18 = vcombine.high %v946_v8, %v950_v9  ;;  %v1003_v8 = vld [vmem:[#allocation11 + $0x648] sm:$0xff] }
 0x204   :  { %2480 = vmatprep.subr.bf16.mxu0 %v6451_v21  ;;  %v6523_v21 = vcombine.high %v947_v10, %v951_v11  ;;  %v1007_v9 = vld [vmem:[#allocation11 + $0x668] sm:$0xff] }
 0x207   :  { %2481 = vmatpush1.bf16.msra.mxu0 %v6450_v24  ;;  %v955_v24 = vld [vmem:[#allocation11 + $0x4c8] sm:$0xff] }
 0x208   :  { %2482 = vmatprep.subr.bf16.mxu0 %v6459_v25  ;;  %v959_v25 = vld [vmem:[#allocation11 + $0x4e8] sm:$0xff] }
 0x209   :  { %v6531_v14 = vcombine.high %v955_v24, %v959_v25 }
 0x20b   :  { %2483 = vmatpush1.bf16.msra.mxu0 %v6458_v28  ;;  %v6528_v28 = vcombine.low %v954_v22, %v958_v23  ;;  %v1011_v22 = vld [vmem:[#allocation11 + $0x688] sm:$0xff] }
 0x20c   :  { %2484 = vmatprep.subr.bf16.mxu0 %v6467_v29  ;;  %v6530_v29 = vcombine.low %v955_v24, %v959_v25  ;;  %v1015_v23 = vld [vmem:[#allocation11 + $0x6a8] sm:$0xff]  ;;  %v6578_v25 = vcombine.low %v1003_v8, %v1007_v9 }
 0x20f   :  { %2485 = vmatpush1.bf16.msra.mxu0 %v6466_v32  ;;  %v970_v32 = vld [vmem:[#allocation11 + $0x540] sm:$0xff] }
 0x210   :  { %2486 = vmatprep.subr.bf16.mxu0 %v6475_v33  ;;  %v974_v33 = vld [vmem:[#allocation11 + $0x560] sm:$0xff] }
 0x211   :  { %v6545_v39 = vcombine.high %v970_v32, %v974_v33 }
 0x213   :  { %2487 = vmatpush1.bf16.msra.mxu0 %v6474_v37  ;;  %v6536_v37 = vcombine.low %v962_v15, %v966_v17  ;;  %v1019_v15 = vld [vmem:[#allocation11 + $0x6c8] sm:$0xff] }
 0x214   :  { %2488 = vmatprep.subr.bf16.mxu0 %v6483_v38  ;;  %v1023_v17 = vld [vmem:[#allocation11 + $0x6e8] sm:$0xff] }
 0x217   :  { %2489 = vmatpush1.bf16.msra.mxu0 %v6482_v43  ;;  %v978_v43 = vld [vmem:[#allocation11 + $0x580] sm:$0xff] }
 0x218   :  { %2490 = vmatprep.subr.bf16.mxu0 %v6491_v44  ;;  %v982_v44 = vld [vmem:[#allocation11 + $0x5a0] sm:$0xff] }
 0x21b   :  { %2491 = vmatpush1.bf16.msra.mxu0 %v6490_v47  ;;  %v6544_v47 = vcombine.low %v970_v32, %v974_v33  ;;  %v1027_v32 = vld [vmem:[#allocation11 + $0x708] sm:$0xff] }
 0x21c   :  { %2492 = vmatprep.subr.bf16.mxu0 %v6499_v48  ;;  %v6546_v48 = vcombine.low %v971_v35, %v975_v36  ;;  %v1031_v33 = vld [vmem:[#allocation11 + $0x728] sm:$0xff]  ;;  %v6594_v36 = vcombine.low %v1019_v15, %v1023_v17 }
 0x21f   :  { %2493 = vmatpush1.bf16.msra.mxu0 %v6498_v49  ;;  %v6553_v49 = vcombine.high %v978_v43, %v982_v44 }
 0x220   :  { %2503 = vmatprep.subr.bf16.mxu0 %v6507_v50  ;;  %v6555_v50 = vcombine.high %v979_v45, %v983_v46 }
 0x275   :  { %v742_v54 = vpop.f32.mrb[4].mxu0 }
 0x276   :  { %v743_v55 = vadd.f32 %v742_v54, %v371_v52  ;;  %v744_v56 = vpop.f32.mrb[5].mxu0  ;;  %v986_v52 = vld [vmem:[#allocation11 + $0x5c0] sm:$0xff]  ;;  %v987_v54 = vld [vmem:[#allocation11 + $0x5c8] sm:$0xff] }
 0x277   :  { %v745_v57 = vadd.f32 %v744_v56, %v375_v53  ;;  %v746_v58 = vpop.f32.mrb[6].mxu0  ;;  %v990_v53 = vld [vmem:[#allocation11 + $0x5e0] sm:$0xff]  ;;  %v6552_v56 = vcombine.low %v978_v43, %v982_v44  ;;  %v1035_v43 = vld [vmem:[#allocation11 + $0x748] sm:$0xff] }
 0x278   :  { %v790_v59 = vmul.f32 0.2, %v743_v55  ;;  %v747_v60 = vpop.f32.mrb[7].mxu0  ;;  %v6561_v58 = vcombine.high %v986_v52, %v990_v53  ;;  %v1039_v44 = vld [vmem:[#allocation11 + $0x768] sm:$0xff] }
 0x279   :  { %v791_v61 = vmul.f32 0.2, %v745_v57  ;;  %v994_v60 = vld [vmem:[#allocation11 + $0x600] sm:$0xff] }
 0x27a   :  { %v794_v62 = vmax.f32 %v743_v55, %v790_v59  ;;  %v991_v55 = vld [vmem:[#allocation11 + $0x5e8] sm:$0xff] }
 0x27b   :  { %v795_v0 = vmax.f32 %v745_v57, %v791_v61  ;;  %v6554_v57 = vcombine.low %v979_v45, %v983_v46  ;;  %v6563_v59 = vcombine.high %v987_v54, %v991_v55  ;;  %v998_v61 = vld [vmem:[#allocation11 + $0x620] sm:$0xff]  ;;  %v6562_v1 = vcombine.low %v987_v54, %v991_v55  ;;  %v1043_v54 = vld [vmem:[#allocation11 + $0x788] sm:$0xff] }
 0x27c   :  { %v8482_v5 = vpack.c.bf16 %v794_v62, %v794_v62  ;;  %v995_v62 = vld [vmem:[#allocation11 + $0x608] sm:$0xff]  ;;  %v6569_v2 = vcombine.high %v994_v60, %v998_v61  ;;  %v6568_v10 = vcombine.low %v994_v60, %v998_v61  ;;  %v6602_v46 = vcombine.low %v1027_v32, %v1031_v33  ;;  %v1050_v61 = vld [vmem:[#allocation11 + $0x7c0] sm:$0xff] }
 0x27d   :  { %v8480_v4 = vpack.c.bf16 %v795_v0, %v795_v0  ;;  %v6560_v0 = vcombine.low %v986_v52, %v990_v53  ;;  %v6571_v3 = vcombine.high %v995_v62, %v999_v63  ;;  %v6570_v11 = vcombine.low %v995_v62, %v999_v63  ;;  %v1046_v53 = vld [vmem:[#allocation11 + $0x7a0] sm:$0xff]  ;;  %v1047_v55 = vld [vmem:[#allocation11 + $0x7a8] sm:$0xff] }
 0x27e   :  { %v8498_v52 = vsub.s32 3, %v8444_v34  ;;  %v6619_v60 = vcombine.high %v1043_v54, %v1047_v55  ;;  %v1054_v63 = vld [vmem:[#allocation11 + $0x7e0] sm:$0xff] }
 0x27f   :  { %2412 = vmatprep.mubr.bf16.mxu1 %v8480_v4  ;;  %2494 = vmatprep.mubr.bf16.mxu0 %v8480_v4 }
 0x280   :  { %2413 = vmatmul.mubr.bf16.vlgmr.msra.gmra.mrb[0].mxu1 %v8482_v5  ;;  %2495 = vmatmul.mubr.bf16.vlgmr.msra.gmra.mrb[12].mxu0 %v8482_v5  ;;  %v383_v62 = vrot.slane %v8474_v51, %v8498_v52 }
 0x281   :  { %2422 = vmatpush1.bf16.msra.mxu1 %v6504_v19  ;;  %2504 = vmatpush1.bf16.msra.mxu0 %v6506_v20  ;;  %v963_v19 = vld [vmem:[#allocation11 + $0x508] sm:$0xff] }
 0x282   :  { %2423 = vmatprep.subr.bf16.mxu1 %v6513_v6  ;;  %2505 = vmatprep.subr.bf16.mxu0 %v6515_v7  ;;  %v967_v20 = vld [vmem:[#allocation11 + $0x528] sm:$0xff]  ;;  %v1002_v6 = vld [vmem:[#allocation11 + $0x640] sm:$0xff] }
 0x283   :  { %v6539_v31 = vcombine.high %v963_v19, %v967_v20  ;;  %v6538_v38 = vcombine.low %v963_v19, %v967_v20  ;;  %v1006_v7 = vld [vmem:[#allocation11 + $0x660] sm:$0xff]  ;;  %v6586_v20 = vcombine.low %v1011_v22, %v1015_v23 }
 0x284   :  { %v6576_v24 = vcombine.low %v1002_v6, %v1006_v7 }
 0x285   :  { %2424 = vmatpush1.bf16.msra.mxu1 %v6512_v12  ;;  %2506 = vmatpush1.bf16.msra.mxu0 %v6514_v16  ;;  %v6577_v12 = vcombine.high %v1002_v6, %v1006_v7  ;;  %v6579_v16 = vcombine.high %v1003_v8, %v1007_v9  ;;  %v6618_v6 = vcombine.low %v1043_v54, %v1047_v55 }
 0x286   :  { %2425 = vmatprep.subr.bf16.mxu1 %v6521_v18  ;;  %2507 = vmatprep.subr.bf16.mxu0 %v6523_v21  ;;  %v1010_v18 = vld [vmem:[#allocation11 + $0x680] sm:$0xff]  ;;  %v6625_v9 = vcombine.high %v1050_v61, %v1054_v63 }
 0x287   :  { %v1014_v21 = vld [vmem:[#allocation11 + $0x6a0] sm:$0xff] }
 0x288   :  { %v6584_v19 = vcombine.low %v1010_v18, %v1014_v21 }
 0x289   :  { %2426 = vmatpush1.bf16.msra.mxu1 %v6520_v26  ;;  %2508 = vmatpush1.bf16.msra.mxu0 %v6522_v27  ;;  %v6585_v26 = vcombine.high %v1010_v18, %v1014_v21  ;;  %v6587_v27 = vcombine.high %v1011_v22, %v1015_v23  ;;  %v808_v18 = vld [vmem:[#allocation11 + $0x30] sm:$0xff]  ;;  %v805_v21 = vld [vmem:[#allocation11 + $0x18] sm:$0xff] }
 0x28a   :  { %2427 = vmatprep.subr.bf16.mxu1 %v6529_v13  ;;  %2509 = vmatprep.subr.bf16.mxu0 %v6531_v14  ;;  %v1018_v13 = vld [vmem:[#allocation11 + $0x6c0] sm:$0xff] }
 0x28b   :  { %v1022_v14 = vld [vmem:[#allocation11 + $0x6e0] sm:$0xff] }
 0x28c   :  { %v6592_v35 = vcombine.low %v1018_v13, %v1022_v14 }
 0x28d   :  { %2428 = vmatpush1.bf16.msra.mxu1 %v6528_v28  ;;  %2510 = vmatpush1.bf16.msra.mxu0 %v6530_v29  ;;  %v6593_v28 = vcombine.high %v1018_v13, %v1022_v14  ;;  %v6595_v29 = vcombine.high %v1019_v15, %v1023_v17  ;;  %v812_v17 = vld [vmem:[#allocation11 + $0x50] sm:$0xff] }
 0x28e   :  { %2429 = vmatprep.subr.bf16.mxu1 %v6537_v30  ;;  %2511 = vmatprep.subr.bf16.mxu0 %v6539_v31  ;;  %v1026_v30 = vld [vmem:[#allocation11 + $0x700] sm:$0xff] }
 0x28f   :  { %v1030_v31 = vld [vmem:[#allocation11 + $0x720] sm:$0xff] }
 0x290   :  { %v6600_v45 = vcombine.low %v1026_v30, %v1030_v31 }
 0x291   :  { %2430 = vmatpush1.bf16.msra.mxu1 %v6536_v37  ;;  %2512 = vmatpush1.bf16.msra.mxu0 %v6538_v38  ;;  %v6601_v37 = vcombine.high %v1026_v30, %v1030_v31  ;;  %v6603_v38 = vcombine.high %v1027_v32, %v1031_v33 }
 0x292   :  { %2431 = vmatprep.subr.bf16.mxu1 %v6545_v39  ;;  %2513 = vmatprep.subr.bf16.mxu0 %v6547_v41  ;;  %v1034_v39 = vld [vmem:[#allocation11 + $0x740] sm:$0xff] }
 0x293   :  { %v1038_v41 = vld [vmem:[#allocation11 + $0x760] sm:$0xff] }
 0x295   :  { %2432 = vmatpush1.bf16.msra.mxu1 %v6544_v47  ;;  %2514 = vmatpush1.bf16.msra.mxu0 %v6546_v48  ;;  %v6609_v47 = vcombine.high %v1034_v39, %v1038_v41  ;;  %v6611_v48 = vcombine.high %v1035_v43, %v1039_v44 }
 0x296   :  { %2433 = vmatprep.subr.bf16.mxu1 %v6553_v49  ;;  %2515 = vmatprep.subr.bf16.mxu0 %v6555_v50  ;;  %v8495_v49 = vsub.s32 2, %v8444_v34  ;;  %v1042_v50 = vld [vmem:[#allocation11 + $0x780] sm:$0xff] }
 0x299   :  { %2434 = vmatpush1.bf16.msra.mxu1 %v6552_v56  ;;  %2516 = vmatpush1.bf16.msra.mxu0 %v6554_v57  ;;  %v6608_v56 = vcombine.low %v1034_v39, %v1038_v41  ;;  %v6610_v57 = vcombine.low %v1035_v43, %v1039_v44  ;;  %v825_v39 = vld [vmem:[#allocation11 + $0xb8] sm:$0xff] }
 0x29a   :  { %2435 = vmatprep.subr.bf16.mxu1 %v6561_v58  ;;  %2517 = vmatprep.subr.bf16.mxu0 %v6563_v59  ;;  %v379_v58 = vrot.slane %v8474_v51, %v8495_v49  ;;  %v6617_v59 = vcombine.high %v1042_v50, %v1046_v53  ;;  %v809_v51 = vld [vmem:[#allocation11 + $0x38] sm:$0xff] }
 0x29b   :  { %v6383_v14 = vcombine.high %v805_v21, %v809_v51  ;;  %v6382_v32 = vcombine.low %v805_v21, %v809_v51 }
 0x29d   :  { %2436 = vmatpush1.bf16.msra.mxu1 %v6560_v0  ;;  %2518 = vmatpush1.bf16.msra.mxu0 %v6562_v1  ;;  %v1051_v0 = vld [vmem:[#allocation11 + $0x7c8] sm:$0xff] }
 0x29e   :  { %2437 = vmatprep.subr.bf16.mxu1 %v6569_v2  ;;  %2519 = vmatprep.subr.bf16.mxu0 %v6571_v3  ;;  %v1055_v1 = vld [vmem:[#allocation11 + $0x7e8] sm:$0xff]  ;;  %v6616_v3 = vcombine.low %v1042_v50, %v1046_v53  ;;  %v833_v50 = vld [vmem:[#allocation11 + $0xf8] sm:$0xff] }
 0x2a1   :  { %2438 = vmatpush1.bf16.msra.mxu1 %v6568_v10  ;;  %2520 = vmatpush1.bf16.msra.mxu0 %v6570_v11  ;;  %v6627_v10 = vcombine.high %v1051_v0, %v1055_v1  ;;  %v804_v11 = vld [vmem:[#allocation11 + $0x10] sm:$0xff] }
 0x2a2   :  { %2439 = vmatprep.subr.bf16.mxu1 %v6577_v12  ;;  %2521 = vmatprep.subr.bf16.mxu0 %v6579_v16  ;;  %v6381_v13 = vcombine.high %v804_v11, %v808_v18  ;;  %v6380_v30 = vcombine.low %v804_v11, %v808_v18  ;;  %v856_v11 = vld [vmem:[#allocation11 + $0x1b0] sm:$0xff] }
 0x2a5   :  { %2440 = vmatpush1.bf16.msra.mxu1 %v6576_v24  ;;  %2522 = vmatpush1.bf16.msra.mxu0 %v6578_v25  ;;  %v6624_v25 = vcombine.low %v1050_v61, %v1054_v63 }
 0x2a6   :  { %2441 = vmatprep.subr.bf16.mxu1 %v6585_v26  ;;  %2523 = vmatprep.subr.bf16.mxu0 %v6587_v27  ;;  %v6626_v26 = vcombine.low %v1051_v0, %v1055_v1  ;;  %v844_v0 = vld [vmem:[#allocation11 + $0x150] sm:$0xff] }
 0x2a7   :  { %v848_v1 = vld [vmem:[#allocation11 + $0x170] sm:$0xff] }
 0x2a8   :  { %v6420_v18 = vcombine.low %v844_v0, %v848_v1 }
 0x2a9   :  { %2442 = vmatpush1.bf16.msra.mxu1 %v6584_v19  ;;  %2524 = vmatpush1.bf16.msra.mxu0 %v6586_v20  ;;  %v816_v19 = vld [vmem:[#allocation11 + $0x70] sm:$0xff]  ;;  %v813_v20 = vld [vmem:[#allocation11 + $0x58] sm:$0xff] }
 0x2aa   :  { %2443 = vmatprep.subr.bf16.mxu1 %v6593_v28  ;;  %2525 = vmatprep.subr.bf16.mxu0 %v6595_v29  ;;  %v817_v28 = vld [vmem:[#allocation11 + $0x78] sm:$0xff]  ;;  %v6389_v33 = vcombine.high %v812_v17, %v816_v19  ;;  %v6388_v41 = vcombine.low %v812_v17, %v816_v19  ;;  %v868_v17 = vld [vmem:[#allocation11 + $0x210] sm:$0xff] }
 0x2ab   :  { %v6390_v43 = vcombine.low %v813_v20, %v817_v28  ;;  %v872_v19 = vld [vmem:[#allocation11 + $0x230] sm:$0xff] }
 0x2ad   :  { %2444 = vmatpush1.bf16.msra.mxu1 %v6592_v35  ;;  %2526 = vmatpush1.bf16.msra.mxu0 %v6594_v36  ;;  %v6391_v35 = vcombine.high %v813_v20, %v817_v28  ;;  %v820_v36 = vld [vmem:[#allocation11 + $0x90] sm:$0xff]  ;;  %v869_v20 = vld [vmem:[#allocation11 + $0x218] sm:$0xff] }
 0x2ae   :  { %2445 = vmatprep.subr.bf16.mxu1 %v6601_v37  ;;  %2527 = vmatprep.subr.bf16.mxu0 %v6603_v38  ;;  %v824_v37 = vld [vmem:[#allocation11 + $0xb0] sm:$0xff]  ;;  %v821_v38 = vld [vmem:[#allocation11 + $0x98] sm:$0xff] }
 0x2af   :  { %v6397_v44 = vcombine.high %v820_v36, %v824_v37  ;;  %v6396_v53 = vcombine.low %v820_v36, %v824_v37  ;;  %v6398_v54 = vcombine.low %v821_v38, %v825_v39  ;;  %v873_v28 = vld [vmem:[#allocation11 + $0x238] sm:$0xff]  ;;  %v876_v36 = vld [vmem:[#allocation11 + $0x250] sm:$0xff] }
 0x2b0   :  { %v880_v37 = vld [vmem:[#allocation11 + $0x270] sm:$0xff] }
 0x2b1   :  { %2446 = vmatpush1.bf16.msra.mxu1 %v6600_v45  ;;  %2528 = vmatpush1.bf16.msra.mxu0 %v6602_v46  ;;  %v6399_v45 = vcombine.high %v821_v38, %v825_v39  ;;  %v828_v46 = vld [vmem:[#allocation11 + $0xd0] sm:$0xff]  ;;  %v877_v38 = vld [vmem:[#allocation11 + $0x258] sm:$0xff] }
 0x2b2   :  { %2447 = vmatprep.subr.bf16.mxu1 %v6609_v47  ;;  %2529 = vmatprep.subr.bf16.mxu0 %v6611_v48  ;;  %v832_v47 = vld [vmem:[#allocation11 + $0xf0] sm:$0xff]  ;;  %v829_v48 = vld [vmem:[#allocation11 + $0xd8] sm:$0xff] }
 0x2b3   :  { %v6405_v55 = vcombine.high %v828_v46, %v832_v47  ;;  %v6406_v61 = vcombine.low %v829_v48, %v833_v50  ;;  %v881_v39 = vld [vmem:[#allocation11 + $0x278] sm:$0xff] }
 0x2b5   :  { %v783_v2 = vpop.f32.mrb[8].mxu0  ;;  %2448 = vmatpush1.bf16.msra.mxu1 %v6608_v56  ;;  %2530 = vmatpush1.bf16.msra.mxu0 %v6610_v57  ;;  %v6407_v56 = vcombine.high %v829_v48, %v833_v50  ;;  %v836_v57 = vld [vmem:[#allocation11 + $0x110] sm:$0xff]  ;;  %v885_v48 = vld [vmem:[#allocation11 + $0x298] sm:$0xff] }
 0x2b6   :  { %v784_v7 = vadd.f32 %v783_v2, %v379_v58  ;;  %v785_v8 = vpop.f32.mrb[9].mxu0  ;;  %2449 = vmatprep.subr.bf16.mxu1 %v6617_v59  ;;  %2531 = vmatprep.subr.bf16.mxu0 %v6619_v60  ;;  %v840_v58 = vld [vmem:[#allocation11 + $0x130] sm:$0xff]  ;;  %v841_v59 = vld [vmem:[#allocation11 + $0x138] sm:$0xff]  ;;  %v6404_v60 = vcombine.low %v828_v46, %v832_v47 }
 0x2b7   :  { %v786_v12 = vadd.f32 %v785_v8, %v383_v62  ;;  %v787_v16 = vpop.f32.mrb[10].mxu0  ;;  %v6413_v62 = vcombine.high %v836_v57, %v840_v58  ;;  %v845_v2 = vld [vmem:[#allocation11 + $0x158] sm:$0xff]  ;;  %v6421_v8 = vcombine.high %v844_v0, %v848_v1  ;;  %v884_v46 = vld [vmem:[#allocation11 + $0x290] sm:$0xff] }
 0x2b8   :  { %v792_v22 = vmul.f32 0.2, %v784_v7  ;;  %v788_v23 = vpop.f32.mrb[11].mxu0  ;;  %v857_v16 = vld [vmem:[#allocation11 + $0x1b8] sm:$0xff]  ;;  %v888_v47 = vld [vmem:[#allocation11 + $0x2b0] sm:$0xff] }
 0x2b9   :  { %v793_v24 = vmul.f32 0.2, %v786_v12  ;;  %2450 = vmatpush1.bf16.msra.mxu1 %v6616_v3  ;;  %2532 = vmatpush1.bf16.msra.mxu0 %v6618_v6  ;;  %v849_v3 = vld [vmem:[#allocation11 + $0x178] sm:$0xff]  ;;  %v6412_v6 = vcombine.low %v836_v57, %v840_v58  ;;  %v860_v23 = vld [vmem:[#allocation11 + $0x1d0] sm:$0xff] }
 0x2ba   :  { %v796_v27 = vmax.f32 %v784_v7, %v792_v22  ;;  %2451 = vmatprep.subr.bf16.mxu1 %v6625_v9  ;;  %2533 = vmatprep.subr.bf16.mxu0 %v6627_v10  ;;  %v6423_v9 = vcombine.high %v845_v2, %v849_v3  ;;  %v852_v10 = vld [vmem:[#allocation11 + $0x190] sm:$0xff]  ;;  %v6422_v21 = vcombine.low %v845_v2, %v849_v3  ;;  %v889_v50 = vld [vmem:[#allocation11 + $0x2b8] sm:$0xff] }
 0x2bb   :  { %v797_v15 = vmax.f32 %v786_v12, %v793_v24  ;;  %v853_v12 = vld [vmem:[#allocation11 + $0x198] sm:$0xff]  ;;  %v6429_v51 = vcombine.high %v852_v10, %v856_v11  ;;  %v864_v24 = vld [vmem:[#allocation11 + $0x1f0] sm:$0xff] }
 0x2bc   :  { %v8506_v31 = vpack.c.bf16 %v796_v27, %v796_v27  ;;  %v6431_v22 = vcombine.high %v853_v12, %v857_v16  ;;  %v6428_v27 = vcombine.low %v852_v10, %v856_v11  ;;  %v892_v57 = vld [vmem:[#allocation11 + $0x2d0] sm:$0xff]  ;;  %v901_v2 = vld [vmem:[#allocation11 + $0x318] sm:$0xff] }
 0x2bd   :  { %v8504_v29 = vpack.c.bf16 %v797_v15, %v797_v15  ;;  %2452 = vmatpush1.bf16.msra.mxu1 %v6624_v25  ;;  %2534 = vmatpush1.bf16.msra.mxu0 %v6626_v26  ;;  %v861_v25 = vld [vmem:[#allocation11 + $0x1d8] sm:$0xff]  ;;  %v896_v58 = vld [vmem:[#allocation11 + $0x2f0] sm:$0xff] }
 0x2be   :  { %2544 = vmatprep.subr.bf16.mxu1 %v6381_v13  ;;  %2626 = vmatprep.subr.bf16.mxu0 %v6383_v14  ;;  %v865_v26 = vld [vmem:[#allocation11 + $0x1f8] sm:$0xff]  ;;  %v6430_v13 = vcombine.low %v853_v12, %v857_v16  ;;  %v6437_v14 = vcombine.high %v860_v23, %v864_v24  ;;  %v900_v0 = vld [vmem:[#allocation11 + $0x310] sm:$0xff] }
 0x2bf   :  { %2453 = vmatprep.mubr.bf16.mxu1 %v8504_v29  ;;  %2535 = vmatprep.mubr.bf16.mxu0 %v8504_v29  ;;  %v6439_v15 = vcombine.high %v861_v25, %v865_v26  ;;  %v904_v1 = vld [vmem:[#allocation11 + $0x330] sm:$0xff]  ;;  %v905_v3 = vld [vmem:[#allocation11 + $0x338] sm:$0xff] }
 0x2c0   :  { %2454 = vmatmul.mubr.bf16.vlgmr.msra.gmra.mrb[0].mxu1 %v8506_v31  ;;  %2536 = vmatmul.mubr.bf16.vlgmr.msra.gmra.mrb[12].mxu0 %v8506_v31  ;;  %v908_v10 = vld [vmem:[#allocation11 + $0x350] sm:$0xff]  ;;  %v909_v12 = vld [vmem:[#allocation11 + $0x358] sm:$0xff] }
 0x2c1   :  { %2545 = vmatpush1.bf16.msra.mxu1 %v6380_v30  ;;  %2576 = vmatprep.mubr.bf16.mxu1 %v8480_v4  ;;  %v6436_v30 = vcombine.low %v860_v23, %v864_v24  ;;  %v912_v11 = vld [vmem:[#allocation11 + $0x370] sm:$0xff]  ;;  %v913_v16 = vld [vmem:[#allocation11 + $0x378] sm:$0xff] }
 0x2c2   :  { %2627 = vmatpush1.bf16.msra.mxu0 %v6382_v32  ;;  %2658 = vmatprep.mubr.bf16.mxu0 %v8480_v4  ;;  %v837_v4 = vld [vmem:[#allocation11 + $0x118] sm:$0xff]  ;;  %v6438_v32 = vcombine.low %v861_v25, %v865_v26  ;;  %v916_v23 = vld [vmem:[#allocation11 + $0x390] sm:$0xff] }
 0x2c3   :  { %2546 = vmatprep.subr.bf16.mxu1 %v6389_v33  ;;  %2628 = vmatprep.subr.bf16.mxu0 %v6391_v35  ;;  %v6415_v63 = vcombine.high %v837_v4, %v841_v59  ;;  %v6414_v7 = vcombine.low %v837_v4, %v841_v59  ;;  %v6445_v33 = vcombine.high %v868_v17, %v872_v19  ;;  %v893_v4 = vld [vmem:[#allocation11 + $0x2d8] sm:$0xff]  ;;  %v920_v24 = vld [vmem:[#allocation11 + $0x3b0] sm:$0xff] }
 0x2c4   :  { %v6447_v35 = vcombine.high %v869_v20, %v873_v28  ;;  %v897_v59 = vld [vmem:[#allocation11 + $0x2f8] sm:$0xff] }
 0x2c5   :  { %2547 = vmatpush1.bf16.msra.mxu1 %v6388_v41  ;;  %v6444_v41 = vcombine.low %v868_v17, %v872_v19  ;;  %v917_v25 = vld [vmem:[#allocation11 + $0x398] sm:$0xff]  ;;  %v924_v17 = vld [vmem:[#allocation11 + $0x3d0] sm:$0xff] }
 0x2c6   :  { %2629 = vmatpush1.bf16.msra.mxu0 %v6390_v43  ;;  %2548 = vmatprep.subr.bf16.mxu1 %v6397_v44  ;;  %v6446_v43 = vcombine.low %v869_v20, %v873_v28  ;;  %v6453_v44 = vcombine.high %v876_v36, %v880_v37  ;;  %v921_v26 = vld [vmem:[#allocation11 + $0x3b8] sm:$0xff]  ;;  %v928_v19 = vld [vmem:[#allocation11 + $0x3f0] sm:$0xff] }
 0x2c7   :  { %2630 = vmatprep.subr.bf16.mxu0 %v6399_v45  ;;  %v6455_v45 = vcombine.high %v877_v38, %v881_v39  ;;  %v925_v20 = vld [vmem:[#allocation11 + $0x3d8] sm:$0xff] }
 0x2c8   :  { %v929_v28 = vld [vmem:[#allocation11 + $0x3f8] sm:$0xff] }
 0x2c9   :  { %2549 = vmatpush1.bf16.msra.mxu1 %v6396_v53  ;;  %v6452_v53 = vcombine.low %v876_v36, %v880_v37  ;;  %v932_v36 = vld [vmem:[#allocation11 + $0x410] sm:$0xff] }
 0x2ca   :  { %2631 = vmatpush1.bf16.msra.mxu0 %v6398_v54  ;;  %2550 = vmatprep.subr.bf16.mxu1 %v6405_v55  ;;  %v6454_v54 = vcombine.low %v877_v38, %v881_v39  ;;  %v6461_v55 = vcombine.high %v884_v46, %v888_v47  ;;  %v936_v37 = vld [vmem:[#allocation11 + $0x430] sm:$0xff]  ;;  %v933_v38 = vld [vmem:[#allocation11 + $0x418] sm:$0xff] }
 0x2cb   :  { %2632 = vmatprep.subr.bf16.mxu0 %v6407_v56  ;;  %v6463_v56 = vcombine.high %v885_v48, %v889_v50  ;;  %v937_v39 = vld [vmem:[#allocation11 + $0x438] sm:$0xff] }
 0x2cd   :  { %2551 = vmatpush1.bf16.msra.mxu1 %v6404_v60  ;;  %v6460_v60 = vcombine.low %v884_v46, %v888_v47  ;;  %v940_v46 = vld [vmem:[#allocation11 + $0x450] sm:$0xff] }
 0x2ce   :  { %2633 = vmatpush1.bf16.msra.mxu0 %v6406_v61  ;;  %2552 = vmatprep.subr.bf16.mxu1 %v6413_v62  ;;  %v6462_v61 = vcombine.low %v885_v48, %v889_v50  ;;  %v6469_v62 = vcombine.high %v892_v57, %v896_v58  ;;  %v944_v47 = vld [vmem:[#allocation11 + $0x470] sm:$0xff]  ;;  %v6508_v48 = vcombine.low %v932_v36, %v936_v37  ;;  %v941_v50 = vld [vmem:[#allocation11 + $0x458] sm:$0xff] }
 0x2cf   :  { %2634 = vmatprep.subr.bf16.mxu0 %v6415_v63  ;;  %v6471_v63 = vcombine.high %v893_v4, %v897_v59 }
 0x2d1   :  { %2553 = vmatpush1.bf16.msra.mxu1 %v6412_v6  ;;  %v6468_v6 = vcombine.low %v892_v57, %v896_v58  ;;  %v952_v57 = vld [vmem:[#allocation11 + $0x4b0] sm:$0xff] }
 0x2d2   :  { %2635 = vmatpush1.bf16.msra.mxu0 %v6414_v7  ;;  %2554 = vmatprep.subr.bf16.mxu1 %v6421_v8  ;;  %v6470_v7 = vcombine.low %v893_v4, %v897_v59  ;;  %v6477_v8 = vcombine.high %v900_v0, %v904_v1  ;;  %v949_v4 = vld [vmem:[#allocation11 + $0x498] sm:$0xff] }
 0x2d3   :  { %2636 = vmatprep.subr.bf16.mxu0 %v6423_v9  ;;  %v6479_v9 = vcombine.high %v901_v2, %v905_v3  ;;  %v953_v59 = vld [vmem:[#allocation11 + $0x4b8] sm:$0xff] }
 0x2d5   :  { %2555 = vmatpush1.bf16.msra.mxu1 %v6420_v18  ;;  %v6476_v18 = vcombine.low %v900_v0, %v904_v1  ;;  %v956_v0 = vld [vmem:[#allocation11 + $0x4d0] sm:$0xff] }
 0x2d6   :  { %2637 = vmatpush1.bf16.msra.mxu0 %v6422_v21  ;;  %2556 = vmatprep.subr.bf16.mxu1 %v6429_v51  ;;  %v6478_v21 = vcombine.low %v901_v2, %v905_v3  ;;  %v6485_v51 = vcombine.high %v908_v10, %v912_v11  ;;  %v960_v1 = vld [vmem:[#allocation11 + $0x4f0] sm:$0xff]  ;;  %v957_v2 = vld [vmem:[#allocation11 + $0x4d8] sm:$0xff] }
 0x2d7   :  { %2638 = vmatprep.subr.bf16.mxu0 %v6431_v22  ;;  %v6487_v22 = vcombine.high %v909_v12, %v913_v16  ;;  %v961_v3 = vld [vmem:[#allocation11 + $0x4f8] sm:$0xff] }
 0x2d9   :  { %2557 = vmatpush1.bf16.msra.mxu1 %v6428_v27  ;;  %v6484_v27 = vcombine.low %v908_v10, %v912_v11  ;;  %v968_v10 = vld [vmem:[#allocation11 + $0x530] sm:$0xff]  ;;  %v965_v11 = vld [vmem:[#allocation11 + $0x518] sm:$0xff] }
 0x2da   :  { %2639 = vmatpush1.bf16.msra.mxu0 %v6430_v13  ;;  %2558 = vmatprep.subr.bf16.mxu1 %v6437_v14  ;;  %v6486_v13 = vcombine.low %v909_v12, %v913_v16  ;;  %v6493_v14 = vcombine.high %v916_v23, %v920_v24  ;;  %v969_v12 = vld [vmem:[#allocation11 + $0x538] sm:$0xff]  ;;  %v6534_v16 = vcombine.low %v957_v2, %v961_v3 }
 0x2db   :  { %2640 = vmatprep.subr.bf16.mxu0 %v6439_v15  ;;  %v6495_v15 = vcombine.high %v917_v25, %v921_v26 }
 0x2dd   :  { %2559 = vmatpush1.bf16.msra.mxu1 %v6436_v30  ;;  %v6492_v30 = vcombine.low %v916_v23, %v920_v24  ;;  %v973_v23 = vld [vmem:[#allocation11 + $0x558] sm:$0xff] }
 0x2de   :  { %2641 = vmatpush1.bf16.msra.mxu0 %v6438_v32  ;;  %2560 = vmatprep.subr.bf16.mxu1 %v6445_v33  ;;  %v6494_v32 = vcombine.low %v917_v25, %v921_v26  ;;  %v6501_v33 = vcombine.high %v924_v17, %v928_v19  ;;  %v977_v24 = vld [vmem:[#allocation11 + $0x578] sm:$0xff]  ;;  %v6542_v26 = vcombine.low %v965_v11, %v969_v12 }
 0x2df   :  { %2642 = vmatprep.subr.bf16.mxu0 %v6447_v35  ;;  %v6503_v35 = vcombine.high %v925_v20, %v929_v28 }
 0x2e1   :  { %2561 = vmatpush1.bf16.msra.mxu1 %v6444_v41  ;;  %v6500_v41 = vcombine.low %v924_v17, %v928_v19  ;;  %v981_v17 = vld [vmem:[#allocation11 + $0x598] sm:$0xff] }
 0x2e2   :  { %2643 = vmatpush1.bf16.msra.mxu0 %v6446_v43  ;;  %2562 = vmatprep.subr.bf16.mxu1 %v6453_v44  ;;  %v6502_v43 = vcombine.low %v925_v20, %v929_v28  ;;  %v6509_v44 = vcombine.high %v932_v36, %v936_v37  ;;  %v985_v19 = vld [vmem:[#allocation11 + $0x5b8] sm:$0xff]  ;;  %v6550_v28 = vcombine.low %v973_v23, %v977_v24 }
 0x2e3   :  { %2644 = vmatprep.subr.bf16.mxu0 %v6455_v45  ;;  %v6511_v45 = vcombine.high %v933_v38, %v937_v39  ;;  %v989_v36 = vld [vmem:[#allocation11 + $0x5d8] sm:$0xff] }
 0x2e4   :  { %v993_v37 = vld [vmem:[#allocation11 + $0x5f8] sm:$0xff] }
 0x2e5   :  { %2563 = vmatpush1.bf16.msra.mxu1 %v6452_v53  ;;  %v945_v53 = vld [vmem:[#allocation11 + $0x478] sm:$0xff] }
 0x2e6   :  { %2645 = vmatpush1.bf16.msra.mxu0 %v6454_v54  ;;  %2564 = vmatprep.subr.bf16.mxu1 %v6461_v55  ;;  %v6510_v54 = vcombine.low %v933_v38, %v937_v39  ;;  %v6517_v55 = vcombine.high %v940_v46, %v944_v47  ;;  %v6519_v58 = vcombine.high %v941_v50, %v945_v53 }
 0x2e7   :  { %2646 = vmatprep.subr.bf16.mxu0 %v6463_v56  ;;  %v948_v56 = vld [vmem:[#allocation11 + $0x490] sm:$0xff]  ;;  %v6558_v39 = vcombine.low %v981_v17, %v985_v19 }
 0x2e9   :  { %2565 = vmatpush1.bf16.msra.mxu1 %v6460_v60  ;;  %v6516_v60 = vcombine.low %v940_v46, %v944_v47  ;;  %v997_v46 = vld [vmem:[#allocation11 + $0x618] sm:$0xff] }
 0x2ea   :  { %2647 = vmatpush1.bf16.msra.mxu0 %v6462_v61  ;;  %2566 = vmatprep.subr.bf16.mxu1 %v6469_v62  ;;  %v6518_v61 = vcombine.low %v941_v50, %v945_v53  ;;  %v6525_v62 = vcombine.high %v948_v56, %v952_v57  ;;  %v1001_v47 = vld [vmem:[#allocation11 + $0x638] sm:$0xff]  ;;  %v6566_v50 = vcombine.low %v989_v36, %v993_v37 }
 0x2eb   :  { %2648 = vmatprep.subr.bf16.mxu0 %v6471_v63  ;;  %v6527_v63 = vcombine.high %v949_v4, %v953_v59 }
 0x2ed   :  { %2567 = vmatpush1.bf16.msra.mxu1 %v6468_v6  ;;  %v6524_v6 = vcombine.low %v948_v56, %v952_v57  ;;  %v1008_v56 = vld [vmem:[#allocation11 + $0x670] sm:$0xff]  ;;  %v1005_v57 = vld [vmem:[#allocation11 + $0x658] sm:$0xff] }
 0x2ee   :  { %2649 = vmatpush1.bf16.msra.mxu0 %v6470_v7  ;;  %2568 = vmatprep.subr.bf16.mxu1 %v6477_v8  ;;  %v6533_v7 = vcombine.high %v956_v0, %v960_v1  ;;  %v6535_v8 = vcombine.high %v957_v2, %v961_v3 }
 0x2ef   :  { %2650 = vmatprep.subr.bf16.mxu0 %v6479_v9  ;;  %v964_v9 = vld [vmem:[#allocation11 + $0x510] sm:$0xff] }
 0x2f0   :  { %v6540_v25 = vcombine.low %v964_v9, %v968_v10 }
 0x2f1   :  { %2569 = vmatpush1.bf16.msra.mxu1 %v6476_v18  ;;  %v6541_v18 = vcombine.high %v964_v9, %v968_v10  ;;  %v1021_v9 = vld [vmem:[#allocation11 + $0x6d8] sm:$0xff] }
 0x2f2   :  { %2651 = vmatpush1.bf16.msra.mxu0 %v6478_v21  ;;  %2570 = vmatprep.subr.bf16.mxu1 %v6485_v51  ;;  %v6543_v21 = vcombine.high %v965_v11, %v969_v12  ;;  %v972_v51 = vld [vmem:[#allocation11 + $0x550] sm:$0xff]  ;;  %v1025_v10 = vld [vmem:[#allocation11 + $0x6f8] sm:$0xff] }
 0x2f3   :  { %2652 = vmatprep.subr.bf16.mxu0 %v6487_v22  ;;  %v976_v22 = vld [vmem:[#allocation11 + $0x570] sm:$0xff] }
 0x2f4   :  { %v6548_v20 = vcombine.low %v972_v51, %v976_v22 }
 0x2f5   :  { %2571 = vmatpush1.bf16.msra.mxu1 %v6484_v27  ;;  %v6549_v27 = vcombine.high %v972_v51, %v976_v22  ;;  %v1029_v51 = vld [vmem:[#allocation11 + $0x718] sm:$0xff] }
 0x2f6   :  { %2653 = vmatpush1.bf16.msra.mxu0 %v6486_v13  ;;  %2572 = vmatprep.subr.bf16.mxu1 %v6493_v14  ;;  %v6551_v13 = vcombine.high %v973_v23, %v977_v24  ;;  %v980_v14 = vld [vmem:[#allocation11 + $0x590] sm:$0xff]  ;;  %v1033_v22 = vld [vmem:[#allocation11 + $0x738] sm:$0xff]  ;;  %v6598_v24 = vcombine.low %v1021_v9, %v1025_v10 }
 0x2f7   :  { %2654 = vmatprep.subr.bf16.mxu0 %v6495_v15  ;;  %v984_v15 = vld [vmem:[#allocation11 + $0x5b0] sm:$0xff] }
 0x2f8   :  { %v6556_v38 = vcombine.low %v980_v14, %v984_v15 }
 0x2f9   :  { %2573 = vmatpush1.bf16.msra.mxu1 %v6492_v30  ;;  %v6557_v30 = vcombine.high %v980_v14, %v984_v15  ;;  %v1037_v14 = vld [vmem:[#allocation11 + $0x758] sm:$0xff] }
 0x2fa   :  { %2655 = vmatpush1.bf16.msra.mxu0 %v6494_v32  ;;  %2574 = vmatprep.subr.bf16.mxu1 %v6501_v33  ;;  %v6559_v32 = vcombine.high %v981_v17, %v985_v19  ;;  %v988_v33 = vld [vmem:[#allocation11 + $0x5d0] sm:$0xff]  ;;  %v1041_v15 = vld [vmem:[#allocation11 + $0x778] sm:$0xff]  ;;  %v6606_v19 = vcombine.low %v1029_v51, %v1033_v22 }
 0x2fb   :  { %2656 = vmatprep.subr.bf16.mxu0 %v6503_v35  ;;  %v992_v35 = vld [vmem:[#allocation11 + $0x5f0] sm:$0xff] }
 0x2fd   :  { %2575 = vmatpush1.bf16.msra.mxu1 %v6500_v41  ;;  %v6565_v41 = vcombine.high %v988_v33, %v992_v35 }
 0x2fe   :  { %2657 = vmatpush1.bf16.msra.mxu0 %v6502_v43  ;;  %2585 = vmatprep.subr.bf16.mxu1 %v6509_v44  ;;  %v6567_v43 = vcombine.high %v989_v36, %v993_v37  ;;  %v996_v44 = vld [vmem:[#allocation11 + $0x610] sm:$0xff]  ;;  %v6614_v37 = vcombine.low %v1037_v14, %v1041_v15 }
 0x2ff   :  { %2667 = vmatprep.subr.bf16.mxu0 %v6511_v45  ;;  %v1000_v45 = vld [vmem:[#allocation11 + $0x630] sm:$0xff] }
 0x300   :  { %2577 = vmatmul.mubr.bf16.vlgmr.msra.gmra.mrb[4].mxu1 %v8482_v5  ;;  %v6573_v53 = vcombine.high %v996_v44, %v1000_v45 }
 0x301   :  { %2659 = vmatmul.mubr.bf16.vlgmr.msra.gmra.mrb[16].mxu0 %v8482_v5  ;;  %2586 = vmatpush1.bf16.msra.mxu1 %v6508_v48  ;;  %v6526_v5 = vcombine.low %v949_v4, %v953_v59  ;;  %v6564_v48 = vcombine.low %v988_v33, %v992_v35  ;;  %v6572_v4 = vcombine.low %v996_v44, %v1000_v45  ;;  %v1045_v33 = vld [vmem:[#allocation11 + $0x798] sm:$0xff] }
 0x302   :  { %2617 = vmatprep.mubr.bf16.mxu1 %v8504_v29  ;;  %2668 = vmatpush1.bf16.msra.mxu0 %v6510_v54  ;;  %v6575_v54 = vcombine.high %v997_v46, %v1001_v47  ;;  %v6574_v59 = vcombine.low %v997_v46, %v1001_v47  ;;  %v1049_v35 = vld [vmem:[#allocation11 + $0x7b8] sm:$0xff] }
 0x303   :  { %2699 = vmatprep.mubr.bf16.mxu0 %v8504_v29  ;;  %2587 = vmatprep.subr.bf16.mxu1 %v6517_v55  ;;  %v6532_v29 = vcombine.low %v956_v0, %v960_v1  ;;  %v1004_v55 = vld [vmem:[#allocation11 + $0x650] sm:$0xff]  ;;  %v1013_v0 = vld [vmem:[#allocation11 + $0x698] sm:$0xff]  ;;  %v6622_v47 = vcombine.low %v1045_v33, %v1049_v35 }
 0x304   :  { %2669 = vmatprep.subr.bf16.mxu0 %v6519_v58  ;;  %v1009_v58 = vld [vmem:[#allocation11 + $0x678] sm:$0xff]  ;;  %v6580_v2 = vcombine.low %v1004_v55, %v1008_v56 }
 0x305   :  { %2588 = vmatpush1.bf16.msra.mxu1 %v6516_v60  ;;  %v6581_v60 = vcombine.high %v1004_v55, %v1008_v56  ;;  %v1017_v1 = vld [vmem:[#allocation11 + $0x6b8] sm:$0xff]  ;;  %v6582_v3 = vcombine.low %v1005_v57, %v1009_v58  ;;  %v7383_v55 = vld [vmem:[#allocation14 + $0x4] ss:$28 sps:$4 sm:$0xff]   ;;  %v7386_v56 = vld [vmem:[#allocation14 + $0xc] ss:$28 sps:$4 sm:$0xff]  }
 0x306   :  { %2670 = vmatpush1.bf16.msra.mxu0 %v6518_v61  ;;  %2589 = vmatprep.subr.bf16.mxu1 %v6525_v62  ;;  %v6583_v61 = vcombine.high %v1005_v57, %v1009_v58  ;;  %v1012_v62 = vld [vmem:[#allocation11 + $0x690] sm:$0xff]  ;;  %v6590_v12 = vcombine.low %v1013_v0, %v1017_v1  ;;  %v1053_v44 = vld [vmem:[#allocation11 + $0x7d8] sm:$0xff]  ;;  %v7381_v57 = vld [vmem:[#allocation14] ss:$28 sps:$4 sm:$0xff]  }
 0x307   :  { %2671 = vmatprep.subr.bf16.mxu0 %v6527_v63  ;;  %v1016_v63 = vld [vmem:[#allocation11 + $0x6b0] sm:$0xff]  ;;  %v1057_v45 = vld [vmem:[#allocation11 + $0x7f8] sm:$0xff] }
 0x308   :  { %v6588_v11 = vcombine.low %v1012_v62, %v1016_v63  ;;  %v7384_v58 = vld [vmem:[#allocation14 + $0x8] ss:$28 sps:$4 sm:$0xff]  }
 0x309   :  { %2590 = vmatpush1.bf16.msra.mxu1 %v6524_v6  ;;  %v6589_v6 = vcombine.high %v1012_v62, %v1016_v63  ;;  %v7395_v62 = vld [vmem:[#allocation14 + $0x74] ss:$28 sps:$4 sm:$0xff]   ;;  %v7398_v63 = vld [vmem:[#allocation14 + $0x7c] ss:$28 sps:$4 sm:$0xff]  }
 0x30a   :  { %2672 = vmatpush1.bf16.msra.mxu0 %v6526_v5  ;;  %2591 = vmatprep.subr.bf16.mxu1 %v6533_v7  ;;  %v6591_v5 = vcombine.high %v1013_v0, %v1017_v1  ;;  %v1020_v7 = vld [vmem:[#allocation11 + $0x6d0] sm:$0xff]  ;;  %v7396_v1 = vld [vmem:[#allocation14 + $0x78] ss:$28 sps:$4 sm:$0xff]  }
 0x30b   :  { %2673 = vmatprep.subr.bf16.mxu0 %v6535_v8  ;;  %v1024_v8 = vld [vmem:[#allocation11 + $0x6f0] sm:$0xff] }
 0x30c   :  { %v6596_v23 = vcombine.low %v1020_v7, %v1024_v8  ;;  %v7393_v0 = vld [vmem:[#allocation14 + $0x70] ss:$28 sps:$4 sm:$0xff]  }
 0x30d   :  { %2592 = vmatpush1.bf16.msra.mxu1 %v6532_v29  ;;  %v6597_v29 = vcombine.high %v1020_v7, %v1024_v8  ;;  %v7410_v7 = vld [vmem:[#allocation14 + $0xec] ss:$28 sps:$4 sm:$0xff]   ;;  %v7405_v8 = vld [vmem:[#allocation14 + $0xe0] ss:$28 sps:$4 sm:$0xff]  }
 0x30e   :  { %2674 = vmatpush1.bf16.msra.mxu0 %v6534_v16  ;;  %2593 = vmatprep.subr.bf16.mxu1 %v6541_v18  ;;  %v6599_v16 = vcombine.high %v1021_v9, %v1025_v10  ;;  %v1028_v18 = vld [vmem:[#allocation11 + $0x710] sm:$0xff]  ;;  %v7413_v10 = vld [vmem:[#allocation14 + $0x11c] ss:$28 sps:$4 sm:$0xff]  }
 0x30f   :  { %2675 = vmatprep.subr.bf16.mxu0 %v6543_v21  ;;  %v1032_v21 = vld [vmem:[#allocation11 + $0x730] sm:$0xff] }
 0x310   :  { %v6604_v17 = vcombine.low %v1028_v18, %v1032_v21  ;;  %v7408_v9 = vld [vmem:[#allocation14 + $0xe8] ss:$28 sps:$4 sm:$0xff]  }
 0x311   :  { %2594 = vmatpush1.bf16.msra.mxu1 %v6540_v25  ;;  %v6605_v25 = vcombine.high %v1028_v18, %v1032_v21  ;;  %v7422_v18 = vld [vmem:[#allocation14 + $0x15c] ss:$28 sps:$4 sm:$0xff]   ;;  %v7417_v21 = vld [vmem:[#allocation14 + $0x150] ss:$28 sps:$4 sm:$0xff]  }
 0x312   :  { %2676 = vmatpush1.bf16.msra.mxu0 %v6542_v26  ;;  %2595 = vmatprep.subr.bf16.mxu1 %v6549_v27  ;;  %v6607_v26 = vcombine.high %v1029_v51, %v1033_v22  ;;  %v1036_v27 = vld [vmem:[#allocation11 + $0x750] sm:$0xff]  ;;  %v7420_v51 = vld [vmem:[#allocation14 + $0x158] ss:$28 sps:$4 sm:$0xff]  }
 0x313   :  { %2677 = vmatprep.subr.bf16.mxu0 %v6551_v13  ;;  %v1040_v13 = vld [vmem:[#allocation11 + $0x770] sm:$0xff] }
 0x314   :  { %v6612_v36 = vcombine.low %v1036_v27, %v1040_v13  ;;  %v7425_v22 = vld [vmem:[#allocation14 + $0x18c] ss:$28 sps:$4 sm:$0xff]  }
 0x315   :  { %2596 = vmatpush1.bf16.msra.mxu1 %v6548_v20  ;;  %v6613_v20 = vcombine.high %v1036_v27, %v1040_v13  ;;  %v7434_v27 = vld [vmem:[#allocation14 + $0x1cc] ss:$28 sps:$4 sm:$0xff]   ;;  %v7429_v13 = vld [vmem:[#allocation14 + $0x1c0] ss:$28 sps:$4 sm:$0xff]  }
 0x316   :  { %2678 = vmatpush1.bf16.msra.mxu0 %v6550_v28  ;;  %2597 = vmatprep.subr.bf16.mxu1 %v6557_v30  ;;  %v6615_v28 = vcombine.high %v1037_v14, %v1041_v15  ;;  %v1044_v30 = vld [vmem:[#allocation11 + $0x790] sm:$0xff]  ;;  %v7437_v15 = vld [vmem:[#allocation14 + $0x1fc] ss:$28 sps:$4 sm:$0xff]  }
 0x317   :  { %2679 = vmatprep.subr.bf16.mxu0 %v6559_v32  ;;  %v1048_v32 = vld [vmem:[#allocation11 + $0x7b0] sm:$0xff] }
 0x318   :  { %v6620_v46 = vcombine.low %v1044_v30, %v1048_v32  ;;  %v7432_v14 = vld [vmem:[#allocation14 + $0x1c8] ss:$28 sps:$4 sm:$0xff]  }
 0x319   :  { %2598 = vmatpush1.bf16.msra.mxu1 %v6556_v38  ;;  %v6621_v38 = vcombine.high %v1044_v30, %v1048_v32  ;;  %v7446_v30 = vld [vmem:[#allocation14 + $0x23c] ss:$28 sps:$4 sm:$0xff]   ;;  %v7441_v32 = vld [vmem:[#allocation14 + $0x230] ss:$28 sps:$4 sm:$0xff]  }
 0x31a   :  { %2680 = vmatpush1.bf16.msra.mxu0 %v6558_v39  ;;  %2599 = vmatprep.subr.bf16.mxu1 %v6565_v41  ;;  %v6623_v39 = vcombine.high %v1045_v33, %v1049_v35  ;;  %v1052_v41 = vld [vmem:[#allocation11 + $0x7d0] sm:$0xff]  ;;  %v7444_v33 = vld [vmem:[#allocation14 + $0x238] ss:$28 sps:$4 sm:$0xff]  }
 0x31b   :  { %2681 = vmatprep.subr.bf16.mxu0 %v6567_v43  ;;  %v1056_v43 = vld [vmem:[#allocation11 + $0x7f0] sm:$0xff] }
 0x31c   :  { %v7449_v35 = vld [vmem:[#allocation14 + $0x26c] ss:$28 sps:$4 sm:$0xff]  }
 0x31d   :  { %2600 = vmatpush1.bf16.msra.mxu1 %v6564_v48  ;;  %v6629_v48 = vcombine.high %v1052_v41, %v1056_v43 }
 0x31e   :  { %2682 = vmatpush1.bf16.msra.mxu0 %v6566_v50  ;;  %2601 = vmatprep.subr.bf16.mxu1 %v6573_v53  ;;  %v6631_v50 = vcombine.high %v1053_v44, %v1057_v45  ;;  %v6628_v53 = vcombine.low %v1052_v41, %v1056_v43  ;;  %v7458_v41 = vld [vmem:[#allocation14 + $0x2ac] ss:$28 sps:$4 sm:$0xff]   ;;  %v7453_v43 = vld [vmem:[#allocation14 + $0x2a0] ss:$28 sps:$4 sm:$0xff]  }
 0x31f   :  { %2683 = vmatprep.subr.bf16.mxu0 %v6575_v54  ;;  %v6630_v54 = vcombine.low %v1053_v44, %v1057_v45  ;;  %v7456_v44 = vld [vmem:[#allocation14 + $0x2a8] ss:$28 sps:$4 sm:$0xff]   ;;  %v7461_v45 = vld [vmem:[#allocation14 + $0x2dc] ss:$28 sps:$4 sm:$0xff]  }
 0x321   :  { %2602 = vmatpush1.bf16.msra.mxu1 %v6572_v4  ;;  %v7389_v4 = vld [vmem:[#allocation14 + $0x3c] ss:$28 sps:$4 sm:$0xff]  }
 0x322   :  { %2684 = vmatpush1.bf16.msra.mxu0 %v6574_v59  ;;  %2603 = vmatprep.subr.bf16.mxu1 %v6581_v60  ;;  %v7392_v59 = vld [vmem:[#allocation14 + $0x44] ss:$28 sps:$4 sm:$0xff]   ;;  %v7387_v60 = vld [vmem:[#allocation14 + $0x38] ss:$28 sps:$4 sm:$0xff]  }
 0x323   :  { %2685 = vmatprep.subr.bf16.mxu0 %v6583_v61  ;;  %v7390_v61 = vld [vmem:[#allocation14 + $0x40] ss:$28 sps:$4 sm:$0xff]  }
 0x325   :  { %2604 = vmatpush1.bf16.msra.mxu1 %v6580_v2  ;;  %v7401_v2 = vld [vmem:[#allocation14 + $0xac] ss:$28 sps:$4 sm:$0xff]  }
 0x326   :  { %2686 = vmatpush1.bf16.msra.mxu0 %v6582_v3  ;;  %2605 = vmatprep.subr.bf16.mxu1 %v6589_v6  ;;  %v7404_v3 = vld [vmem:[#allocation14 + $0xb4] ss:$28 sps:$4 sm:$0xff]   ;;  %v7399_v6 = vld [vmem:[#allocation14 + $0xa8] ss:$28 sps:$4 sm:$0xff]  }
 0x327   :  { %2687 = vmatprep.subr.bf16.mxu0 %v6591_v5  ;;  %v7407_v5 = vld [vmem:[#allocation14 + $0xe4] ss:$28 sps:$4 sm:$0xff]  }
 0x329   :  { %2606 = vmatpush1.bf16.msra.mxu1 %v6588_v11  ;;  %v7416_v11 = vld [vmem:[#allocation14 + $0x124] ss:$28 sps:$4 sm:$0xff]  }
 0x32a   :  { %2688 = vmatpush1.bf16.msra.mxu0 %v6590_v12  ;;  %2607 = vmatprep.subr.bf16.mxu1 %v6597_v29  ;;  %v7411_v12 = vld [vmem:[#allocation14 + $0x118] ss:$28 sps:$4 sm:$0xff]   ;;  %v7414_v29 = vld [vmem:[#allocation14 + $0x120] ss:$28 sps:$4 sm:$0xff]  }
 0x32b   :  { %2689 = vmatprep.subr.bf16.mxu0 %v6599_v16  ;;  %v7419_v16 = vld [vmem:[#allocation14 + $0x154] ss:$28 sps:$4 sm:$0xff]  }
 0x32d   :  { %2608 = vmatpush1.bf16.msra.mxu1 %v6596_v23  ;;  %v7428_v23 = vld [vmem:[#allocation14 + $0x194] ss:$28 sps:$4 sm:$0xff]  }
 0x32e   :  { %2690 = vmatpush1.bf16.msra.mxu0 %v6598_v24  ;;  %2609 = vmatprep.subr.bf16.mxu1 %v6605_v25  ;;  %v7423_v24 = vld [vmem:[#allocation14 + $0x188] ss:$28 sps:$4 sm:$0xff]   ;;  %v7426_v25 = vld [vmem:[#allocation14 + $0x190] ss:$28 sps:$4 sm:$0xff]  }
 0x32f   :  { %2691 = vmatprep.subr.bf16.mxu0 %v6607_v26  ;;  %v7431_v26 = vld [vmem:[#allocation14 + $0x1c4] ss:$28 sps:$4 sm:$0xff]  }
 0x331   :  { %2610 = vmatpush1.bf16.msra.mxu1 %v6604_v17  ;;  %v7440_v17 = vld [vmem:[#allocation14 + $0x204] ss:$28 sps:$4 sm:$0xff]  }
 0x332   :  { %2692 = vmatpush1.bf16.msra.mxu0 %v6606_v19  ;;  %2611 = vmatprep.subr.bf16.mxu1 %v6613_v20  ;;  %v7435_v19 = vld [vmem:[#allocation14 + $0x1f8] ss:$28 sps:$4 sm:$0xff]   ;;  %v7438_v20 = vld [vmem:[#allocation14 + $0x200] ss:$28 sps:$4 sm:$0xff]  }
 0x333   :  { %2693 = vmatprep.subr.bf16.mxu0 %v6615_v28  ;;  %v7443_v28 = vld [vmem:[#allocation14 + $0x234] ss:$28 sps:$4 sm:$0xff]  }
 0x335   :  { %2612 = vmatpush1.bf16.msra.mxu1 %v6612_v36  ;;  %v7452_v36 = vld [vmem:[#allocation14 + $0x274] ss:$28 sps:$4 sm:$0xff]  }
 0x336   :  { %2694 = vmatpush1.bf16.msra.mxu0 %v6614_v37  ;;  %2613 = vmatprep.subr.bf16.mxu1 %v6621_v38  ;;  %v7447_v37 = vld [vmem:[#allocation14 + $0x268] ss:$28 sps:$4 sm:$0xff]   ;;  %v7450_v38 = vld [vmem:[#allocation14 + $0x270] ss:$28 sps:$4 sm:$0xff]  }
 0x337   :  { %2695 = vmatprep.subr.bf16.mxu0 %v6623_v39  ;;  %v7455_v39 = vld [vmem:[#allocation14 + $0x2a4] ss:$28 sps:$4 sm:$0xff]  }
 0x339   :  { %2614 = vmatpush1.bf16.msra.mxu1 %v6620_v46  ;;  %v7464_v46 = vld [vmem:[#allocation14 + $0x2e4] ss:$28 sps:$4 sm:$0xff]  }
 0x33a   :  { %2696 = vmatpush1.bf16.msra.mxu0 %v6622_v47  ;;  %2615 = vmatprep.subr.bf16.mxu1 %v6629_v48  ;;  %v7459_v47 = vld [vmem:[#allocation14 + $0x2d8] ss:$28 sps:$4 sm:$0xff]   ;;  %v7462_v48 = vld [vmem:[#allocation14 + $0x2e0] ss:$28 sps:$4 sm:$0xff]  }
 0x33b   :  { %2697 = vmatprep.subr.bf16.mxu0 %v6631_v50  ;;  %v7467_v50 = vld [vmem:[#allocation14 + $0x314] ss:$28 sps:$4 sm:$0xff]  }
 0x33d   :  { %2616 = vmatpush1.bf16.msra.mxu1 %v6628_v53  ;;  %v7470_v53 = vld [vmem:[#allocation14 + $0x31c] ss:$28 sps:$4 sm:$0xff]  }
 0x33e   :  { %2698 = vmatpush1.bf16.msra.mxu0 %v6630_v54  ;;  %5585 = vmatprep.subr.bf16.mxu1 %v7383_v55  ;;  %v7465_v54 = vld [vmem:[#allocation14 + $0x310] ss:$28 sps:$4 sm:$0xff]   ;;  %v7468_v55 = vld [vmem:[#allocation14 + $0x318] ss:$28 sps:$4 sm:$0xff]  }
 0x33f   :  { %5749 = vmatprep.subr.bf16.mxu0 %v7386_v56  ;;  %v7473_v56 = vld [vmem:[#allocation14 + $0x34c] ss:$28 sps:$4 sm:$0xff]  }
 0x340   :  { %2618 = vmatmul.mubr.bf16.vlgmr.msra.gmra.mrb[4].mxu1 %v8506_v31 }
 0x341   :  { %2700 = vmatmul.mubr.bf16.vlgmr.msra.gmra.mrb[16].mxu0 %v8506_v31  ;;  %5586 = vmatpush1.bf16.msra.mxu1 %v7381_v57  ;;  %v7402_v31 = vld [vmem:[#allocation14 + $0xb0] ss:$28 sps:$4 sm:$0xff]  }
 0x342   :  { %5750 = vmatpush1.bf16.msra.mxu0 %v7384_v58  ;;  %5587 = vmatprep.subr.bf16.mxu1 %v7389_v4  ;;  %v7476_v57 = vld [vmem:[#allocation14 + $0x354] ss:$28 sps:$4 sm:$0xff]   ;;  %v7471_v58 = vld [vmem:[#allocation14 + $0x348] ss:$28 sps:$4 sm:$0xff]  }
 0x343   :  { %5751 = vmatprep.subr.bf16.mxu0 %v7392_v59  ;;  %v7474_v4 = vld [vmem:[#allocation14 + $0x350] ss:$28 sps:$4 sm:$0xff]   ;;  %v7479_v59 = vld [vmem:[#allocation14 + $0x384] ss:$28 sps:$4 sm:$0xff]  }
 0x345   :  { %5588 = vmatpush1.bf16.msra.mxu1 %v7387_v60  ;;  %v7482_v60 = vld [vmem:[#allocation14 + $0x38c] ss:$28 sps:$4 sm:$0xff]  }
 0x346   :  { %5752 = vmatpush1.bf16.msra.mxu0 %v7390_v61  ;;  %5589 = vmatprep.subr.bf16.mxu1 %v7395_v62  ;;  %v8520_v61 = vld [vmem:[#allocation13] sm:$0xff] }
 0x347   :  { %5753 = vmatprep.subr.bf16.mxu0 %v7398_v63  ;;  %v1063_v62 = vrot.slane %v8520_v61, %v8447_v40  ;;  %v1067_v63 = vrot.slane %v8520_v61, %v8450_v42 }
 0x349   :  { %5590 = vmatpush1.bf16.msra.mxu1 %v7393_v0  ;;  %v1075_v0 = vrot.slane %v8520_v61, %v8498_v52 }
 0x34a   :  { %5754 = vmatpush1.bf16.msra.mxu0 %v7396_v1  ;;  %5591 = vmatprep.subr.bf16.mxu1 %v7401_v2 }
 0x34b   :  { %5755 = vmatprep.subr.bf16.mxu0 %v7404_v3 }
 0x34d   :  { %5592 = vmatpush1.bf16.msra.mxu1 %v7399_v6 }
 0x34e   :  { %5756 = vmatpush1.bf16.msra.mxu0 %v7402_v31  ;;  %5593 = vmatprep.subr.bf16.mxu1 %v7407_v5 }
 0x34f   :  { %5757 = vmatprep.subr.bf16.mxu0 %v7410_v7 }
 0x351   :  { %5594 = vmatpush1.bf16.msra.mxu1 %v7405_v8 }
 0x352   :  { %5758 = vmatpush1.bf16.msra.mxu0 %v7408_v9  ;;  %5595 = vmatprep.subr.bf16.mxu1 %v7413_v10 }
 0x353   :  { %5759 = vmatprep.subr.bf16.mxu0 %v7416_v11 }
 0x355   :  { %5596 = vmatpush1.bf16.msra.mxu1 %v7411_v12 }
 0x356   :  { %5760 = vmatpush1.bf16.msra.mxu0 %v7414_v29  ;;  %5597 = vmatprep.subr.bf16.mxu1 %v7419_v16 }
 0x357   :  { %5761 = vmatprep.subr.bf16.mxu0 %v7422_v18 }
 0x359   :  { %5598 = vmatpush1.bf16.msra.mxu1 %v7417_v21 }
 0x35a   :  { %5762 = vmatpush1.bf16.msra.mxu0 %v7420_v51  ;;  %5599 = vmatprep.subr.bf16.mxu1 %v7425_v22 }
 0x35b   :  { %5763 = vmatprep.subr.bf16.mxu0 %v7428_v23  ;;  %v7477_v23 = vld [vmem:[#allocation14 + $0x380] ss:$28 sps:$4 sm:$0xff]  }
 0x35d   :  { %5600 = vmatpush1.bf16.msra.mxu1 %v7423_v24  ;;  %v7480_v24 = vld [vmem:[#allocation14 + $0x388] ss:$28 sps:$4 sm:$0xff]  }
 0x35e   :  { %5764 = vmatpush1.bf16.msra.mxu0 %v7426_v25  ;;  %5601 = vmatprep.subr.bf16.mxu1 %v7431_v26  ;;  %v7485_v26 = vld [vmem:[#allocation14 + $0x3bc] ss:$28 sps:$4 sm:$0xff]  }
 0x35f   :  { %5765 = vmatprep.subr.bf16.mxu0 %v7434_v27  ;;  %v7488_v27 = vld [vmem:[#allocation14 + $0x3c4] ss:$28 sps:$4 sm:$0xff]  }
 0x361   :  { %5602 = vmatpush1.bf16.msra.mxu1 %v7429_v13 }
 0x362   :  { %5766 = vmatpush1.bf16.msra.mxu0 %v7432_v14  ;;  %5603 = vmatprep.subr.bf16.mxu1 %v7437_v15  ;;  %v7483_v14 = vld [vmem:[#allocation14 + $0x3b8] ss:$28 sps:$4 sm:$0xff]   ;;  %v7486_v15 = vld [vmem:[#allocation14 + $0x3c0] ss:$28 sps:$4 sm:$0xff]  }
 0x363   :  { %5767 = vmatprep.subr.bf16.mxu0 %v7440_v17  ;;  %v7491_v17 = vld [vmem:[#allocation14 + $0x3f4] ss:$28 sps:$4 sm:$0xff]  }
 0x365   :  { %5604 = vmatpush1.bf16.msra.mxu1 %v7435_v19  ;;  %v7494_v19 = vld [vmem:[#allocation14 + $0x3fc] ss:$28 sps:$4 sm:$0xff]  }
 0x366   :  { %5768 = vmatpush1.bf16.msra.mxu0 %v7438_v20  ;;  %5605 = vmatprep.subr.bf16.mxu1 %v7443_v28  ;;  %v7489_v20 = vld [vmem:[#allocation14 + $0x3f0] ss:$28 sps:$4 sm:$0xff]   ;;  %v7492_v28 = vld [vmem:[#allocation14 + $0x3f8] ss:$28 sps:$4 sm:$0xff]  }
 0x367   :  { %5769 = vmatprep.subr.bf16.mxu0 %v7446_v30  ;;  %v7497_v30 = vld [vmem:[#allocation14 + $0x42c] ss:$28 sps:$4 sm:$0xff]  }
 0x369   :  { %5606 = vmatpush1.bf16.msra.mxu1 %v7441_v32  ;;  %v7500_v32 = vld [vmem:[#allocation14 + $0x434] ss:$28 sps:$4 sm:$0xff]  }
 0x36a   :  { %5770 = vmatpush1.bf16.msra.mxu0 %v7444_v33  ;;  %5607 = vmatprep.subr.bf16.mxu1 %v7449_v35  ;;  %v7495_v33 = vld [vmem:[#allocation14 + $0x428] ss:$28 sps:$4 sm:$0xff]   ;;  %v7498_v35 = vld [vmem:[#allocation14 + $0x430] ss:$28 sps:$4 sm:$0xff]  }
 0x36b   :  { %5771 = vmatprep.subr.bf16.mxu0 %v7452_v36  ;;  %v7503_v36 = vld [vmem:[#allocation14 + $0x464] ss:$28 sps:$4 sm:$0xff]  }
 0x36d   :  { %5608 = vmatpush1.bf16.msra.mxu1 %v7447_v37  ;;  %v7506_v37 = vld [vmem:[#allocation14 + $0x46c] ss:$28 sps:$4 sm:$0xff]  }
 0x36e   :  { %5772 = vmatpush1.bf16.msra.mxu0 %v7450_v38  ;;  %5609 = vmatprep.subr.bf16.mxu1 %v7455_v39  ;;  %v7501_v38 = vld [vmem:[#allocation14 + $0x460] ss:$28 sps:$4 sm:$0xff]   ;;  %v7504_v39 = vld [vmem:[#allocation14 + $0x468] ss:$28 sps:$4 sm:$0xff]  }
 0x36f   :  { %5773 = vmatprep.subr.bf16.mxu0 %v7458_v41  ;;  %v7509_v41 = vld [vmem:[#allocation14 + $0x49c] ss:$28 sps:$4 sm:$0xff]  }
 0x371   :  { %5610 = vmatpush1.bf16.msra.mxu1 %v7453_v43  ;;  %v7512_v43 = vld [vmem:[#allocation14 + $0x4a4] ss:$28 sps:$4 sm:$0xff]  }
 0x372   :  { %5774 = vmatpush1.bf16.msra.mxu0 %v7456_v44  ;;  %5611 = vmatprep.subr.bf16.mxu1 %v7461_v45  ;;  %v7507_v44 = vld [vmem:[#allocation14 + $0x498] ss:$28 sps:$4 sm:$0xff]   ;;  %v7510_v45 = vld [vmem:[#allocation14 + $0x4a0] ss:$28 sps:$4 sm:$0xff]  }
 0x373   :  { %5775 = vmatprep.subr.bf16.mxu0 %v7464_v46  ;;  %v7515_v46 = vld [vmem:[#allocation14 + $0x4d4] ss:$28 sps:$4 sm:$0xff]  }
 0x375   :  { %5612 = vmatpush1.bf16.msra.mxu1 %v7459_v47  ;;  %v7518_v47 = vld [vmem:[#allocation14 + $0x4dc] ss:$28 sps:$4 sm:$0xff]  }
 0x376   :  { %5776 = vmatpush1.bf16.msra.mxu0 %v7462_v48  ;;  %5613 = vmatprep.subr.bf16.mxu1 %v7467_v50  ;;  %v7513_v48 = vld [vmem:[#allocation14 + $0x4d0] ss:$28 sps:$4 sm:$0xff]   ;;  %v7516_v50 = vld [vmem:[#allocation14 + $0x4d8] ss:$28 sps:$4 sm:$0xff]  }
 0x377   :  { %5777 = vmatprep.subr.bf16.mxu0 %v7470_v53  ;;  %v7521_v53 = vld [vmem:[#allocation14 + $0x50c] ss:$28 sps:$4 sm:$0xff]  }
 0x379   :  { %5614 = vmatpush1.bf16.msra.mxu1 %v7465_v54  ;;  %v7524_v54 = vld [vmem:[#allocation14 + $0x514] ss:$28 sps:$4 sm:$0xff]  }
 0x37a   :  { %5778 = vmatpush1.bf16.msra.mxu0 %v7468_v55  ;;  %5615 = vmatprep.subr.bf16.mxu1 %v7473_v56  ;;  %v7519_v55 = vld [vmem:[#allocation14 + $0x508] ss:$28 sps:$4 sm:$0xff]   ;;  %v7522_v56 = vld [vmem:[#allocation14 + $0x510] ss:$28 sps:$4 sm:$0xff]  }
 0x37b   :  { %5779 = vmatprep.subr.bf16.mxu0 %v7476_v57  ;;  %v7527_v57 = vld [vmem:[#allocation14 + $0x544] ss:$28 sps:$4 sm:$0xff]  }
 0x37d   :  { %5616 = vmatpush1.bf16.msra.mxu1 %v7471_v58  ;;  %v7530_v58 = vld [vmem:[#allocation14 + $0x54c] ss:$28 sps:$4 sm:$0xff]  }
 0x37e   :  { %5780 = vmatpush1.bf16.msra.mxu0 %v7474_v4  ;;  %5626 = vmatprep.subr.bf16.mxu1 %v7479_v59  ;;  %v7525_v4 = vld [vmem:[#allocation14 + $0x540] ss:$28 sps:$4 sm:$0xff]   ;;  %v7528_v59 = vld [vmem:[#allocation14 + $0x548] ss:$28 sps:$4 sm:$0xff]  }
 0x37f   :  { %5790 = vmatprep.subr.bf16.mxu0 %v7482_v60  ;;  %v7533_v60 = vld [vmem:[#allocation14 + $0x57c] ss:$28 sps:$4 sm:$0xff]  }
 0x393   :  { %v2455_v1 = vpop.f32.mrb[0].mxu1  ;;  %v8528_v2 = vpop.f32.mrb[12].mxu0 }
 0x394   :  { %v7176_v3 = vadd.f32 %v2455_v1, %v1063_v62  ;;  %v2457_v6 = vpop.f32.mrb[1].mxu1  ;;  %v2539_v31 = vpop.f32.mrb[13].mxu0  ;;  %v7536_v62 = vld [vmem:[#allocation14 + $0x584] ss:$28 sps:$4 sm:$0xff]   ;;  %v7539_v1 = vld [vmem:[#allocation14 + $0x5b4] ss:$28 sps:$4 sm:$0xff]  }
 0x395   :  { %v7177_v5 = vadd.f32 %v2457_v6, %v1067_v63  ;;  %v7179_v7 = vadd.f32 %v2539_v31, %v1075_v0  ;;  %v2459_v8 = vpop.f32.mrb[2].mxu1  ;;  %v2541_v9 = vpop.f32.mrb[14].mxu0  ;;  %v7531_v63 = vld [vmem:[#allocation14 + $0x578] ss:$28 sps:$4 sm:$0xff]   ;;  %v7534_v0 = vld [vmem:[#allocation14 + $0x580] ss:$28 sps:$4 sm:$0xff]  }
 0x396   :  { %v2708_v10 = vmul.f32 0.2, %v7176_v3  ;;  %v2460_v11 = vpop.f32.mrb[3].mxu1  ;;  %v2542_v12 = vpop.f32.mrb[15].mxu0  ;;  %v7537_v6 = vld [vmem:[#allocation14 + $0x5b0] ss:$28 sps:$4 sm:$0xff]  }
 0x397   :  { %v2709_v29 = vmul.f32 0.2, %v7177_v5  ;;  %v2711_v16 = vmul.f32 0.2, %v7179_v7  ;;  %v7540_v31 = vld [vmem:[#allocation14 + $0x5b8] ss:$28 sps:$4 sm:$0xff]  }
 0x398   :  { %v2716_v18 = vmax.f32 %v7176_v3, %v2708_v10  ;;  %v7542_v3 = vld [vmem:[#allocation14 + $0x5bc] ss:$28 sps:$4 sm:$0xff]   ;;  %v7543_v8 = vld [vmem:[#allocation14 + $0x5e8] ss:$28 sps:$4 sm:$0xff]   ;;  %v7546_v9 = vld [vmem:[#allocation14 + $0x5f0] ss:$28 sps:$4 sm:$0xff]  }
 0x399   :  { %v2717_v21 = vmax.f32 %v7177_v5, %v2709_v29  ;;  %v2719_v51 = vmax.f32 %v7179_v7, %v2711_v16  ;;  %v7545_v5 = vld [vmem:[#allocation14 + $0x5ec] ss:$28 sps:$4 sm:$0xff]   ;;  %v7548_v7 = vld [vmem:[#allocation14 + $0x5f4] ss:$28 sps:$4 sm:$0xff]   ;;  %v7551_v10 = vld [vmem:[#allocation14 + $0x624] ss:$28 sps:$4 sm:$0xff]   ;;  %v1071_v16 = vrot.slane %v8520_v61, %v8495_v49 }
 0x39a   :  { %v8532_v25 = vpack.c.bf16 %v2716_v18, %v2716_v18  ;;  %v7554_v11 = vld [vmem:[#allocation14 + $0x62c] ss:$28 sps:$4 sm:$0xff]   ;;  %v7549_v12 = vld [vmem:[#allocation14 + $0x620] ss:$28 sps:$4 sm:$0xff]  }
 0x39b   :  { %v8530_v22 = vpack.c.bf16 %v2717_v21, %v2717_v21  ;;  %v8536_v13 = vpack.c.bf16 %v2719_v51, %v2719_v51  ;;  %v7552_v29 = vld [vmem:[#allocation14 + $0x628] ss:$28 sps:$4 sm:$0xff]   ;;  %v7557_v18 = vld [vmem:[#allocation14 + $0x65c] ss:$28 sps:$4 sm:$0xff]  }
 0x39c   :  { %v7560_v21 = vld [vmem:[#allocation14 + $0x664] ss:$28 sps:$4 sm:$0xff]   ;;  %v7555_v51 = vld [vmem:[#allocation14 + $0x658] ss:$28 sps:$4 sm:$0xff]  }
 0x39d   :  { %5617 = vmatprep.mubr.bf16.mxu1 %v8530_v22  ;;  %5781 = vmatprep.mubr.bf16.mxu0 %v8530_v22 }
 0x39e   :  { %5618 = vmatmul.mubr.bf16.vlgmr.msra.gmra.mrb[8].mxu1 %v8532_v25  ;;  %5782 = vmatmul.mubr.bf16.vlgmr.msra.gmra.mrb[20].mxu0 %v8532_v25 }
 0x39f   :  { %5627 = vmatpush1.bf16.msra.mxu1 %v7477_v23  ;;  %5791 = vmatpush1.bf16.msra.mxu0 %v7480_v24  ;;  %v7558_v23 = vld [vmem:[#allocation14 + $0x660] ss:$28 sps:$4 sm:$0xff]   ;;  %v7178_v24 = vadd.f32 %v8528_v2, %v1071_v16  ;;  %v7627_v16 = vld [vmem:[#allocation14 + $0x8f8] ss:$28 sps:$4 sm:$0xff]  }
 0x3a0   :  { %5658 = vmatprep.mubr.bf16.mxu1 %v8536_v13  ;;  %5822 = vmatprep.mubr.bf16.mxu0 %v8536_v13  ;;  %v7575_v2 = vld [vmem:[#allocation14 + $0x704] ss:$28 sps:$4 sm:$0xff]  }
 0x3a1   :  { %5628 = vmatprep.subr.bf16.mxu1 %v7485_v26  ;;  %5792 = vmatprep.subr.bf16.mxu0 %v7488_v27  ;;  %v7563_v26 = vld [vmem:[#allocation14 + $0x694] ss:$28 sps:$4 sm:$0xff]   ;;  %v7566_v27 = vld [vmem:[#allocation14 + $0x69c] ss:$28 sps:$4 sm:$0xff]  }
 0x3a3   :  { %5629 = vmatpush1.bf16.msra.mxu1 %v7483_v14  ;;  %5793 = vmatpush1.bf16.msra.mxu0 %v7486_v15  ;;  %v7561_v14 = vld [vmem:[#allocation14 + $0x690] ss:$28 sps:$4 sm:$0xff]   ;;  %v7564_v15 = vld [vmem:[#allocation14 + $0x698] ss:$28 sps:$4 sm:$0xff]  }
 0x3a4   :  { %5630 = vmatprep.subr.bf16.mxu1 %v7491_v17  ;;  %5794 = vmatprep.subr.bf16.mxu0 %v7494_v19  ;;  %v2710_v17 = vmul.f32 0.2, %v7178_v24  ;;  %v7569_v19 = vld [vmem:[#allocation14 + $0x6cc] ss:$28 sps:$4 sm:$0xff]  }
 0x3a7   :  { %5631 = vmatpush1.bf16.msra.mxu1 %v7489_v20  ;;  %5795 = vmatpush1.bf16.msra.mxu0 %v7492_v28  ;;  %v7572_v20 = vld [vmem:[#allocation14 + $0x6d4] ss:$28 sps:$4 sm:$0xff]   ;;  %v7567_v28 = vld [vmem:[#allocation14 + $0x6c8] ss:$28 sps:$4 sm:$0xff]  }
 0x3a8   :  { %5632 = vmatprep.subr.bf16.mxu1 %v7497_v30  ;;  %5796 = vmatprep.subr.bf16.mxu0 %v7500_v32  ;;  %v7570_v30 = vld [vmem:[#allocation14 + $0x6d0] ss:$28 sps:$4 sm:$0xff]   ;;  %v2718_v32 = vmax.f32 %v7178_v24, %v2710_v17  ;;  %v7636_v24 = vld [vmem:[#allocation14 + $0x938] ss:$28 sps:$4 sm:$0xff]   ;;  %v7647_v17 = vld [vmem:[#allocation14 + $0x9a4] ss:$28 sps:$4 sm:$0xff]  }
 0x3ab   :  { %5633 = vmatpush1.bf16.msra.mxu1 %v7495_v33  ;;  %5797 = vmatpush1.bf16.msra.mxu0 %v7498_v35  ;;  %v7578_v33 = vld [vmem:[#allocation14 + $0x70c] ss:$28 sps:$4 sm:$0xff]   ;;  %v7573_v35 = vld [vmem:[#allocation14 + $0x700] ss:$28 sps:$4 sm:$0xff]  }
 0x3ac   :  { %5634 = vmatprep.subr.bf16.mxu1 %v7503_v36  ;;  %5798 = vmatprep.subr.bf16.mxu0 %v7506_v37  ;;  %v7576_v36 = vld [vmem:[#allocation14 + $0x708] ss:$28 sps:$4 sm:$0xff]   ;;  %v8545_v37 = vpack.c.bf16 %v2718_v32, %v2718_v32 }
 0x3ad   :  { %v7656_v32 = vld [vmem:[#allocation14 + $0x9e4] ss:$28 sps:$4 sm:$0xff]  }
 0x3af   :  { %5635 = vmatpush1.bf16.msra.mxu1 %v7501_v38  ;;  %5799 = vmatpush1.bf16.msra.mxu0 %v7504_v39  ;;  %v7581_v38 = vld [vmem:[#allocation14 + $0x73c] ss:$28 sps:$4 sm:$0xff]   ;;  %v7584_v39 = vld [vmem:[#allocation14 + $0x744] ss:$28 sps:$4 sm:$0xff]  }
 0x3b0   :  { %5636 = vmatprep.subr.bf16.mxu1 %v7509_v41  ;;  %5800 = vmatprep.subr.bf16.mxu0 %v7512_v43  ;;  %v7579_v41 = vld [vmem:[#allocation14 + $0x738] ss:$28 sps:$4 sm:$0xff]   ;;  %v7582_v43 = vld [vmem:[#allocation14 + $0x740] ss:$28 sps:$4 sm:$0xff]  }
 0x3b3   :  { %5637 = vmatpush1.bf16.msra.mxu1 %v7507_v44  ;;  %5801 = vmatpush1.bf16.msra.mxu0 %v7510_v45  ;;  %v7587_v44 = vld [vmem:[#allocation14 + $0x774] ss:$28 sps:$4 sm:$0xff]   ;;  %v7590_v45 = vld [vmem:[#allocation14 + $0x77c] ss:$28 sps:$4 sm:$0xff]  }
 0x3b4   :  { %5638 = vmatprep.subr.bf16.mxu1 %v7515_v46  ;;  %5802 = vmatprep.subr.bf16.mxu0 %v7518_v47  ;;  %v7585_v46 = vld [vmem:[#allocation14 + $0x770] ss:$28 sps:$4 sm:$0xff]   ;;  %v7588_v47 = vld [vmem:[#allocation14 + $0x778] ss:$28 sps:$4 sm:$0xff]  }
 0x3b7   :  { %5639 = vmatpush1.bf16.msra.mxu1 %v7513_v48  ;;  %5803 = vmatpush1.bf16.msra.mxu0 %v7516_v50  ;;  %v7593_v48 = vld [vmem:[#allocation14 + $0x7ac] ss:$28 sps:$4 sm:$0xff]   ;;  %v7596_v50 = vld [vmem:[#allocation14 + $0x7b4] ss:$28 sps:$4 sm:$0xff]  }
 0x3b8   :  { %5640 = vmatprep.subr.bf16.mxu1 %v7521_v53  ;;  %5804 = vmatprep.subr.bf16.mxu0 %v7524_v54  ;;  %v7591_v53 = vld [vmem:[#allocation14 + $0x7a8] ss:$28 sps:$4 sm:$0xff]   ;;  %v7594_v54 = vld [vmem:[#allocation14 + $0x7b0] ss:$28 sps:$4 sm:$0xff]  }
 0x3bb   :  { %5641 = vmatpush1.bf16.msra.mxu1 %v7519_v55  ;;  %5805 = vmatpush1.bf16.msra.mxu0 %v7522_v56  ;;  %v7599_v55 = vld [vmem:[#allocation14 + $0x7e4] ss:$28 sps:$4 sm:$0xff]   ;;  %v7602_v56 = vld [vmem:[#allocation14 + $0x7ec] ss:$28 sps:$4 sm:$0xff]  }
 0x3bc   :  { %5642 = vmatprep.subr.bf16.mxu1 %v7527_v57  ;;  %5806 = vmatprep.subr.bf16.mxu0 %v7530_v58  ;;  %v7597_v57 = vld [vmem:[#allocation14 + $0x7e0] ss:$28 sps:$4 sm:$0xff]   ;;  %v7600_v58 = vld [vmem:[#allocation14 + $0x7e8] ss:$28 sps:$4 sm:$0xff]  }
 0x3bf   :  { %5643 = vmatpush1.bf16.msra.mxu1 %v7525_v4  ;;  %5807 = vmatpush1.bf16.msra.mxu0 %v7528_v59  ;;  %v7605_v4 = vld [vmem:[#allocation14 + $0x81c] ss:$28 sps:$4 sm:$0xff]   ;;  %v7608_v59 = vld [vmem:[#allocation14 + $0x824] ss:$28 sps:$4 sm:$0xff]  }
 0x3c0   :  { %5644 = vmatprep.subr.bf16.mxu1 %v7533_v60  ;;  %5808 = vmatprep.subr.bf16.mxu0 %v7536_v62  ;;  %v7603_v60 = vld [vmem:[#allocation14 + $0x818] ss:$28 sps:$4 sm:$0xff]   ;;  %v7606_v62 = vld [vmem:[#allocation14 + $0x820] ss:$28 sps:$4 sm:$0xff]  }
 0x3c3   :  { %5645 = vmatpush1.bf16.msra.mxu1 %v7531_v63  ;;  %5809 = vmatpush1.bf16.msra.mxu0 %v7534_v0  ;;  %v7611_v63 = vld [vmem:[#allocation14 + $0x854] ss:$28 sps:$4 sm:$0xff]   ;;  %v7614_v0 = vld [vmem:[#allocation14 + $0x85c] ss:$28 sps:$4 sm:$0xff]  }
 0x3c4   :  { %5646 = vmatprep.subr.bf16.mxu1 %v7539_v1  ;;  %5810 = vmatprep.subr.bf16.mxu0 %v7542_v3  ;;  %v7609_v1 = vld [vmem:[#allocation14 + $0x850] ss:$28 sps:$4 sm:$0xff]   ;;  %v7612_v3 = vld [vmem:[#allocation14 + $0x858] ss:$28 sps:$4 sm:$0xff]  }
 0x3c7   :  { %5647 = vmatpush1.bf16.msra.mxu1 %v7537_v6  ;;  %5811 = vmatpush1.bf16.msra.mxu0 %v7540_v31  ;;  %v7617_v6 = vld [vmem:[#allocation14 + $0x88c] ss:$28 sps:$4 sm:$0xff]   ;;  %v7620_v31 = vld [vmem:[#allocation14 + $0x894] ss:$28 sps:$4 sm:$0xff]  }
 0x3c8   :  { %5648 = vmatprep.subr.bf16.mxu1 %v7545_v5  ;;  %5812 = vmatprep.subr.bf16.mxu0 %v7548_v7  ;;  %v7615_v5 = vld [vmem:[#allocation14 + $0x888] ss:$28 sps:$4 sm:$0xff]   ;;  %v7618_v7 = vld [vmem:[#allocation14 + $0x890] ss:$28 sps:$4 sm:$0xff]  }
 0x3cb   :  { %5649 = vmatpush1.bf16.msra.mxu1 %v7543_v8  ;;  %5813 = vmatpush1.bf16.msra.mxu0 %v7546_v9  ;;  %v7623_v8 = vld [vmem:[#allocation14 + $0x8c4] ss:$28 sps:$4 sm:$0xff]   ;;  %v7626_v9 = vld [vmem:[#allocation14 + $0x8cc] ss:$28 sps:$4 sm:$0xff]  }
 0x3cc   :  { %5650 = vmatprep.subr.bf16.mxu1 %v7551_v10  ;;  %5814 = vmatprep.subr.bf16.mxu0 %v7554_v11  ;;  %v7621_v10 = vld [vmem:[#allocation14 + $0x8c0] ss:$28 sps:$4 sm:$0xff]   ;;  %v7624_v11 = vld [vmem:[#allocation14 + $0x8c8] ss:$28 sps:$4 sm:$0xff]  }
 0x3cf   :  { %5651 = vmatpush1.bf16.msra.mxu1 %v7549_v12  ;;  %5815 = vmatpush1.bf16.msra.mxu0 %v7552_v29  ;;  %v7629_v12 = vld [vmem:[#allocation14 + $0x8fc] ss:$28 sps:$4 sm:$0xff]   ;;  %v7632_v29 = vld [vmem:[#allocation14 + $0x904] ss:$28 sps:$4 sm:$0xff]  }
 0x3d0   :  { %5652 = vmatprep.subr.bf16.mxu1 %v7557_v18  ;;  %5816 = vmatprep.subr.bf16.mxu0 %v7560_v21  ;;  %v7630_v18 = vld [vmem:[#allocation14 + $0x900] ss:$28 sps:$4 sm:$0xff]   ;;  %v7635_v21 = vld [vmem:[#allocation14 + $0x934] ss:$28 sps:$4 sm:$0xff]  }
 0x3d3   :  { %5653 = vmatpush1.bf16.msra.mxu1 %v7555_v51  ;;  %5817 = vmatpush1.bf16.msra.mxu0 %v7558_v23  ;;  %v7638_v51 = vld [vmem:[#allocation14 + $0x93c] ss:$28 sps:$4 sm:$0xff]   ;;  %v7633_v23 = vld [vmem:[#allocation14 + $0x930] ss:$28 sps:$4 sm:$0xff]  }
 0x3d4   :  { %5654 = vmatprep.subr.bf16.mxu1 %v7563_v26  ;;  %5818 = vmatprep.subr.bf16.mxu0 %v7566_v27  ;;  %v7641_v26 = vld [vmem:[#allocation14 + $0x96c] ss:$28 sps:$4 sm:$0xff]   ;;  %v7644_v27 = vld [vmem:[#allocation14 + $0x974] ss:$28 sps:$4 sm:$0xff]  }
 0x3d7   :  { %5655 = vmatpush1.bf16.msra.mxu1 %v7561_v14  ;;  %5819 = vmatpush1.bf16.msra.mxu0 %v7564_v15  ;;  %v7639_v14 = vld [vmem:[#allocation14 + $0x968] ss:$28 sps:$4 sm:$0xff]   ;;  %v7642_v15 = vld [vmem:[#allocation14 + $0x970] ss:$28 sps:$4 sm:$0xff]  }
 0x3d8   :  { %5656 = vmatprep.subr.bf16.mxu1 %v7569_v19  ;;  %5820 = vmatprep.subr.bf16.mxu0 %v7572_v20  ;;  %v7650_v19 = vld [vmem:[#allocation14 + $0x9ac] ss:$28 sps:$4 sm:$0xff]   ;;  %v7645_v20 = vld [vmem:[#allocation14 + $0x9a0] ss:$28 sps:$4 sm:$0xff]  }
 0x3db   :  { %5657 = vmatpush1.bf16.msra.mxu1 %v7567_v28  ;;  %5821 = vmatpush1.bf16.msra.mxu0 %v7570_v30  ;;  %v7648_v28 = vld [vmem:[#allocation14 + $0x9a8] ss:$28 sps:$4 sm:$0xff]   ;;  %v7653_v30 = vld [vmem:[#allocation14 + $0x9dc] ss:$28 sps:$4 sm:$0xff]  }
 0x3dc   :  { %5667 = vmatprep.subr.bf16.mxu1 %v7575_v2  ;;  %5831 = vmatprep.subr.bf16.mxu0 %v7578_v33  ;;  %v1078_v2 = vsub.s32 4, %v8444_v34  ;;  %v1082_v33 = vsub.s32 5, %v8444_v34 }
 0x3de   :  { %5659 = vmatmul.mubr.bf16.vlgmr.msra.gmra.mrb[8].mxu1 %v8545_v37  ;;  %5823 = vmatmul.mubr.bf16.vlgmr.msra.gmra.mrb[20].mxu0 %v8545_v37 }
 0x3df   :  { %5668 = vmatpush1.bf16.msra.mxu1 %v7573_v35  ;;  %5832 = vmatpush1.bf16.msra.mxu0 %v7576_v36  ;;  %v1090_v35 = vsub.s32 7, %v8444_v34  ;;  %v7651_v36 = vld [vmem:[#allocation14 + $0x9d8] ss:$28 sps:$4 sm:$0xff]  }
 0x3e0   :  { %5669 = vmatprep.subr.bf16.mxu1 %v7581_v38  ;;  %5833 = vmatprep.subr.bf16.mxu0 %v7584_v39  ;;  %v7654_v38 = vld [vmem:[#allocation14 + $0x9e0] ss:$28 sps:$4 sm:$0xff]   ;;  %v1079_v39 = vrot.slane %v8520_v61, %v1078_v2 }
 0x3e3   :  { %5670 = vmatpush1.bf16.msra.mxu1 %v7579_v41  ;;  %5834 = vmatpush1.bf16.msra.mxu0 %v7582_v43  ;;  %v7659_v41 = vld [vmem:[#allocation14 + $0xa14] ss:$28 sps:$4 sm:$0xff]   ;;  %v7662_v43 = vld [vmem:[#allocation14 + $0xa1c] ss:$28 sps:$4 sm:$0xff]  }
 0x3e4   :  { %5671 = vmatprep.subr.bf16.mxu1 %v7587_v44  ;;  %5835 = vmatprep.subr.bf16.mxu0 %v7590_v45  ;;  %v1083_v44 = vrot.slane %v8520_v61, %v1082_v33  ;;  %v1091_v45 = vrot.slane %v8520_v61, %v1090_v35  ;;  %v7693_v35 = vld [vmem:[#allocation14 + $0xb60] ss:$28 sps:$4 sm:$0xff]  }
 0x3e7   :  { %5672 = vmatpush1.bf16.msra.mxu1 %v7585_v46  ;;  %5836 = vmatpush1.bf16.msra.mxu0 %v7588_v47  ;;  %v7657_v47 = vld [vmem:[#allocation14 + $0xa10] ss:$28 sps:$4 sm:$0xff]  }
 0x3e8   :  { %5673 = vmatprep.subr.bf16.mxu1 %v7593_v48  ;;  %5837 = vmatprep.subr.bf16.mxu0 %v7596_v50  ;;  %v7660_v48 = vld [vmem:[#allocation14 + $0xa18] ss:$28 sps:$4 sm:$0xff]  }
 0x3eb   :  { %5674 = vmatpush1.bf16.msra.mxu1 %v7591_v53  ;;  %5838 = vmatpush1.bf16.msra.mxu0 %v7594_v54 }
 0x3ec   :  { %5675 = vmatprep.subr.bf16.mxu1 %v7599_v55  ;;  %5839 = vmatprep.subr.bf16.mxu0 %v7602_v56  ;;  %v7665_v55 = vld [vmem:[#allocation14 + $0xa4c] ss:$28 sps:$4 sm:$0xff]   ;;  %v7668_v56 = vld [vmem:[#allocation14 + $0xa54] ss:$28 sps:$4 sm:$0xff]  }
 0x3ef   :  { %5676 = vmatpush1.bf16.msra.mxu1 %v7597_v57  ;;  %5840 = vmatpush1.bf16.msra.mxu0 %v7600_v58 }
 0x3f0   :  { %5677 = vmatprep.subr.bf16.mxu1 %v7605_v4  ;;  %5841 = vmatprep.subr.bf16.mxu0 %v7608_v59 }
 0x3f3   :  { %5678 = vmatpush1.bf16.msra.mxu1 %v7603_v60  ;;  %5842 = vmatpush1.bf16.msra.mxu0 %v7606_v62 }
 0x3f4   :  { %5679 = vmatprep.subr.bf16.mxu1 %v7611_v63  ;;  %5843 = vmatprep.subr.bf16.mxu0 %v7614_v0  ;;  %v7663_v0 = vld [vmem:[#allocation14 + $0xa48] ss:$28 sps:$4 sm:$0xff]  }
 0x3f7   :  { %5680 = vmatpush1.bf16.msra.mxu1 %v7609_v1  ;;  %5844 = vmatpush1.bf16.msra.mxu0 %v7612_v3 }
 0x3f8   :  { %5681 = vmatprep.subr.bf16.mxu1 %v7617_v6  ;;  %5845 = vmatprep.subr.bf16.mxu0 %v7620_v31  ;;  %v7666_v6 = vld [vmem:[#allocation14 + $0xa50] ss:$28 sps:$4 sm:$0xff]  }
 0x3fb   :  { %5682 = vmatpush1.bf16.msra.mxu1 %v7615_v5  ;;  %5846 = vmatpush1.bf16.msra.mxu0 %v7618_v7  ;;  %v7671_v7 = vld [vmem:[#allocation14 + $0xa84] ss:$28 sps:$4 sm:$0xff]  }
 0x3fc   :  { %5683 = vmatprep.subr.bf16.mxu1 %v7623_v8  ;;  %5847 = vmatprep.subr.bf16.mxu0 %v7626_v9  ;;  %v7674_v8 = vld [vmem:[#allocation14 + $0xa8c] ss:$28 sps:$4 sm:$0xff]  }
 0x3ff   :  { %5684 = vmatpush1.bf16.msra.mxu1 %v7621_v10  ;;  %5848 = vmatpush1.bf16.msra.mxu0 %v7624_v11 }
 0x400   :  { %5685 = vmatprep.subr.bf16.mxu1 %v7629_v12  ;;  %5849 = vmatprep.subr.bf16.mxu0 %v7632_v29  ;;  %v7669_v12 = vld [vmem:[#allocation14 + $0xa80] ss:$28 sps:$4 sm:$0xff]   ;;  %v7672_v29 = vld [vmem:[#allocation14 + $0xa88] ss:$28 sps:$4 sm:$0xff]  }
 0x403   :  { %5686 = vmatpush1.bf16.msra.mxu1 %v7627_v16  ;;  %5850 = vmatpush1.bf16.msra.mxu0 %v7630_v18  ;;  %v7677_v18 = vld [vmem:[#allocation14 + $0xabc] ss:$28 sps:$4 sm:$0xff]  }
 0x404   :  { %5687 = vmatprep.subr.bf16.mxu1 %v7635_v21  ;;  %5851 = vmatprep.subr.bf16.mxu0 %v7638_v51  ;;  %v7680_v21 = vld [vmem:[#allocation14 + $0xac4] ss:$28 sps:$4 sm:$0xff]  }
 0x407   :  { %5688 = vmatpush1.bf16.msra.mxu1 %v7633_v23  ;;  %5852 = vmatpush1.bf16.msra.mxu0 %v7636_v24  ;;  %v7675_v23 = vld [vmem:[#allocation14 + $0xab8] ss:$28 sps:$4 sm:$0xff]   ;;  %v7678_v24 = vld [vmem:[#allocation14 + $0xac0] ss:$28 sps:$4 sm:$0xff]  }
 0x408   :  { %5689 = vmatprep.subr.bf16.mxu1 %v7641_v26  ;;  %5853 = vmatprep.subr.bf16.mxu0 %v7644_v27  ;;  %v7683_v26 = vld [vmem:[#allocation14 + $0xaf4] ss:$28 sps:$4 sm:$0xff]   ;;  %v7686_v27 = vld [vmem:[#allocation14 + $0xafc] ss:$28 sps:$4 sm:$0xff]  }
 0x40b   :  { %5690 = vmatpush1.bf16.msra.mxu1 %v7639_v14  ;;  %5854 = vmatpush1.bf16.msra.mxu0 %v7642_v15  ;;  %v7681_v14 = vld [vmem:[#allocation14 + $0xaf0] ss:$28 sps:$4 sm:$0xff]   ;;  %v7684_v15 = vld [vmem:[#allocation14 + $0xaf8] ss:$28 sps:$4 sm:$0xff]  }
 0x40c   :  { %5691 = vmatprep.subr.bf16.mxu1 %v7647_v17  ;;  %5855 = vmatprep.subr.bf16.mxu0 %v7650_v19  ;;  %v7689_v17 = vld [vmem:[#allocation14 + $0xb2c] ss:$28 sps:$4 sm:$0xff]   ;;  %v7692_v19 = vld [vmem:[#allocation14 + $0xb34] ss:$28 sps:$4 sm:$0xff]  }
 0x40f   :  { %5692 = vmatpush1.bf16.msra.mxu1 %v7645_v20  ;;  %5856 = vmatpush1.bf16.msra.mxu0 %v7648_v28  ;;  %v7687_v20 = vld [vmem:[#allocation14 + $0xb28] ss:$28 sps:$4 sm:$0xff]   ;;  %v7690_v28 = vld [vmem:[#allocation14 + $0xb30] ss:$28 sps:$4 sm:$0xff]  }
 0x410   :  { %5693 = vmatprep.subr.bf16.mxu1 %v7653_v30  ;;  %5857 = vmatprep.subr.bf16.mxu0 %v7656_v32  ;;  %v7695_v30 = vld [vmem:[#allocation14 + $0xb64] ss:$28 sps:$4 sm:$0xff]   ;;  %v7698_v32 = vld [vmem:[#allocation14 + $0xb6c] ss:$28 sps:$4 sm:$0xff]  }
 0x413   :  { %5694 = vmatpush1.bf16.msra.mxu1 %v7651_v36  ;;  %5858 = vmatpush1.bf16.msra.mxu0 %v7654_v38  ;;  %v2619_v46 = vpop.f32.mrb[4].mxu1  ;;  %v7696_v36 = vld [vmem:[#allocation14 + $0xb68] ss:$28 sps:$4 sm:$0xff]   ;;  %v7701_v38 = vld [vmem:[#allocation14 + $0xb9c] ss:$28 sps:$4 sm:$0xff]  }
 0x414   :  { %v7180_v50 = vadd.f32 %v2619_v46, %v1079_v39  ;;  %v8559_v53 = vpop.f32.mrb[16].mxu0  ;;  %v2621_v54 = vpop.f32.mrb[5].mxu1  ;;  %5695 = vmatprep.subr.bf16.mxu1 %v7659_v41  ;;  %5859 = vmatprep.subr.bf16.mxu0 %v7662_v43  ;;  %v7704_v39 = vld [vmem:[#allocation14 + $0xba4] ss:$28 sps:$4 sm:$0xff]   ;;  %v7699_v41 = vld [vmem:[#allocation14 + $0xb98] ss:$28 sps:$4 sm:$0xff]  }
 0x415   :  { %v7181_v57 = vadd.f32 %v2621_v54, %v1083_v44  ;;  %v2703_v58 = vpop.f32.mrb[17].mxu0  ;;  %v2623_v4 = vpop.f32.mrb[6].mxu1  ;;  %v7702_v43 = vld [vmem:[#allocation14 + $0xba0] ss:$28 sps:$4 sm:$0xff]   ;;  %v7707_v44 = vld [vmem:[#allocation14 + $0xbd4] ss:$28 sps:$4 sm:$0xff]  }
 0x416   :  { %v2712_v59 = vmul.f32 0.2, %v7180_v50  ;;  %v7183_v60 = vadd.f32 %v2703_v58, %v1091_v45  ;;  %v2705_v62 = vpop.f32.mrb[18].mxu0  ;;  %v2624_v63 = vpop.f32.mrb[7].mxu1  ;;  %v7710_v45 = vld [vmem:[#allocation14 + $0xbdc] ss:$28 sps:$4 sm:$0xff]  }
 0x417   :  { %v2713_v1 = vmul.f32 0.2, %v7181_v57  ;;  %v2706_v3 = vpop.f32.mrb[19].mxu0  ;;  %5696 = vmatpush1.bf16.msra.mxu1 %v7657_v47  ;;  %5860 = vmatpush1.bf16.msra.mxu0 %v7660_v48  ;;  %v7705_v46 = vld [vmem:[#allocation14 + $0xbd0] ss:$28 sps:$4 sm:$0xff]  }
 0x418   :  { %v2720_v31 = vmax.f32 %v7180_v50, %v2712_v59  ;;  %v2715_v5 = vmul.f32 0.2, %v7183_v60  ;;  %5697 = vmatprep.subr.bf16.mxu1 %v7665_v55  ;;  %5861 = vmatprep.subr.bf16.mxu0 %v7668_v56  ;;  %v7708_v47 = vld [vmem:[#allocation14 + $0xbd8] ss:$28 sps:$4 sm:$0xff]   ;;  %v7713_v48 = vld [vmem:[#allocation14 + $0xc0c] ss:$28 sps:$4 sm:$0xff]  }
 0x419   :  { %v2721_v9 = vmax.f32 %v7181_v57, %v2713_v1  ;;  %v7716_v50 = vld [vmem:[#allocation14 + $0xc14] ss:$28 sps:$4 sm:$0xff]   ;;  %v7711_v54 = vld [vmem:[#allocation14 + $0xc08] ss:$28 sps:$4 sm:$0xff]   ;;  %v7717_v58 = vld [vmem:[#allocation14 + $0xc40] ss:$28 sps:$4 sm:$0xff]  }
 0x41a   :  { %v2723_v10 = vmax.f32 %v7183_v60, %v2715_v5  ;;  %v8563_v16 = vpack.c.bf16 %v2720_v31, %v2720_v31  ;;  %v7714_v55 = vld [vmem:[#allocation14 + $0xc10] ss:$28 sps:$4 sm:$0xff]   ;;  %v7719_v56 = vld [vmem:[#allocation14 + $0xc44] ss:$28 sps:$4 sm:$0xff]   ;;  %v7725_v59 = vld [vmem:[#allocation14 + $0xc7c] ss:$28 sps:$4 sm:$0xff]  }
 0x41b   :  { %v8561_v11 = vpack.c.bf16 %v2721_v9, %v2721_v9  ;;  %5698 = vmatpush1.bf16.msra.mxu1 %v7663_v0  ;;  %5862 = vmatpush1.bf16.msra.mxu0 %v7666_v6  ;;  %v7722_v57 = vld [vmem:[#allocation14 + $0xc4c] ss:$28 sps:$4 sm:$0xff]   ;;  %v7728_v60 = vld [vmem:[#allocation14 + $0xc84] ss:$28 sps:$4 sm:$0xff]   ;;  %v7723_v62 = vld [vmem:[#allocation14 + $0xc78] ss:$28 sps:$4 sm:$0xff]  }
 0x41c   :  { %5708 = vmatprep.subr.bf16.mxu1 %v7671_v7  ;;  %5872 = vmatprep.subr.bf16.mxu0 %v7674_v8  ;;  %v8567_v51 = vpack.c.bf16 %v2723_v10, %v2723_v10  ;;  %v7720_v4 = vld [vmem:[#allocation14 + $0xc48] ss:$28 sps:$4 sm:$0xff]   ;;  %v7726_v63 = vld [vmem:[#allocation14 + $0xc80] ss:$28 sps:$4 sm:$0xff]   ;;  %v7731_v0 = vld [vmem:[#allocation14 + $0xcb4] ss:$28 sps:$4 sm:$0xff]  }
 0x41d   :  { %5699 = vmatprep.mubr.bf16.mxu1 %v8561_v11  ;;  %5863 = vmatprep.mubr.bf16.mxu0 %v8561_v11  ;;  %v7734_v1 = vld [vmem:[#allocation14 + $0xcbc] ss:$28 sps:$4 sm:$0xff]   ;;  %v7729_v3 = vld [vmem:[#allocation14 + $0xcb0] ss:$28 sps:$4 sm:$0xff]   ;;  %v7735_v7 = vld [vmem:[#allocation14 + $0xce8] ss:$28 sps:$4 sm:$0xff]  }
 0x41e   :  { %5700 = vmatmul.mubr.bf16.vlgmr.msra.gmra.mrb[8].mxu1 %v8563_v16  ;;  %5864 = vmatmul.mubr.bf16.vlgmr.msra.gmra.mrb[20].mxu0 %v8563_v16  ;;  %v7732_v6 = vld [vmem:[#allocation14 + $0xcb8] ss:$28 sps:$4 sm:$0xff]   ;;  %v7737_v31 = vld [vmem:[#allocation14 + $0xcec] ss:$28 sps:$4 sm:$0xff]   ;;  %v1086_v9 = vsub.s32 6, %v8444_v34 }
 0x41f   :  { %5709 = vmatpush1.bf16.msra.mxu1 %v7669_v12  ;;  %5873 = vmatpush1.bf16.msra.mxu0 %v7672_v29  ;;  %v7740_v5 = vld [vmem:[#allocation14 + $0xcf4] ss:$28 sps:$4 sm:$0xff]   ;;  %v7743_v10 = vld [vmem:[#allocation14 + $0xd24] ss:$28 sps:$4 sm:$0xff]   ;;  %v7746_v12 = vld [vmem:[#allocation14 + $0xd2c] ss:$28 sps:$4 sm:$0xff]  }
 0x420   :  { %5740 = vmatprep.mubr.bf16.mxu1 %v8567_v51  ;;  %5904 = vmatprep.mubr.bf16.mxu0 %v8567_v51  ;;  %v7738_v8 = vld [vmem:[#allocation14 + $0xcf0] ss:$28 sps:$4 sm:$0xff]   ;;  %v7741_v29 = vld [vmem:[#allocation14 + $0xd20] ss:$28 sps:$4 sm:$0xff]  }
 0x421   :  { %5710 = vmatprep.subr.bf16.mxu1 %v7677_v18  ;;  %5874 = vmatprep.subr.bf16.mxu0 %v7680_v21  ;;  %v7744_v18 = vld [vmem:[#allocation14 + $0xd28] ss:$28 sps:$4 sm:$0xff]   ;;  %v1087_v21 = vrot.slane %v8520_v61, %v1086_v9 }
 0x422   :  { %v7761_v61 = vld [vmem:[#allocation14 + $0xdcc] ss:$28 sps:$4 sm:$0xff]  }
 0x423   :  { %5711 = vmatpush1.bf16.msra.mxu1 %v7675_v23  ;;  %5875 = vmatpush1.bf16.msra.mxu0 %v7678_v24  ;;  %v7749_v23 = vld [vmem:[#allocation14 + $0xd5c] ss:$28 sps:$4 sm:$0xff]   ;;  %v7752_v24 = vld [vmem:[#allocation14 + $0xd64] ss:$28 sps:$4 sm:$0xff]  }
 0x424   :  { %5712 = vmatprep.subr.bf16.mxu1 %v7683_v26  ;;  %5876 = vmatprep.subr.bf16.mxu0 %v7686_v27  ;;  %v7747_v26 = vld [vmem:[#allocation14 + $0xd58] ss:$28 sps:$4 sm:$0xff]   ;;  %v7750_v27 = vld [vmem:[#allocation14 + $0xd60] ss:$28 sps:$4 sm:$0xff]  }
 0x427   :  { %5713 = vmatpush1.bf16.msra.mxu1 %v7681_v14  ;;  %5877 = vmatpush1.bf16.msra.mxu0 %v7684_v15  ;;  %v7182_v14 = vadd.f32 %v8559_v53, %v1087_v21  ;;  %v7755_v15 = vld [vmem:[#allocation14 + $0xd94] ss:$28 sps:$4 sm:$0xff]  }
 0x428   :  { %5714 = vmatprep.subr.bf16.mxu1 %v7689_v17  ;;  %5878 = vmatprep.subr.bf16.mxu0 %v7692_v19  ;;  %v7758_v17 = vld [vmem:[#allocation14 + $0xd9c] ss:$28 sps:$4 sm:$0xff]   ;;  %v7753_v19 = vld [vmem:[#allocation14 + $0xd90] ss:$28 sps:$4 sm:$0xff]  }
 0x429   :  { %v7767_v53 = vld [vmem:[#allocation14 + $0x14] ss:$28 sps:$4 sm:$0xff]  }
 0x42a   :  { %v7808_v21 = vld [vmem:[#allocation14 + $0x558] ss:$28 sps:$4 sm:$0xff]  }
 0x42b   :  { %5715 = vmatpush1.bf16.msra.mxu1 %v7687_v20  ;;  %5879 = vmatpush1.bf16.msra.mxu0 %v7690_v28  ;;  %v7756_v20 = vld [vmem:[#allocation14 + $0xd98] ss:$28 sps:$4 sm:$0xff]   ;;  %v2714_v28 = vmul.f32 0.2, %v7182_v14 }
 0x42c   :  { %5716 = vmatprep.subr.bf16.mxu1 %v7695_v30  ;;  %5880 = vmatprep.subr.bf16.mxu0 %v7698_v32  ;;  %v7764_v30 = vld [vmem:[#allocation14 + $0xdd4] ss:$28 sps:$4 sm:$0xff]   ;;  %v7759_v32 = vld [vmem:[#allocation14 + $0xdc8] ss:$28 sps:$4 sm:$0xff]  }
 0x42f   :  { %5717 = vmatpush1.bf16.msra.mxu1 %v7693_v35  ;;  %5881 = vmatpush1.bf16.msra.mxu0 %v7696_v36  ;;  %v7762_v35 = vld [vmem:[#allocation14 + $0xdd0] ss:$28 sps:$4 sm:$0xff]   ;;  %v2722_v36 = vmax.f32 %v7182_v14, %v2714_v28  ;;  %v7810_v14 = vld [vmem:[#allocation14 + $0x208] ss:$28 sps:$4 sm:$0xff]  }
 0x430   :  { %5718 = vmatprep.subr.bf16.mxu1 %v7701_v38  ;;  %5882 = vmatprep.subr.bf16.mxu0 %v7704_v39  ;;  %v7768_v38 = vld [vmem:[#allocation14 + $0x1d8] ss:$28 sps:$4 sm:$0xff]   ;;  %v7765_v39 = vld [vmem:[#allocation14 + $0x10] ss:$28 sps:$4 sm:$0xff]   ;;  %v7819_v28 = vld [vmem:[#allocation14 + $0x408] ss:$28 sps:$4 sm:$0xff]  }
 0x433   :  { %5719 = vmatpush1.bf16.msra.mxu1 %v7699_v41  ;;  %5883 = vmatpush1.bf16.msra.mxu0 %v7702_v43  ;;  %v8578_v41 = vpack.c.bf16 %v2722_v36, %v2722_v36  ;;  %v7769_v43 = vld [vmem:[#allocation14 + $0x18] ss:$28 sps:$4 sm:$0xff]  }
 0x434   :  { %5720 = vmatprep.subr.bf16.mxu1 %v7707_v44  ;;  %5884 = vmatprep.subr.bf16.mxu0 %v7710_v45  ;;  %v7772_v44 = vld [vmem:[#allocation14 + $0x4c] ss:$28 sps:$4 sm:$0xff]   ;;  %v7827_v36 = vld [vmem:[#allocation14 + $0x2b4] ss:$28 sps:$4 sm:$0xff]  }
 0x435   :  { %v7773_v45 = vld [vmem:[#allocation14 + $0x210] ss:$28 sps:$4 sm:$0xff]  }
 0x437   :  { %5721 = vmatpush1.bf16.msra.mxu1 %v7705_v46  ;;  %5885 = vmatpush1.bf16.msra.mxu0 %v7708_v47  ;;  %v7770_v46 = vld [vmem:[#allocation14 + $0x48] ss:$28 sps:$4 sm:$0xff]   ;;  %v7774_v47 = vld [vmem:[#allocation14 + $0x50] ss:$28 sps:$4 sm:$0xff]  }
 0x438   :  { %5722 = vmatprep.subr.bf16.mxu1 %v7713_v48  ;;  %5886 = vmatprep.subr.bf16.mxu0 %v7716_v50  ;;  %v7777_v48 = vld [vmem:[#allocation14 + $0x84] ss:$28 sps:$4 sm:$0xff]  }
 0x439   :  { %v7778_v50 = vld [vmem:[#allocation14 + $0x248] ss:$28 sps:$4 sm:$0xff]  }
 0x43b   :  { %5723 = vmatpush1.bf16.msra.mxu1 %v7711_v54  ;;  %5887 = vmatpush1.bf16.msra.mxu0 %v7714_v55  ;;  %v7775_v54 = vld [vmem:[#allocation14 + $0x80] ss:$28 sps:$4 sm:$0xff]   ;;  %v7779_v55 = vld [vmem:[#allocation14 + $0x88] ss:$28 sps:$4 sm:$0xff]  }
 0x43c   :  { %5724 = vmatprep.subr.bf16.mxu1 %v7719_v56  ;;  %5888 = vmatprep.subr.bf16.mxu0 %v7722_v57  ;;  %v7782_v56 = vld [vmem:[#allocation14 + $0xbc] ss:$28 sps:$4 sm:$0xff]  }
 0x43d   :  { %v7783_v57 = vld [vmem:[#allocation14 + $0x280] ss:$28 sps:$4 sm:$0xff]  }
 0x43f   :  { %5725 = vmatpush1.bf16.msra.mxu1 %v7717_v58  ;;  %5889 = vmatpush1.bf16.msra.mxu0 %v7720_v4  ;;  %v7780_v58 = vld [vmem:[#allocation14 + $0xb8] ss:$28 sps:$4 sm:$0xff]   ;;  %v7784_v4 = vld [vmem:[#allocation14 + $0xc0] ss:$28 sps:$4 sm:$0xff]  }
 0x440   :  { %5726 = vmatprep.subr.bf16.mxu1 %v7725_v59  ;;  %5890 = vmatprep.subr.bf16.mxu0 %v7728_v60  ;;  %v7787_v59 = vld [vmem:[#allocation14 + $0xf4] ss:$28 sps:$4 sm:$0xff]  }
 0x441   :  { %v7785_v60 = vld [vmem:[#allocation14 + $0xf0] ss:$28 sps:$4 sm:$0xff]  }
 0x443   :  { %5727 = vmatpush1.bf16.msra.mxu1 %v7723_v62  ;;  %5891 = vmatpush1.bf16.msra.mxu0 %v7726_v63  ;;  %v7789_v62 = vld [vmem:[#allocation14 + $0xf8] ss:$28 sps:$4 sm:$0xff]   ;;  %v7792_v63 = vld [vmem:[#allocation14 + $0x12c] ss:$28 sps:$4 sm:$0xff]  }
 0x444   :  { %5728 = vmatprep.subr.bf16.mxu1 %v7731_v0  ;;  %5892 = vmatprep.subr.bf16.mxu0 %v7734_v1  ;;  %v7793_v0 = vld [vmem:[#allocation14 + $0x2f0] ss:$28 sps:$4 sm:$0xff]   ;;  %v7790_v1 = vld [vmem:[#allocation14 + $0x128] ss:$28 sps:$4 sm:$0xff]  }
 0x447   :  { %5729 = vmatpush1.bf16.msra.mxu1 %v7729_v3  ;;  %5893 = vmatpush1.bf16.msra.mxu0 %v7732_v6  ;;  %v7794_v3 = vld [vmem:[#allocation14 + $0x130] ss:$28 sps:$4 sm:$0xff]   ;;  %v7797_v6 = vld [vmem:[#allocation14 + $0x164] ss:$28 sps:$4 sm:$0xff]  }
 0x448   :  { %5730 = vmatprep.subr.bf16.mxu1 %v7737_v31  ;;  %5894 = vmatprep.subr.bf16.mxu0 %v7740_v5  ;;  %v7798_v31 = vld [vmem:[#allocation14 + $0x328] ss:$28 sps:$4 sm:$0xff]   ;;  %v7795_v5 = vld [vmem:[#allocation14 + $0x160] ss:$28 sps:$4 sm:$0xff]  }
 0x44b   :  { %5731 = vmatpush1.bf16.msra.mxu1 %v7735_v7  ;;  %5895 = vmatpush1.bf16.msra.mxu0 %v7738_v8  ;;  %v7799_v7 = vld [vmem:[#allocation14 + $0x168] ss:$28 sps:$4 sm:$0xff]   ;;  %v7802_v8 = vld [vmem:[#allocation14 + $0x19c] ss:$28 sps:$4 sm:$0xff]  }
 0x44c   :  { %5732 = vmatprep.subr.bf16.mxu1 %v7743_v10  ;;  %5896 = vmatprep.subr.bf16.mxu0 %v7746_v12  ;;  %v7803_v10 = vld [vmem:[#allocation14 + $0x360] ss:$28 sps:$4 sm:$0xff]   ;;  %v7800_v12 = vld [vmem:[#allocation14 + $0x198] ss:$28 sps:$4 sm:$0xff]  }
 0x44f   :  { %5733 = vmatpush1.bf16.msra.mxu1 %v7741_v29  ;;  %5897 = vmatpush1.bf16.msra.mxu0 %v7744_v18  ;;  %v7804_v29 = vld [vmem:[#allocation14 + $0x1a0] ss:$28 sps:$4 sm:$0xff]   ;;  %v7807_v18 = vld [vmem:[#allocation14 + $0x1d4] ss:$28 sps:$4 sm:$0xff]  }
 0x450   :  { %5734 = vmatprep.subr.bf16.mxu1 %v7749_v23  ;;  %5898 = vmatprep.subr.bf16.mxu0 %v7752_v24  ;;  %v7805_v23 = vld [vmem:[#allocation14 + $0x1d0] ss:$28 sps:$4 sm:$0xff]   ;;  %v7809_v24 = vld [vmem:[#allocation14 + $0x398] ss:$28 sps:$4 sm:$0xff]  }
 0x453   :  { %5735 = vmatpush1.bf16.msra.mxu1 %v7747_v26  ;;  %5899 = vmatpush1.bf16.msra.mxu0 %v7750_v27  ;;  %v7812_v26 = vld [vmem:[#allocation14 + $0x20c] ss:$28 sps:$4 sm:$0xff]  }
 0x454   :  { %5736 = vmatprep.subr.bf16.mxu1 %v7755_v15  ;;  %5900 = vmatprep.subr.bf16.mxu0 %v7758_v17  ;;  %v7813_v27 = vld [vmem:[#allocation14 + $0x590] ss:$28 sps:$4 sm:$0xff]   ;;  %v7817_v17 = vld [vmem:[#allocation14 + $0x244] ss:$28 sps:$4 sm:$0xff]  }
 0x455   :  { %v7814_v15 = vld [vmem:[#allocation14 + $0x3d0] ss:$28 sps:$4 sm:$0xff]  }
 0x457   :  { %5737 = vmatpush1.bf16.msra.mxu1 %v7753_v19  ;;  %5901 = vmatpush1.bf16.msra.mxu0 %v7756_v20  ;;  %v7818_v19 = vld [vmem:[#allocation14 + $0x5c8] ss:$28 sps:$4 sm:$0xff]   ;;  %v7815_v20 = vld [vmem:[#allocation14 + $0x240] ss:$28 sps:$4 sm:$0xff]  }
 0x458   :  { %5738 = vmatprep.subr.bf16.mxu1 %v7761_v61  ;;  %5902 = vmatprep.subr.bf16.mxu0 %v7764_v30  ;;  %v7822_v61 = vld [vmem:[#allocation14 + $0x27c] ss:$28 sps:$4 sm:$0xff]  }
 0x459   :  { %v7823_v30 = vld [vmem:[#allocation14 + $0x600] ss:$28 sps:$4 sm:$0xff]  }
 0x45b   :  { %5739 = vmatpush1.bf16.msra.mxu1 %v7759_v32  ;;  %5903 = vmatpush1.bf16.msra.mxu0 %v7762_v35  ;;  %v7820_v32 = vld [vmem:[#allocation14 + $0x278] ss:$28 sps:$4 sm:$0xff]   ;;  %v7824_v35 = vld [vmem:[#allocation14 + $0x440] ss:$28 sps:$4 sm:$0xff]  }
 0x45c   :  { %5913 = vmatprep.subr.bf16.mxu1 %v7767_v53  ;;  %7088 = vmatprep.subr.bf16.mxu0 %v7768_v38  ;;  %v7828_v53 = vld [vmem:[#allocation14 + $0x638] ss:$28 sps:$4 sm:$0xff]   ;;  %v7825_v38 = vld [vmem:[#allocation14 + $0x2b0] ss:$28 sps:$4 sm:$0xff]  }
 0x45e   :  { %5741 = vmatmul.mubr.bf16.vlgmr.msra.gmra.mrb[8].mxu1 %v8578_v41  ;;  %5905 = vmatmul.mubr.bf16.vlgmr.msra.gmra.mrb[20].mxu0 %v8578_v41 }
 0x45f   :  { %5914 = vmatpush1.bf16.msra.mxu1 %v7765_v39  ;;  %5945 = vmatprep.mubr.bf16.mxu1 %v8530_v22  ;;  %v7829_v39 = vld [vmem:[#allocation14 + $0x478] ss:$28 sps:$4 sm:$0xff]  }
 0x460   :  { %7089 = vmatpush3.bf16.msra.mxu0 %v7769_v43  ;;  %6109 = vmatprep.mubr.bf16.mxu0 %v8530_v22  ;;  %v7788_v22 = vld [vmem:[#allocation14 + $0x2b8] ss:$28 sps:$4 sm:$0xff]   ;;  %v7832_v43 = vld [vmem:[#allocation14 + $0x2ec] ss:$28 sps:$4 sm:$0xff]  }
 0x461   :  { %5915 = vmatprep.subr.bf16.mxu1 %v7772_v44  ;;  %7090 = vmatprep.subr.bf16.mxu0 %v7773_v45  ;;  %v7833_v44 = vld [vmem:[#allocation14 + $0x670] ss:$28 sps:$4 sm:$0xff]   ;;  %v7830_v45 = vld [vmem:[#allocation14 + $0x2e8] ss:$28 sps:$4 sm:$0xff]  }
 0x463   :  { %5916 = vmatpush1.bf16.msra.mxu1 %v7770_v46  ;;  %v7834_v46 = vld [vmem:[#allocation14 + $0x4b0] ss:$28 sps:$4 sm:$0xff]  }
 0x464   :  { %7091 = vmatpush3.bf16.msra.mxu0 %v7774_v47  ;;  %5917 = vmatprep.subr.bf16.mxu1 %v7777_v48  ;;  %v7837_v47 = vld [vmem:[#allocation14 + $0x324] ss:$28 sps:$4 sm:$0xff]  }
 0x465   :  { %7092 = vmatprep.subr.bf16.mxu0 %v7778_v50  ;;  %v7838_v48 = vld [vmem:[#allocation14 + $0x6a8] ss:$28 sps:$4 sm:$0xff]   ;;  %v7835_v50 = vld [vmem:[#allocation14 + $0x320] ss:$28 sps:$4 sm:$0xff]  }
 0x467   :  { %5918 = vmatpush1.bf16.msra.mxu1 %v7775_v54  ;;  %v7839_v54 = vld [vmem:[#allocation14 + $0x4e8] ss:$28 sps:$4 sm:$0xff]  }
 0x468   :  { %7093 = vmatpush3.bf16.msra.mxu0 %v7779_v55  ;;  %5919 = vmatprep.subr.bf16.mxu1 %v7782_v56  ;;  %v7842_v55 = vld [vmem:[#allocation14 + $0x35c] ss:$28 sps:$4 sm:$0xff]  }
 0x469   :  { %7094 = vmatprep.subr.bf16.mxu0 %v7783_v57  ;;  %v7843_v56 = vld [vmem:[#allocation14 + $0x6e0] ss:$28 sps:$4 sm:$0xff]   ;;  %v7840_v57 = vld [vmem:[#allocation14 + $0x358] ss:$28 sps:$4 sm:$0xff]  }
 0x46b   :  { %5920 = vmatpush1.bf16.msra.mxu1 %v7780_v58  ;;  %v7844_v58 = vld [vmem:[#allocation14 + $0x520] ss:$28 sps:$4 sm:$0xff]  }
 0x46c   :  { %7095 = vmatpush3.bf16.msra.mxu0 %v7784_v4  ;;  %5921 = vmatprep.subr.bf16.mxu1 %v7787_v59  ;;  %v7847_v4 = vld [vmem:[#allocation14 + $0x394] ss:$28 sps:$4 sm:$0xff]  }
 0x46d   :  { %7096 = vmatprep.subr.bf16.mxu0 %v7788_v22  ;;  %v7848_v59 = vld [vmem:[#allocation14 + $0x8d8] ss:$28 sps:$4 sm:$0xff]   ;;  %v7845_v22 = vld [vmem:[#allocation14 + $0x390] ss:$28 sps:$4 sm:$0xff]  }
 0x46f   :  { %5922 = vmatpush1.bf16.msra.mxu1 %v7785_v60  ;;  %v7849_v60 = vld [vmem:[#allocation14 + $0x718] ss:$28 sps:$4 sm:$0xff]  }
 0x470   :  { %7097 = vmatpush3.bf16.msra.mxu0 %v7789_v62  ;;  %5923 = vmatprep.subr.bf16.mxu1 %v7792_v63  ;;  %v7852_v62 = vld [vmem:[#allocation14 + $0x3cc] ss:$28 sps:$4 sm:$0xff]  }
 0x471   :  { %7098 = vmatprep.subr.bf16.mxu0 %v7793_v0  ;;  %v7853_v63 = vld [vmem:[#allocation14 + $0x910] ss:$28 sps:$4 sm:$0xff]   ;;  %v7850_v0 = vld [vmem:[#allocation14 + $0x3c8] ss:$28 sps:$4 sm:$0xff]  }
 0x473   :  { %5924 = vmatpush1.bf16.msra.mxu1 %v7790_v1  ;;  %v7854_v1 = vld [vmem:[#allocation14 + $0x750] ss:$28 sps:$4 sm:$0xff]  }
 0x474   :  { %7099 = vmatpush3.bf16.msra.mxu0 %v7794_v3  ;;  %5925 = vmatprep.subr.bf16.mxu1 %v7797_v6  ;;  %v7857_v3 = vld [vmem:[#allocation14 + $0x404] ss:$28 sps:$4 sm:$0xff]  }
 0x475   :  { %7100 = vmatprep.subr.bf16.mxu0 %v7798_v31  ;;  %v7858_v6 = vld [vmem:[#allocation14 + $0x948] ss:$28 sps:$4 sm:$0xff]   ;;  %v7855_v31 = vld [vmem:[#allocation14 + $0x400] ss:$28 sps:$4 sm:$0xff]  }
 0x477   :  { %5926 = vmatpush1.bf16.msra.mxu1 %v7795_v5  ;;  %v7862_v5 = vld [vmem:[#allocation14 + $0x43c] ss:$28 sps:$4 sm:$0xff]  }
 0x478   :  { %7101 = vmatpush3.bf16.msra.mxu0 %v7799_v7  ;;  %5927 = vmatprep.subr.bf16.mxu1 %v7802_v8  ;;  %v7863_v7 = vld [vmem:[#allocation14 + $0x980] ss:$28 sps:$4 sm:$0xff]   ;;  %v7860_v8 = vld [vmem:[#allocation14 + $0x438] ss:$28 sps:$4 sm:$0xff]  }
 0x479   :  { %7102 = vmatprep.subr.bf16.mxu0 %v7803_v10  ;;  %v7867_v10 = vld [vmem:[#allocation14 + $0x474] ss:$28 sps:$4 sm:$0xff]  }
 0x47b   :  { %5928 = vmatpush1.bf16.msra.mxu1 %v7800_v12  ;;  %v7868_v12 = vld [vmem:[#allocation14 + $0x9b8] ss:$28 sps:$4 sm:$0xff]  }
 0x47c   :  { %7103 = vmatpush3.bf16.msra.mxu0 %v7804_v29  ;;  %5929 = vmatprep.subr.bf16.mxu1 %v7807_v18  ;;  %v7865_v29 = vld [vmem:[#allocation14 + $0x470] ss:$28 sps:$4 sm:$0xff]   ;;  %v7869_v18 = vld [vmem:[#allocation14 + $0x7f8] ss:$28 sps:$4 sm:$0xff]  }
 0x47d   :  { %7110 = vmatprep.subr.bf16.mxu0 %v7808_v21  ;;  %v7872_v21 = vld [vmem:[#allocation14 + $0x4ac] ss:$28 sps:$4 sm:$0xff]  }
 0x47f   :  { %6110 = vmatmul.mubr.bf16.vlgmr.msra.gmra.mrb[24].mxu0 %v8532_v25  ;;  %5930 = vmatpush1.bf16.msra.mxu1 %v7805_v23  ;;  %v7873_v23 = vld [vmem:[#allocation14 + $0x9f0] ss:$28 sps:$4 sm:$0xff]  }
 0x480   :  { %7111 = vmatpush3.bf16.msra.mxu0 %v7809_v24  ;;  %6149 = vmatprep.mubr.bf16.mxu0 %v8536_v13  ;;  %v7870_v24 = vld [vmem:[#allocation14 + $0x4a8] ss:$28 sps:$4 sm:$0xff]  }
 0x481   :  { %5931 = vmatprep.subr.bf16.mxu1 %v7812_v26  ;;  %7112 = vmatprep.subr.bf16.mxu0 %v7813_v27  ;;  %v7874_v26 = vld [vmem:[#allocation14 + $0x830] ss:$28 sps:$4 sm:$0xff]   ;;  %v7877_v27 = vld [vmem:[#allocation14 + $0x4e4] ss:$28 sps:$4 sm:$0xff]  }
 0x483   :  { %5932 = vmatpush1.bf16.msra.mxu1 %v7810_v14  ;;  %v7878_v14 = vld [vmem:[#allocation14 + $0xa28] ss:$28 sps:$4 sm:$0xff]  }
 0x484   :  { %7113 = vmatpush3.bf16.msra.mxu0 %v7814_v15  ;;  %5933 = vmatprep.subr.bf16.mxu1 %v7817_v17  ;;  %v7875_v15 = vld [vmem:[#allocation14 + $0x4e0] ss:$28 sps:$4 sm:$0xff]   ;;  %v7879_v17 = vld [vmem:[#allocation14 + $0x868] ss:$28 sps:$4 sm:$0xff]  }
 0x485   :  { %7114 = vmatprep.subr.bf16.mxu0 %v7818_v19  ;;  %v7882_v19 = vld [vmem:[#allocation14 + $0x51c] ss:$28 sps:$4 sm:$0xff]  }
 0x487   :  { %5934 = vmatpush1.bf16.msra.mxu1 %v7815_v20  ;;  %v7883_v20 = vld [vmem:[#allocation14 + $0xa60] ss:$28 sps:$4 sm:$0xff]  }
 0x488   :  { %7115 = vmatpush3.bf16.msra.mxu0 %v7819_v28  ;;  %5935 = vmatprep.subr.bf16.mxu1 %v7822_v61  ;;  %v7880_v28 = vld [vmem:[#allocation14 + $0x518] ss:$28 sps:$4 sm:$0xff]   ;;  %v7884_v61 = vld [vmem:[#allocation14 + $0x8a0] ss:$28 sps:$4 sm:$0xff]  }
 0x489   :  { %7116 = vmatprep.subr.bf16.mxu0 %v7823_v30  ;;  %v7887_v30 = vld [vmem:[#allocation14 + $0x554] ss:$28 sps:$4 sm:$0xff]  }
 0x48b   :  { %5936 = vmatpush1.bf16.msra.mxu1 %v7820_v32  ;;  %v7888_v32 = vld [vmem:[#allocation14 + $0xc58] ss:$28 sps:$4 sm:$0xff]  }
 0x48c   :  { %7117 = vmatpush3.bf16.msra.mxu0 %v7824_v35  ;;  %5937 = vmatprep.subr.bf16.mxu1 %v7827_v36  ;;  %v7885_v35 = vld [vmem:[#allocation14 + $0x550] ss:$28 sps:$4 sm:$0xff]   ;;  %v7889_v36 = vld [vmem:[#allocation14 + $0xa98] ss:$28 sps:$4 sm:$0xff]  }
 0x48d   :  { %7118 = vmatprep.subr.bf16.mxu0 %v7828_v53  ;;  %v7892_v53 = vld [vmem:[#allocation14 + $0x58c] ss:$28 sps:$4 sm:$0xff]  }
 0x48f   :  { %5938 = vmatpush1.bf16.msra.mxu1 %v7825_v38  ;;  %v7893_v38 = vld [vmem:[#allocation14 + $0xc90] ss:$28 sps:$4 sm:$0xff]  }
 0x490   :  { %7119 = vmatpush3.bf16.msra.mxu0 %v7829_v39  ;;  %5939 = vmatprep.subr.bf16.mxu1 %v7832_v43  ;;  %v7890_v39 = vld [vmem:[#allocation14 + $0x588] ss:$28 sps:$4 sm:$0xff]   ;;  %v7894_v43 = vld [vmem:[#allocation14 + $0xad0] ss:$28 sps:$4 sm:$0xff]  }
 0x491   :  { %7120 = vmatprep.subr.bf16.mxu0 %v7833_v44  ;;  %v7897_v44 = vld [vmem:[#allocation14 + $0x5c4] ss:$28 sps:$4 sm:$0xff]  }
 0x493   :  { %5940 = vmatpush1.bf16.msra.mxu1 %v7830_v45  ;;  %v7898_v45 = vld [vmem:[#allocation14 + $0xcc8] ss:$28 sps:$4 sm:$0xff]  }
 0x494   :  { %7121 = vmatpush3.bf16.msra.mxu0 %v7834_v46  ;;  %5941 = vmatprep.subr.bf16.mxu1 %v7837_v47  ;;  %v7895_v46 = vld [vmem:[#allocation14 + $0x5c0] ss:$28 sps:$4 sm:$0xff]   ;;  %v7899_v47 = vld [vmem:[#allocation14 + $0xb08] ss:$28 sps:$4 sm:$0xff]  }
 0x495   :  { %7122 = vmatprep.subr.bf16.mxu0 %v7838_v48  ;;  %v7902_v48 = vld [vmem:[#allocation14 + $0x5fc] ss:$28 sps:$4 sm:$0xff]  }
 0x497   :  { %5942 = vmatpush1.bf16.msra.mxu1 %v7835_v50  ;;  %v7903_v50 = vld [vmem:[#allocation14 + $0xd00] ss:$28 sps:$4 sm:$0xff]  }
 0x498   :  { %7123 = vmatpush3.bf16.msra.mxu0 %v7839_v54  ;;  %5943 = vmatprep.subr.bf16.mxu1 %v7842_v55  ;;  %v7900_v54 = vld [vmem:[#allocation14 + $0x5f8] ss:$28 sps:$4 sm:$0xff]   ;;  %v7904_v55 = vld [vmem:[#allocation14 + $0xb40] ss:$28 sps:$4 sm:$0xff]  }
 0x499   :  { %7124 = vmatprep.subr.bf16.mxu0 %v7843_v56  ;;  %v7907_v56 = vld [vmem:[#allocation14 + $0x634] ss:$28 sps:$4 sm:$0xff]  }
 0x49b   :  { %5944 = vmatpush1.bf16.msra.mxu1 %v7840_v57  ;;  %v7908_v57 = vld [vmem:[#allocation14 + $0xd38] ss:$28 sps:$4 sm:$0xff]  }
 0x49c   :  { %7125 = vmatpush3.bf16.msra.mxu0 %v7844_v58  ;;  %5954 = vmatprep.subr.bf16.mxu1 %v7847_v4  ;;  %v7905_v58 = vld [vmem:[#allocation14 + $0x630] ss:$28 sps:$4 sm:$0xff]   ;;  %v7909_v4 = vld [vmem:[#allocation14 + $0xb78] ss:$28 sps:$4 sm:$0xff]  }
 0x49d   :  { %7132 = vmatprep.subr.bf16.mxu0 %v7848_v59  ;;  %v7912_v59 = vld [vmem:[#allocation14 + $0x66c] ss:$28 sps:$4 sm:$0xff]  }
 0x49e   :  { %5946 = vmatmul.mubr.bf16.vlgmr.msra.gmra.mrb[12].mxu1 %v8532_v25  ;;  %v7859_v25 = vld [vmem:[#allocation14 + $0x788] ss:$28 sps:$4 sm:$0xff]  }
 0x49f   :  { %6150 = vmatmul.mubr.bf16.vlgmr.msra.gmra.mrb[28].mxu0 %v8545_v37  ;;  %5955 = vmatpush1.bf16.msra.mxu1 %v7845_v22  ;;  %v7913_v22 = vld [vmem:[#allocation14 + $0xd70] ss:$28 sps:$4 sm:$0xff]  }
 0x4a0   :  { %5986 = vmatprep.mubr.bf16.mxu1 %v8536_v13  ;;  %7133 = vmatpush3.bf16.msra.mxu0 %v7849_v60  ;;  %v7864_v13 = vld [vmem:[#allocation14 + $0x7c0] ss:$28 sps:$4 sm:$0xff]   ;;  %v7910_v60 = vld [vmem:[#allocation14 + $0x668] ss:$28 sps:$4 sm:$0xff]  }
 0x4a1   :  { %6189 = vmatprep.mubr.bf16.mxu0 %v8561_v11  ;;  %5956 = vmatprep.subr.bf16.mxu1 %v7852_v62  ;;  %v7914_v62 = vld [vmem:[#allocation14 + $0xbb0] ss:$28 sps:$4 sm:$0xff]  }
 0x4a2   :  { %7134 = vmatprep.subr.bf16.mxu0 %v7853_v63  ;;  %v7917_v63 = vld [vmem:[#allocation14 + $0x6a4] ss:$28 sps:$4 sm:$0xff]  }
 0x4a3   :  { %5957 = vmatpush1.bf16.msra.mxu1 %v7850_v0  ;;  %v7918_v0 = vld [vmem:[#allocation14 + $0xda8] ss:$28 sps:$4 sm:$0xff]  }
 0x4a4   :  { %7135 = vmatpush3.bf16.msra.mxu0 %v7854_v1  ;;  %5958 = vmatprep.subr.bf16.mxu1 %v7857_v3  ;;  %v7915_v1 = vld [vmem:[#allocation14 + $0x6a0] ss:$28 sps:$4 sm:$0xff]   ;;  %v7919_v3 = vld [vmem:[#allocation14 + $0xbe8] ss:$28 sps:$4 sm:$0xff]  }
 0x4a5   :  { %7136 = vmatprep.subr.bf16.mxu0 %v7858_v6  ;;  %v7922_v6 = vld [vmem:[#allocation14 + $0x6dc] ss:$28 sps:$4 sm:$0xff]  }
 0x4a7   :  { %5959 = vmatpush1.bf16.msra.mxu1 %v7855_v31  ;;  %v7923_v31 = vld [vmem:[#allocation14 + $0xde0] ss:$28 sps:$4 sm:$0xff]  }
 0x4a8   :  { %7137 = vmatpush3.bf16.msra.mxu0 %v7859_v25  ;;  %5960 = vmatprep.subr.bf16.mxu1 %v7862_v5  ;;  %v7920_v25 = vld [vmem:[#allocation14 + $0x6d8] ss:$28 sps:$4 sm:$0xff]   ;;  %v7924_v5 = vld [vmem:[#allocation14 + $0xc20] ss:$28 sps:$4 sm:$0xff]  }
 0x4a9   :  { %7138 = vmatprep.subr.bf16.mxu0 %v7863_v7  ;;  %v7927_v7 = vld [vmem:[#allocation14 + $0x714] ss:$28 sps:$4 sm:$0xff]  }
 0x4ab   :  { %5961 = vmatpush1.bf16.msra.mxu1 %v7860_v8  ;;  %v7925_v8 = vld [vmem:[#allocation14 + $0x710] ss:$28 sps:$4 sm:$0xff]  }
 0x4ac   :  { %7139 = vmatpush3.bf16.msra.mxu0 %v7864_v13  ;;  %5962 = vmatprep.subr.bf16.mxu1 %v7867_v10  ;;  %v7930_v13 = vld [vmem:[#allocation14 + $0x74c] ss:$28 sps:$4 sm:$0xff]  }
 0x4ad   :  { %7140 = vmatprep.subr.bf16.mxu0 %v7868_v12  ;;  %v7928_v10 = vld [vmem:[#allocation14 + $0x748] ss:$28 sps:$4 sm:$0xff]  }
 0x4ae   :  { %v7933_v12 = vld [vmem:[#allocation14 + $0x784] ss:$28 sps:$4 sm:$0xff]  }
 0x4af   :  { %5963 = vmatpush1.bf16.msra.mxu1 %v7865_v29  ;;  %v7931_v29 = vld [vmem:[#allocation14 + $0x780] ss:$28 sps:$4 sm:$0xff]  }
 0x4b0   :  { %7141 = vmatpush3.bf16.msra.mxu0 %v7869_v18  ;;  %5964 = vmatprep.subr.bf16.mxu1 %v7872_v21  ;;  %v7936_v18 = vld [vmem:[#allocation14 + $0x7bc] ss:$28 sps:$4 sm:$0xff]  }
 0x4b1   :  { %7142 = vmatprep.subr.bf16.mxu0 %v7873_v23  ;;  %v7934_v21 = vld [vmem:[#allocation14 + $0x7b8] ss:$28 sps:$4 sm:$0xff]  }
 0x4b2   :  { %v7939_v23 = vld [vmem:[#allocation14 + $0x7f4] ss:$28 sps:$4 sm:$0xff]  }
 0x4b3   :  { %5965 = vmatpush1.bf16.msra.mxu1 %v7870_v24  ;;  %v7937_v24 = vld [vmem:[#allocation14 + $0x7f0] ss:$28 sps:$4 sm:$0xff]  }
 0x4b4   :  { %7143 = vmatpush3.bf16.msra.mxu0 %v7874_v26  ;;  %5966 = vmatprep.subr.bf16.mxu1 %v7877_v27  ;;  %v7940_v26 = vld [vmem:[#allocation14 + $0x828] ss:$28 sps:$4 sm:$0xff]  }
 0x4b5   :  { %7144 = vmatprep.subr.bf16.mxu0 %v7878_v14  ;;  %v7945_v27 = vld [vmem:[#allocation14 + $0x864] ss:$28 sps:$4 sm:$0xff]   ;;  %v7948_v14 = vld [vmem:[#allocation14 + $0x89c] ss:$28 sps:$4 sm:$0xff]  }
 0x4b7   :  { %5967 = vmatpush1.bf16.msra.mxu1 %v7875_v15  ;;  %v7946_v15 = vld [vmem:[#allocation14 + $0x898] ss:$28 sps:$4 sm:$0xff]  }
 0x4b8   :  { %7145 = vmatpush3.bf16.msra.mxu0 %v7879_v17  ;;  %5968 = vmatprep.subr.bf16.mxu1 %v7882_v19  ;;  %v7951_v17 = vld [vmem:[#allocation14 + $0x8d4] ss:$28 sps:$4 sm:$0xff]  }
 0x4b9   :  { %7146 = vmatprep.subr.bf16.mxu0 %v7883_v20  ;;  %v7949_v19 = vld [vmem:[#allocation14 + $0x8d0] ss:$28 sps:$4 sm:$0xff]  }
 0x4ba   :  { %v7954_v20 = vld [vmem:[#allocation14 + $0x90c] ss:$28 sps:$4 sm:$0xff]  }
 0x4bb   :  { %5969 = vmatpush1.bf16.msra.mxu1 %v7880_v28  ;;  %v7952_v28 = vld [vmem:[#allocation14 + $0x908] ss:$28 sps:$4 sm:$0xff]  }
 0x4bc   :  { %7147 = vmatpush3.bf16.msra.mxu0 %v7884_v61  ;;  %5970 = vmatprep.subr.bf16.mxu1 %v7887_v30  ;;  %v7957_v61 = vld [vmem:[#allocation14 + $0x944] ss:$28 sps:$4 sm:$0xff]  }
 0x4bd   :  { %7154 = vmatprep.subr.bf16.mxu0 %v7888_v32  ;;  %v7955_v30 = vld [vmem:[#allocation14 + $0x940] ss:$28 sps:$4 sm:$0xff]  }
 0x4be   :  { %v7960_v32 = vld [vmem:[#allocation14 + $0x97c] ss:$28 sps:$4 sm:$0xff]  }
 0x4bf   :  { %6190 = vmatmul.mubr.bf16.vlgmr.msra.gmra.mrb[32].mxu0 %v8563_v16  ;;  %5971 = vmatpush1.bf16.msra.mxu1 %v7885_v35  ;;  %v7958_v35 = vld [vmem:[#allocation14 + $0x978] ss:$28 sps:$4 sm:$0xff]  }
 0x4c0   :  { %7155 = vmatpush3.bf16.msra.mxu0 %v7889_v36  ;;  %6229 = vmatprep.mubr.bf16.mxu0 %v8567_v51  ;;  %v7963_v36 = vld [vmem:[#allocation14 + $0x9b4] ss:$28 sps:$4 sm:$0xff]  }
 0x4c1   :  { %5972 = vmatprep.subr.bf16.mxu1 %v7892_v53  ;;  %7156 = vmatprep.subr.bf16.mxu0 %v7893_v38  ;;  %v7961_v53 = vld [vmem:[#allocation14 + $0x9b0] ss:$28 sps:$4 sm:$0xff]  }
 0x4c2   :  { %v7966_v38 = vld [vmem:[#allocation14 + $0x9ec] ss:$28 sps:$4 sm:$0xff]  }
 0x4c3   :  { %5973 = vmatpush1.bf16.msra.mxu1 %v7890_v39  ;;  %v7964_v39 = vld [vmem:[#allocation14 + $0x9e8] ss:$28 sps:$4 sm:$0xff]  }
 0x4c4   :  { %7157 = vmatpush3.bf16.msra.mxu0 %v7894_v43  ;;  %5974 = vmatprep.subr.bf16.mxu1 %v7897_v44  ;;  %v7969_v43 = vld [vmem:[#allocation14 + $0xa24] ss:$28 sps:$4 sm:$0xff]  }
 0x4c5   :  { %7158 = vmatprep.subr.bf16.mxu0 %v7898_v45  ;;  %v7967_v44 = vld [vmem:[#allocation14 + $0xa20] ss:$28 sps:$4 sm:$0xff]  }
 0x4c6   :  { %v7972_v45 = vld [vmem:[#allocation14 + $0xa5c] ss:$28 sps:$4 sm:$0xff]  }
 0x4c7   :  { %5975 = vmatpush1.bf16.msra.mxu1 %v7895_v46  ;;  %v7970_v46 = vld [vmem:[#allocation14 + $0xa58] ss:$28 sps:$4 sm:$0xff]  }
 0x4c8   :  { %7159 = vmatpush3.bf16.msra.mxu0 %v7899_v47  ;;  %5976 = vmatprep.subr.bf16.mxu1 %v7902_v48  ;;  %v7975_v47 = vld [vmem:[#allocation14 + $0xa94] ss:$28 sps:$4 sm:$0xff]  }
 0x4c9   :  { %7160 = vmatprep.subr.bf16.mxu0 %v7903_v50  ;;  %v7973_v48 = vld [vmem:[#allocation14 + $0xa90] ss:$28 sps:$4 sm:$0xff]  }
 0x4ca   :  { %v7978_v50 = vld [vmem:[#allocation14 + $0xacc] ss:$28 sps:$4 sm:$0xff]  }
 0x4cb   :  { %5977 = vmatpush1.bf16.msra.mxu1 %v7900_v54  ;;  %v7976_v54 = vld [vmem:[#allocation14 + $0xac8] ss:$28 sps:$4 sm:$0xff]  }
 0x4cc   :  { %7161 = vmatpush3.bf16.msra.mxu0 %v7904_v55  ;;  %5978 = vmatprep.subr.bf16.mxu1 %v7907_v56  ;;  %v7981_v55 = vld [vmem:[#allocation14 + $0xb04] ss:$28 sps:$4 sm:$0xff]  }
 0x4cd   :  { %7162 = vmatprep.subr.bf16.mxu0 %v7908_v57  ;;  %v7979_v56 = vld [vmem:[#allocation14 + $0xb00] ss:$28 sps:$4 sm:$0xff]  }
 0x4ce   :  { %v7984_v57 = vld [vmem:[#allocation14 + $0xb3c] ss:$28 sps:$4 sm:$0xff]  }
 0x4cf   :  { %5979 = vmatpush1.bf16.msra.mxu1 %v7905_v58  ;;  %v7982_v58 = vld [vmem:[#allocation14 + $0xb38] ss:$28 sps:$4 sm:$0xff]  }
 0x4d0   :  { %7163 = vmatpush3.bf16.msra.mxu0 %v7909_v4  ;;  %5980 = vmatprep.subr.bf16.mxu1 %v7912_v59  ;;  %v7987_v4 = vld [vmem:[#allocation14 + $0xb74] ss:$28 sps:$4 sm:$0xff]  }
 0x4d1   :  { %7164 = vmatprep.subr.bf16.mxu0 %v7913_v22  ;;  %v7985_v59 = vld [vmem:[#allocation14 + $0xb70] ss:$28 sps:$4 sm:$0xff]   ;;  %v8597_v22 = vld [vmem:[#allocation16] sm:$0xff] }
 0x4d3   :  { %5981 = vmatpush1.bf16.msra.mxu1 %v7910_v60  ;;  %v3257_v60 = vrot.slane %v8597_v22, %v8495_v49 }
 0x4d4   :  { %7165 = vmatpush3.bf16.msra.mxu0 %v7914_v62  ;;  %5982 = vmatprep.subr.bf16.mxu1 %v7917_v63  ;;  %v3253_v62 = vrot.slane %v8597_v22, %v8450_v42  ;;  %v3261_v63 = vrot.slane %v8597_v22, %v8498_v52  ;;  %v7996_v52 = vld [vmem:[#allocation14 + $0xc1c] ss:$28 sps:$4 sm:$0xff]  }
 0x4d5   :  { %7166 = vmatprep.subr.bf16.mxu0 %v7918_v0  ;;  %v7988_v0 = vld [vmem:[#allocation14 + $0xba8] ss:$28 sps:$4 sm:$0xff]  }
 0x4d7   :  { %5983 = vmatpush1.bf16.msra.mxu1 %v7915_v1  ;;  %v7993_v1 = vld [vmem:[#allocation14 + $0xbe4] ss:$28 sps:$4 sm:$0xff]  }
 0x4d8   :  { %7167 = vmatpush3.bf16.msra.mxu0 %v7919_v3  ;;  %5984 = vmatprep.subr.bf16.mxu1 %v7922_v6 }
 0x4d9   :  { %7168 = vmatprep.subr.bf16.mxu0 %v7923_v31 }
 0x4db   :  { %5985 = vmatpush1.bf16.msra.mxu1 %v7920_v25 }
 0x4dc   :  { %7169 = vmatpush3.bf16.msra.mxu0 %v7924_v5  ;;  %5995 = vmatprep.subr.bf16.mxu1 %v7927_v7 }
 0x4de   :  { %5987 = vmatmul.mubr.bf16.vlgmr.msra.gmra.mrb[12].mxu1 %v8545_v37  ;;  %v7942_v37 = vld [vmem:[#allocation14 + $0x82c] ss:$28 sps:$4 sm:$0xff]  }
 0x4df   :  { %6230 = vmatmul.mubr.bf16.vlgmr.msra.gmra.mrb[36].mxu0 %v8578_v41  ;;  %5996 = vmatpush1.bf16.msra.mxu1 %v7925_v8 }
 0x4e0   :  { %6027 = vmatprep.mubr.bf16.mxu1 %v8561_v11  ;;  %5997 = vmatprep.subr.bf16.mxu1 %v7930_v13  ;;  %v7943_v11 = vld [vmem:[#allocation14 + $0x860] ss:$28 sps:$4 sm:$0xff]  }
 0x4e3   :  { %5998 = vmatpush1.bf16.msra.mxu1 %v7928_v10  ;;  %v7991_v10 = vld [vmem:[#allocation14 + $0xbe0] ss:$28 sps:$4 sm:$0xff]  }
 0x4e4   :  { %5999 = vmatprep.subr.bf16.mxu1 %v7933_v12 }
 0x4e7   :  { %6000 = vmatpush1.bf16.msra.mxu1 %v7931_v29  ;;  %v7994_v29 = vld [vmem:[#allocation14 + $0xc18] ss:$28 sps:$4 sm:$0xff]  }
 0x4e8   :  { %6001 = vmatprep.subr.bf16.mxu1 %v7936_v18  ;;  %v7999_v18 = vld [vmem:[#allocation14 + $0xc54] ss:$28 sps:$4 sm:$0xff]  }
 0x4eb   :  { %6002 = vmatpush1.bf16.msra.mxu1 %v7934_v21  ;;  %v7997_v21 = vld [vmem:[#allocation14 + $0xc50] ss:$28 sps:$4 sm:$0xff]  }
 0x4ec   :  { %6003 = vmatprep.subr.bf16.mxu1 %v7939_v23  ;;  %v8002_v23 = vld [vmem:[#allocation14 + $0xc8c] ss:$28 sps:$4 sm:$0xff]  }
 0x4ef   :  { %6004 = vmatpush1.bf16.msra.mxu1 %v7937_v24 }
 0x4f0   :  { %6005 = vmatprep.subr.bf16.mxu1 %v7942_v37 }
 0x4f3   :  { %6006 = vmatpush1.bf16.msra.mxu1 %v7940_v26  ;;  %v8000_v26 = vld [vmem:[#allocation14 + $0xc88] ss:$28 sps:$4 sm:$0xff]  }
 0x4f4   :  { %6007 = vmatprep.subr.bf16.mxu1 %v7945_v27 }
 0x4f7   :  { %6008 = vmatpush1.bf16.msra.mxu1 %v7943_v11  ;;  %v8005_v11 = vld [vmem:[#allocation14 + $0xcc4] ss:$28 sps:$4 sm:$0xff]  }
 0x4f8   :  { %6009 = vmatprep.subr.bf16.mxu1 %v7948_v14 }
 0x4fb   :  { %6010 = vmatpush1.bf16.msra.mxu1 %v7946_v15 }
 0x4fc   :  { %6011 = vmatprep.subr.bf16.mxu1 %v7951_v17 }
 0x4ff   :  { %6012 = vmatpush1.bf16.msra.mxu1 %v7949_v19  ;;  %v8003_v19 = vld [vmem:[#allocation14 + $0xcc0] ss:$28 sps:$4 sm:$0xff]  }
 0x500   :  { %6013 = vmatprep.subr.bf16.mxu1 %v7954_v20  ;;  %v8008_v20 = vld [vmem:[#allocation14 + $0xcfc] ss:$28 sps:$4 sm:$0xff]  }
 0x503   :  { %6014 = vmatpush1.bf16.msra.mxu1 %v7952_v28  ;;  %v8006_v28 = vld [vmem:[#allocation14 + $0xcf8] ss:$28 sps:$4 sm:$0xff]  }
 0x504   :  { %6015 = vmatprep.subr.bf16.mxu1 %v7957_v61  ;;  %v8011_v61 = vld [vmem:[#allocation14 + $0xd34] ss:$28 sps:$4 sm:$0xff]  }
 0x507   :  { %6016 = vmatpush1.bf16.msra.mxu1 %v7955_v30  ;;  %v8009_v30 = vld [vmem:[#allocation14 + $0xd30] ss:$28 sps:$4 sm:$0xff]  }
 0x508   :  { %6017 = vmatprep.subr.bf16.mxu1 %v7960_v32  ;;  %v8014_v32 = vld [vmem:[#allocation14 + $0xd6c] ss:$28 sps:$4 sm:$0xff]  }
 0x50b   :  { %6018 = vmatpush1.bf16.msra.mxu1 %v7958_v35  ;;  %v8012_v35 = vld [vmem:[#allocation14 + $0xd68] ss:$28 sps:$4 sm:$0xff]  }
 0x50c   :  { %6019 = vmatprep.subr.bf16.mxu1 %v7963_v36  ;;  %v8017_v36 = vld [vmem:[#allocation14 + $0xda4] ss:$28 sps:$4 sm:$0xff]  }
 0x50f   :  { %6020 = vmatpush1.bf16.msra.mxu1 %v7961_v53 }
 0x510   :  { %6021 = vmatprep.subr.bf16.mxu1 %v7966_v38 }
 0x513   :  { %6022 = vmatpush1.bf16.msra.mxu1 %v7964_v39  ;;  %v8015_v39 = vld [vmem:[#allocation14 + $0xda0] ss:$28 sps:$4 sm:$0xff]  }
 0x514   :  { %6023 = vmatprep.subr.bf16.mxu1 %v7969_v43 }
 0x517   :  { %6024 = vmatpush1.bf16.msra.mxu1 %v7967_v44 }
 0x518   :  { %6025 = vmatprep.subr.bf16.mxu1 %v7972_v45  ;;  %v8020_v45 = vld [vmem:[#allocation14 + $0xddc] ss:$28 sps:$4 sm:$0xff]  }
 0x51b   :  { %6026 = vmatpush1.bf16.msra.mxu1 %v7970_v46 }
 0x51c   :  { %6036 = vmatprep.subr.bf16.mxu1 %v7975_v47  ;;  %v8018_v47 = vld [vmem:[#allocation14 + $0xdd8] ss:$28 sps:$4 sm:$0xff]  }
 0x51e   :  { %6028 = vmatmul.mubr.bf16.vlgmr.msra.gmra.mrb[12].mxu1 %v8563_v16  ;;  %v7990_v16 = vld [vmem:[#allocation14 + $0xbac] ss:$28 sps:$4 sm:$0xff]  }
 0x51f   :  { %6037 = vmatpush1.bf16.msra.mxu1 %v7973_v48  ;;  %6068 = vmatprep.mubr.bf16.mxu1 %v8567_v51  ;;  %v3249_v51 = vrot.slane %v8597_v22, %v8447_v40  ;;  %v3273_v48 = vrot.slane %v8597_v22, %v1086_v9 }
 0x520   :  { %6038 = vmatprep.subr.bf16.mxu1 %v7978_v50 }
 0x523   :  { %6039 = vmatpush1.bf16.msra.mxu1 %v7976_v54 }
 0x524   :  { %6040 = vmatprep.subr.bf16.mxu1 %v7981_v55 }
 0x527   :  { %6041 = vmatpush1.bf16.msra.mxu1 %v7979_v56 }
 0x528   :  { %6042 = vmatprep.subr.bf16.mxu1 %v7984_v57 }
 0x52b   :  { %6043 = vmatpush1.bf16.msra.mxu1 %v7982_v58 }
 0x52c   :  { %6044 = vmatprep.subr.bf16.mxu1 %v7987_v4 }
 0x52f   :  { %6045 = vmatpush1.bf16.msra.mxu1 %v7985_v59 }
 0x530   :  { %6046 = vmatprep.subr.bf16.mxu1 %v7990_v16 }
 0x531   :  { %v5742_v3 = vpop.f32.mrb[8].mxu1  ;;  %v5906_v6 = vpop.f32.mrb[20].mxu0 }
 0x532   :  { %v7184_v31 = vadd.f32 %v5742_v3, %v3249_v51  ;;  %v7186_v25 = vadd.f32 %v5906_v6, %v3257_v60  ;;  %v5744_v5 = vpop.f32.mrb[9].mxu1  ;;  %v5908_v7 = vpop.f32.mrb[21].mxu0 }
 0x533   :  { %v7185_v40 = vadd.f32 %v5744_v5, %v3253_v62  ;;  %v7187_v8 = vadd.f32 %v5908_v7, %v3261_v63  ;;  %v5746_v13 = vpop.f32.mrb[10].mxu1  ;;  %v5910_v49 = vpop.f32.mrb[22].mxu0  ;;  %6047 = vmatpush1.bf16.msra.mxu1 %v7988_v0  ;;  %v3265_v5 = vrot.slane %v8597_v22, %v1078_v2  ;;  %v3269_v7 = vrot.slane %v8597_v22, %v1082_v33 }
 0x534   :  { %8021 = vtanh.f32 %v7184_v31  ;;  %v5747_v42 = vpop.f32.mrb[11].mxu1  ;;  %v5911_v12 = vpop.f32.mrb[23].mxu0  ;;  %6048 = vmatprep.subr.bf16.mxu1 %v7993_v1 }
 0x535   :  { %8023 = vtanh.f32 %v7186_v25 }
 0x536   :  { %8025 = vtanh.f32 %v7185_v40 }
 0x537   :  { %8027 = vtanh.f32 %v7187_v8  ;;  %6049 = vmatpush1.bf16.msra.mxu1 %v7991_v10 }
 0x538   :  { %6050 = vmatprep.subr.bf16.mxu1 %v7996_v52 }
 0x53b   :  { %6051 = vmatpush1.bf16.msra.mxu1 %v7994_v29 }
 0x53c   :  { %6052 = vmatprep.subr.bf16.mxu1 %v7999_v18 }
 0x53e   :  { %v8022_v24 = vpop.eup %8021 }
 0x53f   :  { %v8024_v37 = vpop.eup %8023  ;;  %6053 = vmatpush1.bf16.msra.mxu1 %v7997_v21 }
 0x540   :  { %v8026_v27 = vpop.eup %8025  ;;  %6054 = vmatprep.subr.bf16.mxu1 %v8002_v23 }
 0x541   :  { %v8028_v14 = vpop.eup %8027  ;;  %v7084_v15 = vpack.c.bf16 %v8026_v27, %v8022_v24 }
 0x542   :  { %v7085_v17 = vpack.c.bf16 %v8028_v14, %v8024_v37 }
 0x543   :  { %6055 = vmatpush1.bf16.msra.mxu1 %v8000_v26  ;;  %6273 = vst [vmem:[#allocation17] sm:$0xff] %v7084_v15 }
 0x544   :  { %6056 = vmatprep.subr.bf16.mxu1 %v8005_v11  ;;  %6274 = vst [vmem:[#allocation17 + $0x8] sm:$0xff] %v7085_v17 }
 0x547   :  { %6057 = vmatpush1.bf16.msra.mxu1 %v8003_v19 }
 0x548   :  { %6058 = vmatprep.subr.bf16.mxu1 %v8008_v20 }
 0x54b   :  { %6059 = vmatpush1.bf16.msra.mxu1 %v8006_v28 }
 0x54c   :  { %6060 = vmatprep.subr.bf16.mxu1 %v8011_v61 }
 0x54f   :  { %6061 = vmatpush1.bf16.msra.mxu1 %v8009_v30 }
 0x550   :  { %6062 = vmatprep.subr.bf16.mxu1 %v8014_v32 }
 0x552   :  { %v7104_v53 = vpop.f32.mrb[24].mxu0 }
 0x553   :  { %v7105_v38 = vpop.f32.mrb[25].mxu0  ;;  %6063 = vmatpush1.bf16.msra.mxu1 %v8012_v35 }
 0x554   :  { %v7106_v43 = vadd.f32 %v7105_v38, %v7104_v53  ;;  %v7107_v44 = vpop.f32.mrb[26].mxu0  ;;  %6064 = vmatprep.subr.bf16.mxu1 %v8017_v36 }
 0x555   :  { %v7108_v46 = vpop.f32.mrb[27].mxu0 }
 0x556   :  { %v6112_v55 = vadd.f32 %v7106_v43, %v3273_v48 }
 0x557   :  { %6065 = vmatpush1.bf16.msra.mxu1 %v8015_v39 }
 0x558   :  { %6066 = vmatprep.subr.bf16.mxu1 %v8020_v45 }
 0x55b   :  { %6067 = vmatpush1.bf16.msra.mxu1 %v8018_v47 }
 0x55e   :  { %6069 = vmatmul.mubr.bf16.vlgmr.msra.gmra.mrb[12].mxu1 %v8578_v41 }
 0x572   :  { %v7126_v50 = vpop.f32.mrb[28].mxu0 }
 0x573   :  { %v7127_v54 = vpop.f32.mrb[29].mxu0 }
 0x574   :  { %v7128_v56 = vadd.f32 %v7127_v54, %v7126_v50  ;;  %v7129_v57 = vpop.f32.mrb[30].mxu0 }
 0x575   :  { %v7130_v58 = vpop.f32.mrb[31].mxu0 }
 0x576   :  { %v6152_v4 = vadd.f32 %v7128_v56, %v6112_v55 }
 0x592   :  { %v7148_v59 = vpop.f32.mrb[32].mxu0 }
 0x593   :  { %v7149_v16 = vpop.f32.mrb[33].mxu0 }
 0x594   :  { %v7150_v51 = vadd.f32 %v7149_v16, %v7148_v59  ;;  %v7151_v60 = vpop.f32.mrb[34].mxu0 }
 0x595   :  { %v7152_v62 = vpop.f32.mrb[35].mxu0 }
 0x596   :  { %v6192_v63 = vadd.f32 %v7150_v51, %v6152_v4 }
 0x5b2   :  { %v7170_v0 = vpop.f32.mrb[36].mxu0 }
 0x5b3   :  { %v7171_v1 = vpop.f32.mrb[37].mxu0 }
 0x5b4   :  { %v7172_v41 = vadd.f32 %v7171_v1, %v7170_v0  ;;  %v7173_v3 = vpop.f32.mrb[38].mxu0 }
 0x5b5   :  { %v7174_v6 = vpop.f32.mrb[39].mxu0 }
 0x5b6   :  { %v6232_v31 = vadd.f32 %v7172_v41, %v6192_v63 }
 0x5b8   :  { %8029 = vtanh.f32 %v6232_v31 }
 0x5c2   :  { %v8030_v9 = vpop.eup %8029 }
 0x5c3   :  { %v7087_v25 = vpack.c.bf16 %v8030_v9, %v8030_v9 }
 0x5c5   :  { %6276 = vst [vmem:[#allocation17 + $0x18] sm:$0xf] %v7087_v25 }
 0x631   :  { %v6070_v40 = vpop.f32.mrb[12].mxu1 }
 0x632   :  { %v7188_v8 = vadd.f32 %v6070_v40, %v3265_v5  ;;  %v6072_v13 = vpop.f32.mrb[13].mxu1 }
 0x633   :  { %v7189_v49 = vadd.f32 %v6072_v13, %v3269_v7  ;;  %v6074_v10 = vpop.f32.mrb[14].mxu1 }
 0x634   :  { %8031 = vtanh.f32 %v7188_v8  ;;  %v6075_v42 = vpop.f32.mrb[15].mxu1 }
 0x635   :  { %8033 = vtanh.f32 %v7189_v49 }
 0x63e   :  { %v8032_v12 = vpop.eup %8031 }
 0x63f   :  { %v8034_v52 = vpop.eup %8033 }
 0x640   :  { %v7086_v29 = vpack.c.bf16 %v8034_v52, %v8032_v12 }
 0x642   :  { %6275 = vst [vmem:[#allocation17 + $0x10] sm:$0xff] %v7086_v29 }
 0x643   :  { %8244 = shalt.err (!%p8241_p6)
}
 0x644   :  { %s8245_s22 = scalar_lea.hbm %s8638_s9, 448 }
 0x645   :  { %p8246_p7 = scmp.ne.s32.totalorder %s8638_s9, %s8245_s22  ;;  %p8249_p8 = scmp.lt.u32.totalorder %s8245_s22, %s8638_s9 }
 0x647   :  { %p8251_p9 = pnand %p8249_p8, %p8246_p7 }
 0x649   :  { %8254 = shalt.err (!%p8251_p9)
}
 0x64a   :  { %6286 = dma.vmem_to_hbm [thread:$0]  %s6284_s24, 448, %s8638_s9, [#allocation4]  }
 0x64b   :  { %8265 = dma.done.wait [#allocation4], 448  }
 0x64c   :  { %8266 = vsyncadd [#allocation4], 4294966848 }
 0x64d   :  { %6290 = vsyncpa [#allocation3], 1 }
 0x64e   :  { %6291 = vsyncpa [#allocation6], 1 }
 0x64f   :  { %6292 = vsyncpa [#allocation9], 1 }
 0x650   :  { %6293 = vsyncpa [#allocation12], 1 }
 0x651   :  { %6294 = vsyncpa [#allocation15], 1 }
 0x652   :  { %6295 = vsyncpa [#allocation4], 1 }

</bundles_post_ra>
